<compile_context>
chip_gen: v7x
topology: tpu7x:2x2x1
jax: 0.10.0
libtpu: 0.0.40
codegen_flags: <defaults>
</compile_context>

<pallas_src>
from functools import partial

import numpy as np
import jax
import jax.numpy as jnp
from jax.experimental import pallas as pl
from jax.experimental.pallas import tpu as pltpu  # noqa: F401  (TPU backend assumed)


# ----------------------------------------------------------------------------- kernel


def vit_kernel(patches_ref, wp_ref, posfull_ref, blockmask_ref, headmask_ref,
               wqkv_ref, wo_ref, ln1g_ref, ln1b_ref,
               w1_ref, b1_ref, w2_ref, b2_ref, ln2g_ref, ln2b_ref,
               clssel_ref, wh_ref, bh_ref, o_ref, *, num_heads, num_blocks, eps):
    """Whole ViT forward for the full batch in one invocation (everything VMEM-resident).

    patches_ref:  (R, token_dim)  R = B*T rows; cls rows are zero patches
    wp_ref:       (token_dim, E)
    posfull_ref:  (R, E)          cls token + positional emb + projection bias, pre-folded
    blockmask_ref:(R, R)          0 within a batch element, -1e30 across batch elements
    headmask_ref: (H, 1, E)       1.0 on the columns belonging to head h
    wqkv_ref:     (L, 3, E, E)    q/k/v projections, columns in (head, dim) order; sqrt(Dh)
                                  attention scale folded into the q slice
    wo_ref:       (L, E, E)       output projection
    ln*/w1/b1/w2/b2: stacked per-block LayerNorm / MLP params
    clssel_ref:   (B, R)          0/1 selector of the cls row of each batch element
    wh_ref, bh_ref: classification head
    o_ref:        (B, num_classes)
    """
    f32 = jnp.float32

    # ---- patch projection over all B*T rows at once + cls/pos/bias add (one fused pass) --
    z = jnp.dot(patches_ref[...], wp_ref[...],
                preferred_element_type=f32) + posfull_ref[...]          # (R, E)

    blockmask = blockmask_ref[...]                                      # (R, R)

    def layer_norm(y, g, b):
        mu = jnp.mean(y, axis=-1, keepdims=True)
        d = y - mu
        var = jnp.mean(d * d, axis=-1, keepdims=True)
        return d * jax.lax.rsqrt(var + eps) * g + b

    for l in range(num_blocks):                                         # static block loop
        # ---- multi-head attention, batch folded into rows -----------------------------
        q = jnp.dot(z, wqkv_ref[l, 0], preferred_element_type=f32)      # (R, E), scale folded
        k = jnp.dot(z, wqkv_ref[l, 1], preferred_element_type=f32)
        v = jnp.dot(z, wqkv_ref[l, 2], preferred_element_type=f32)

        ctx = jnp.zeros_like(z)
        for h in range(num_heads):                                      # static head loop
            m = headmask_ref[h]                                         # (1, E) column mask
            # masking the q columns restricts the contraction to head h's features
            e = jax.lax.dot_general(q * m, k, (((1,), (1,)), ((), ())),
                                    preferred_element_type=f32)         # (R, R)
            e = e + blockmask                                           # batch-local softmax
            e = e - jnp.max(e, axis=-1, keepdims=True)
            p = jnp.exp(e)
            s = jnp.sum(p, axis=-1, keepdims=True)
            c = jnp.dot(p, v, preferred_element_type=f32)               # (R, E)
            # normalise after p@v; reciprocal runs on the EUP slot.  The column mask keeps
            # only head h's slice, so summing over heads assembles the (h d)-ordered context.
            ctx = ctx + c * m * pl.reciprocal(s, approx=True)

        attn = jnp.dot(ctx, wo_ref[l], preferred_element_type=f32)      # single (E,E) out-proj
        z = layer_norm(z + attn, ln1g_ref[l], ln1b_ref[l])              # residual + LN1

        # ---- MLP (Linear -> GELU(tanh) -> Linear) + residual + LN2 --------------------
        hdn = jnp.dot(z, w1_ref[l], preferred_element_type=f32) + b1_ref[l]
        hdn = 0.5 * hdn * (1.0 + jnp.tanh(0.7978845608028654 *
                                          (hdn + 0.044715 * (hdn * hdn * hdn))))
        mlp = jnp.dot(hdn, w2_ref[l], preferred_element_type=f32) + b2_ref[l]
        z = layer_norm(z + mlp, ln2g_ref[l], ln2b_ref[l])

    # ---- classification head on the cls rows (gather-as-matmul, stays on the MXU) ------
    cls_feats = jnp.dot(clssel_ref[...], z, preferred_element_type=f32)   # (B, E)
    logits = jnp.dot(cls_feats, wh_ref[...], preferred_element_type=f32) + bh_ref[...]
    o_ref[...] = logits.astype(o_ref.dtype)


# ----------------------------------------------------------------------------- host prep


def prepare_params(params, *, head_num, batch_size):
    """One-time, host-side weight preprocessing (hoisted out of the jitted forward)."""
    E = params['proj_w'].shape[0]
    H = head_num
    Dh = E // H
    scale = float(Dh) ** 0.5                  # module multiplies scores by sqrt(Dh)
    T = params['pos_emb'].shape[0]            # num_tokens + 1
    B = batch_size
    R = B * T

    # cls token, positional embedding and projection bias folded into one (R, E) table.
    pos = params['pos_emb']
    cls = params['cls_token'].reshape(1, E)
    bp = params['proj_b'].reshape(1, E)
    pos_cls = jnp.concatenate([cls + pos[0:1], pos[1:] + bp], axis=0)    # (T, E)
    posfull = jnp.tile(pos_cls, (B, 1))                                  # (R, E)

    # per-block weights, stacked on a leading block axis.
    # qkv_layer output feature j = d*(3H) + k*H + h  (einops '(d k h)').
    wqkv_l, wo_l = [], []
    ln1g, ln1b, w1, b1, w2, b2, ln2g, ln2b = ([] for _ in range(8))
    for blk in params['blocks']:
        w = blk['qkv_w'].reshape(Dh, 3, H, E)                            # [d, k, h, e]
        wq = jnp.transpose(w[:, 0], (2, 1, 0)).reshape(E, E) * scale     # cols = h*Dh + d
        wk = jnp.transpose(w[:, 1], (2, 1, 0)).reshape(E, E)
        wv = jnp.transpose(w[:, 2], (2, 1, 0)).reshape(E, E)
        wqkv_l.append(jnp.stack([wq, wk, wv]))                           # (3, E, E)
        wo_l.append(jnp.transpose(blk['out_w'], (1, 0)))                 # (E, E)
        ln1g.append(blk['ln1_g'].reshape(1, E)); ln1b.append(blk['ln1_b'].reshape(1, E))
        w1.append(jnp.transpose(blk['w1'], (1, 0))); b1.append(blk['b1'].reshape(1, -1))
        w2.append(jnp.transpose(blk['w2'], (1, 0))); b2.append(blk['b2'].reshape(1, E))
        ln2g.append(blk['ln2_g'].reshape(1, E)); ln2b.append(blk['ln2_b'].reshape(1, E))

    # constant masks / selectors (built with numpy -> compile-time constants).
    headmask = np.zeros((H, 1, E), np.float32)
    for h in range(H):
        headmask[h, 0, h * Dh:(h + 1) * Dh] = 1.0
    blockmask = np.full((R, R), -1e30, np.float32)
    for b in range(B):
        blockmask[b * T:(b + 1) * T, b * T:(b + 1) * T] = 0.0
    clssel = np.zeros((B, R), np.float32)
    for b in range(B):
        clssel[b, b * T] = 1.0

    return {
        'wp': jnp.transpose(params['proj_w'], (1, 0)),                   # (token_dim, E)
        'posfull': posfull,
        'blockmask': jnp.asarray(blockmask),
        'headmask': jnp.asarray(headmask),
        'wqkv': jnp.stack(wqkv_l), 'wo': jnp.stack(wo_l),
        'ln1g': jnp.stack(ln1g), 'ln1b': jnp.stack(ln1b),
        'w1': jnp.stack(w1), 'b1': jnp.stack(b1),
        'w2': jnp.stack(w2), 'b2': jnp.stack(b2),
        'ln2g': jnp.stack(ln2g), 'ln2b': jnp.stack(ln2b),
        'clssel': jnp.asarray(clssel),
        'wh': jnp.transpose(params['head_w'], (1, 0)),                   # (E, num_classes)
        'bh': params['head_b'].reshape(1, -1),
    }


def vit_forward(x, pp, *, patch_dim, head_num):
    """ViT.forward (classification=True). x: (B, C, H, W) -> logits (B, num_classes)."""
    B, C, Hi, Wi = x.shape
    P = patch_dim
    hx, wy = Hi // P, Wi // P
    token_dim = C * P * P
    Tp = hx * wy
    T = Tp + 1
    L = pp['wqkv'].shape[0]
    num_classes = pp['wh'].shape[1]
    assert pp['posfull'].shape[0] == B * T, "prepare_params was built for a different batch"

    # glue: einops 'b c (px x) (py y) -> b (x y) (px py c)', plus one zero row per batch
    # element at the cls position so the projection matmul covers all B*T rows at once.
    patches = (x.reshape(B, C, P, hx, P, wy)
                .transpose(0, 3, 5, 2, 4, 1)
                .reshape(B, Tp, token_dim))
    patches_ext = jnp.pad(patches, ((0, 0), (1, 0), (0, 0))).reshape(B * T, token_dim)

    return pl.pallas_call(
        partial(vit_kernel, num_heads=head_num, num_blocks=L, eps=1e-5),
        out_shape=jax.ShapeDtypeStruct((B, num_classes), jnp.float32),
    )(patches_ext, pp['wp'], pp['posfull'], pp['blockmask'], pp['headmask'],
      pp['wqkv'], pp['wo'], pp['ln1g'], pp['ln1b'],
      pp['w1'], pp['b1'], pp['w2'], pp['b2'], pp['ln2g'], pp['ln2b'],
      pp['clssel'], pp['wh'], pp['bh'])


# ----------------------------------------------------------------------------- reference


def _layer_norm_ref(x, g, b, eps=1e-5):
    mu = jnp.mean(x, axis=-1, keepdims=True)
    var = jnp.mean((x - mu) ** 2, axis=-1, keepdims=True)
    return (x - mu) * jax.lax.rsqrt(var + eps) * g + b


def _gelu_tanh(x):
    return 0.5 * x * (1.0 + jnp.tanh(0.7978845608028654 * (x + 0.044715 * x ** 3)))


def _mm(a, b):
    return jnp.matmul(a, b, precision=jax.lax.Precision.HIGHEST)


def vit_reference(x, params, *, patch_dim, head_num):
    """Pure-JAX reference mirroring the PyTorch forward (eval mode)."""
    B, C, Hi, Wi = x.shape
    P = patch_dim
    hx, wy = Hi // P, Wi // P
    patches = (x.reshape(B, C, P, hx, P, wy)
                .transpose(0, 3, 5, 2, 4, 1)
                .reshape(B, hx * wy, P * P * C))
    z = _mm(patches, params['proj_w'].T) + params['proj_b']
    E = z.shape[-1]
    Dh = E // head_num
    cls = jnp.broadcast_to(params['cls_token'].reshape(1, 1, E), (B, 1, E))
    z = jnp.concatenate([cls, z], axis=1)
    T = z.shape[1]
    z = z + params['pos_emb'][:T]
    for blk in params['blocks']:
        qkv = _mm(z, blk['qkv_w'].T)                         # (B, T, 3E)
        qkv = qkv.reshape(B, T, Dh, 3, head_num)             # '(d k h)'
        q = jnp.transpose(qkv[:, :, :, 0, :], (0, 3, 1, 2))  # (B, H, T, Dh)
        k = jnp.transpose(qkv[:, :, :, 1, :], (0, 3, 1, 2))
        v = jnp.transpose(qkv[:, :, :, 2, :], (0, 3, 1, 2))
        energy = jnp.einsum('bhid,bhjd->bhij', q, k,
                            precision=jax.lax.Precision.HIGHEST) * (Dh ** 0.5)
        attn = jax.nn.softmax(energy, axis=-1)
        ctx = jnp.einsum('bhij,bhjd->bhid', attn, v,
                         precision=jax.lax.Precision.HIGHEST)
        ctx = jnp.transpose(ctx, (0, 2, 1, 3)).reshape(B, T, E)
        a = _mm(ctx, blk['out_w'].T)
        z = _layer_norm_ref(z + a, blk['ln1_g'], blk['ln1_b'])
        h = _gelu_tanh(_mm(z, blk['w1'].T) + blk['b1'])
        m = _mm(h, blk['w2'].T) + blk['b2']
        z = _layer_norm_ref(z + m, blk['ln2_g'], blk['ln2_b'])
    return _mm(z[:, 0, :], params['head_w'].T) + params['head_b']


# ----------------------------------------------------------------------------- main


if __name__ == "__main__":
    # ViT(img_dim=16, in_channels=3, embedding_dim=32, head_num=4, mlp_dim=64,
    #     block_num=2, patch_dim=4, classification=True, num_classes=10)
    img_dim, in_channels, patch_dim = 16, 3, 4
    embedding_dim, head_num, mlp_dim, block_num = 32, 4, 64, 2
    num_classes = 10
    B = 2

    token_dim = in_channels * patch_dim ** 2
    num_tokens = (img_dim // patch_dim) ** 2

    key = jax.random.PRNGKey(0)
    keys = jax.random.split(key, 7 + 10 * block_num)
    ki = iter(keys)

    def nrm(shape, s):
        return s * jax.random.normal(next(ki), shape, jnp.float32)

    params = {
        'proj_w': nrm((embedding_dim, token_dim), 0.1),
        'proj_b': nrm((embedding_dim,), 0.1),
        'cls_token': nrm((1, 1, embedding_dim), 1.0),
        'pos_emb': jax.random.uniform(next(ki), (num_tokens + 1, embedding_dim),
                                      jnp.float32),
        'head_w': nrm((num_classes, embedding_dim), 0.1),
        'head_b': nrm((num_classes,), 0.1),
        'blocks': [],
    }
    for _ in range(block_num):
        params['blocks'].append({
            'qkv_w': nrm((3 * embedding_dim, embedding_dim), 0.1),
            'out_w': nrm((embedding_dim, embedding_dim), 0.1),
            'ln1_g': 1.0 + nrm((embedding_dim,), 0.05),
            'ln1_b': nrm((embedding_dim,), 0.05),
            'w1': nrm((mlp_dim, embedding_dim), 0.1),
            'b1': nrm((mlp_dim,), 0.05),
            'w2': nrm((embedding_dim, mlp_dim), 0.1),
            'b2': nrm((embedding_dim,), 0.05),
            'ln2_g': 1.0 + nrm((embedding_dim,), 0.05),
            'ln2_b': nrm((embedding_dim,), 0.05),
        })

    x = jax.random.normal(next(ki), (B, in_channels, img_dim, img_dim), jnp.float32)

    # one-time host-side weight preparation (outside the jitted forward)
    pp = prepare_params(params, head_num=head_num, batch_size=B)

    fwd = jax.jit(partial(vit_forward, patch_dim=patch_dim, head_num=head_num))
    logits = fwd(x, pp)
    jax.block_until_ready(logits)

    ref = vit_reference(x, params, patch_dim=patch_dim, head_num=head_num)
    assert logits.shape == (B, num_classes), logits.shape
    max_err = float(jnp.max(jnp.abs(logits - ref)))
    assert jnp.allclose(logits, ref, atol=5e-3, rtol=5e-3), f"max abs err {max_err}"

    print("KERNEL_OK")
</pallas_src>

<mosaic_0001>
module attributes {stable_mosaic.version = 11 : i64} {
  func.func @vit_kernel(%arg0: memref<34x48xf32, #tpu.memory_space<vmem>>, %arg1: memref<48x32xf32, #tpu.memory_space<vmem>>, %arg2: memref<34x32xf32, #tpu.memory_space<vmem>>, %arg3: memref<34x34xf32, #tpu.memory_space<vmem>>, %arg4: memref<4x1x32xf32, #tpu.memory_space<vmem>>, %arg5: memref<2x3x32x32xf32, #tpu.memory_space<vmem>>, %arg6: memref<2x32x32xf32, #tpu.memory_space<vmem>>, %arg7: memref<2x1x32xf32, #tpu.memory_space<vmem>>, %arg8: memref<2x1x32xf32, #tpu.memory_space<vmem>>, %arg9: memref<2x32x64xf32, #tpu.memory_space<vmem>>, %arg10: memref<2x1x64xf32, #tpu.memory_space<vmem>>, %arg11: memref<2x64x32xf32, #tpu.memory_space<vmem>>, %arg12: memref<2x1x32xf32, #tpu.memory_space<vmem>>, %arg13: memref<2x1x32xf32, #tpu.memory_space<vmem>>, %arg14: memref<2x1x32xf32, #tpu.memory_space<vmem>>, %arg15: memref<2x34xf32, #tpu.memory_space<vmem>>, %arg16: memref<32x10xf32, #tpu.memory_space<vmem>>, %arg17: memref<1x10xf32, #tpu.memory_space<vmem>>, %arg18: memref<2x10xf32, #tpu.memory_space<vmem>>) attributes {dimension_semantics = [], scalar_prefetch = 0 : i64, scratch_operands = 0 : i64, tpu.core_type = #tpu.core_type<tc>} {
    %c0 = arith.constant 0 : index
    %c0_0 = arith.constant 0 : index
    %0 = vector.load %arg0[%c0, %c0_0] : memref<34x48xf32, #tpu.memory_space<vmem>>, vector<34x48xf32>
    %c0_1 = arith.constant 0 : index
    %c0_2 = arith.constant 0 : index
    %1 = vector.load %arg1[%c0_1, %c0_2] : memref<48x32xf32, #tpu.memory_space<vmem>>, vector<48x32xf32>
    %cst = arith.constant dense<0.000000e+00> : vector<34x32xf32>
    %2 = tpu.matmul %0, %1, %cst {dimension_numbers = #tpu.dot_dimension_numbers<[1], [0], [0], [1], [0, 0, 1, 1], [], []>} : vector<34x48xf32>, vector<48x32xf32>, vector<34x32xf32> -> vector<34x32xf32>
    %c0_3 = arith.constant 0 : index
    %c0_4 = arith.constant 0 : index
    %3 = vector.load %arg2[%c0_3, %c0_4] : memref<34x32xf32, #tpu.memory_space<vmem>>, vector<34x32xf32>
    %4 = arith.addf %2, %3 : vector<34x32xf32>
    %c0_5 = arith.constant 0 : index
    %c0_6 = arith.constant 0 : index
    %5 = vector.load %arg3[%c0_5, %c0_6] : memref<34x34xf32, #tpu.memory_space<vmem>>, vector<34x34xf32>
    %c0_7 = arith.constant 0 : index
    %c0_8 = arith.constant 0 : index
    %c0_9 = arith.constant 0 : index
    %c0_10 = arith.constant 0 : index
    %6 = vector.load %arg5[%c0_7, %c0_8, %c0_9, %c0_10] : memref<2x3x32x32xf32, #tpu.memory_space<vmem>>, vector<1x1x32x32xf32>
    %7 = vector.shape_cast %6 : vector<1x1x32x32xf32> to vector<32x32xf32>
    %cst_11 = arith.constant dense<0.000000e+00> : vector<34x32xf32>
    %8 = tpu.matmul %4, %7, %cst_11 {dimension_numbers = #tpu.dot_dimension_numbers<[1], [0], [0], [1], [0, 0, 1, 1], [], []>} : vector<34x32xf32>, vector<32x32xf32>, vector<34x32xf32> -> vector<34x32xf32>
    %c0_12 = arith.constant 0 : index
    %c1 = arith.constant 1 : index
    %c0_13 = arith.constant 0 : index
    %c0_14 = arith.constant 0 : index
    %9 = vector.load %arg5[%c0_12, %c1, %c0_13, %c0_14] : memref<2x3x32x32xf32, #tpu.memory_space<vmem>>, vector<1x1x32x32xf32>
    %10 = vector.shape_cast %9 : vector<1x1x32x32xf32> to vector<32x32xf32>
    %cst_15 = arith.constant dense<0.000000e+00> : vector<34x32xf32>
    %11 = tpu.matmul %4, %10, %cst_15 {dimension_numbers = #tpu.dot_dimension_numbers<[1], [0], [0], [1], [0, 0, 1, 1], [], []>} : vector<34x32xf32>, vector<32x32xf32>, vector<34x32xf32> -> vector<34x32xf32>
    %c0_16 = arith.constant 0 : index
    %c2 = arith.constant 2 : index
    %c0_17 = arith.constant 0 : index
    %c0_18 = arith.constant 0 : index
    %12 = vector.load %arg5[%c0_16, %c2, %c0_17, %c0_18] : memref<2x3x32x32xf32, #tpu.memory_space<vmem>>, vector<1x1x32x32xf32>
    %13 = vector.shape_cast %12 : vector<1x1x32x32xf32> to vector<32x32xf32>
    %cst_19 = arith.constant dense<0.000000e+00> : vector<34x32xf32>
    %14 = tpu.matmul %4, %13, %cst_19 {dimension_numbers = #tpu.dot_dimension_numbers<[1], [0], [0], [1], [0, 0, 1, 1], [], []>} : vector<34x32xf32>, vector<32x32xf32>, vector<34x32xf32> -> vector<34x32xf32>
    %cst_20 = arith.constant 0.000000e+00 : f32
    %15 = vector.broadcast %cst_20 : f32 to vector<34x32xf32>
    %c0_21 = arith.constant 0 : index
    %c0_22 = arith.constant 0 : index
    %c0_23 = arith.constant 0 : index
    %16 = vector.load %arg4[%c0_21, %c0_22, %c0_23] : memref<4x1x32xf32, #tpu.memory_space<vmem>>, vector<1x1x32xf32>
    %17 = vector.shape_cast %16 : vector<1x1x32xf32> to vector<1x32xf32>
    %18 = vector.broadcast %17 : vector<1x32xf32> to vector<34x32xf32>
    %19 = arith.mulf %8, %18 : vector<34x32xf32>
    %cst_24 = arith.constant dense<0.000000e+00> : vector<34x34xf32>
    %20 = tpu.matmul %19, %11, %cst_24 {dimension_numbers = #tpu.dot_dimension_numbers<[1], [1], [0], [0], [0, 0, 1, 0], [], []>} : vector<34x32xf32>, vector<34x32xf32>, vector<34x34xf32> -> vector<34x34xf32>
    %21 = arith.addf %20, %5 : vector<34x34xf32>
    %cst_25 = arith.constant dense<0xFF800000> : vector<34xf32>
    %22 = vector.multi_reduction <maximumf>, %21, %cst_25 [1] : vector<34x34xf32> to vector<34xf32>
    %23 = vector.shape_cast %22 : vector<34xf32> to vector<34x1xf32>
    %24 = vector.broadcast %23 : vector<34x1xf32> to vector<34x34xf32>
    %25 = arith.subf %21, %24 : vector<34x34xf32>
    %26 = math.exp %25 : vector<34x34xf32>
    %cst_26 = arith.constant dense<0.000000e+00> : vector<34xf32>
    %27 = vector.multi_reduction <add>, %26, %cst_26 [1] : vector<34x34xf32> to vector<34xf32>
    %28 = vector.shape_cast %27 : vector<34xf32> to vector<34x1xf32>
    %cst_27 = arith.constant dense<0.000000e+00> : vector<34x32xf32>
    %29 = tpu.matmul %26, %14, %cst_27 {dimension_numbers = #tpu.dot_dimension_numbers<[1], [0], [0], [1], [0, 0, 1, 1], [], []>} : vector<34x34xf32>, vector<34x32xf32>, vector<34x32xf32> -> vector<34x32xf32>
    %30 = vector.broadcast %17 : vector<1x32xf32> to vector<34x32xf32>
    %31 = arith.mulf %29, %30 : vector<34x32xf32>
    %32 = tpu.reciprocal %28 {approx = true} : vector<34x1xf32> -> vector<34x1xf32>
    %33 = vector.broadcast %32 : vector<34x1xf32> to vector<34x32xf32>
    %34 = arith.mulf %31, %33 : vector<34x32xf32>
    %35 = arith.addf %15, %34 : vector<34x32xf32>
    %c1_28 = arith.constant 1 : index
    %c0_29 = arith.constant 0 : index
    %c0_30 = arith.constant 0 : index
    %36 = vector.load %arg4[%c1_28, %c0_29, %c0_30] : memref<4x1x32xf32, #tpu.memory_space<vmem>>, vector<1x1x32xf32>
    %37 = vector.shape_cast %36 : vector<1x1x32xf32> to vector<1x32xf32>
    %38 = vector.broadcast %37 : vector<1x32xf32> to vector<34x32xf32>
    %39 = arith.mulf %8, %38 : vector<34x32xf32>
    %cst_31 = arith.constant dense<0.000000e+00> : vector<34x34xf32>
    %40 = tpu.matmul %39, %11, %cst_31 {dimension_numbers = #tpu.dot_dimension_numbers<[1], [1], [0], [0], [0, 0, 1, 0], [], []>} : vector<34x32xf32>, vector<34x32xf32>, vector<34x34xf32> -> vector<34x34xf32>
    %41 = arith.addf %40, %5 : vector<34x34xf32>
    %cst_32 = arith.constant dense<0xFF800000> : vector<34xf32>
    %42 = vector.multi_reduction <maximumf>, %41, %cst_32 [1] : vector<34x34xf32> to vector<34xf32>
    %43 = vector.shape_cast %42 : vector<34xf32> to vector<34x1xf32>
    %44 = vector.broadcast %43 : vector<34x1xf32> to vector<34x34xf32>
    %45 = arith.subf %41, %44 : vector<34x34xf32>
    %46 = math.exp %45 : vector<34x34xf32>
    %cst_33 = arith.constant dense<0.000000e+00> : vector<34xf32>
    %47 = vector.multi_reduction <add>, %46, %cst_33 [1] : vector<34x34xf32> to vector<34xf32>
    %48 = vector.shape_cast %47 : vector<34xf32> to vector<34x1xf32>
    %cst_34 = arith.constant dense<0.000000e+00> : vector<34x32xf32>
    %49 = tpu.matmul %46, %14, %cst_34 {dimension_numbers = #tpu.dot_dimension_numbers<[1], [0], [0], [1], [0, 0, 1, 1], [], []>} : vector<34x34xf32>, vector<34x32xf32>, vector<34x32xf32> -> vector<34x32xf32>
    %50 = vector.broadcast %37 : vector<1x32xf32> to vector<34x32xf32>
    %51 = arith.mulf %49, %50 : vector<34x32xf32>
    %52 = tpu.reciprocal %48 {approx = true} : vector<34x1xf32> -> vector<34x1xf32>
    %53 = vector.broadcast %52 : vector<34x1xf32> to vector<34x32xf32>
    %54 = arith.mulf %51, %53 : vector<34x32xf32>
    %55 = arith.addf %35, %54 : vector<34x32xf32>
    %c2_35 = arith.constant 2 : index
    %c0_36 = arith.constant 0 : index
    %c0_37 = arith.constant 0 : index
    %56 = vector.load %arg4[%c2_35, %c0_36, %c0_37] : memref<4x1x32xf32, #tpu.memory_space<vmem>>, vector<1x1x32xf32>
    %57 = vector.shape_cast %56 : vector<1x1x32xf32> to vector<1x32xf32>
    %58 = vector.broadcast %57 : vector<1x32xf32> to vector<34x32xf32>
    %59 = arith.mulf %8, %58 : vector<34x32xf32>
    %cst_38 = arith.constant dense<0.000000e+00> : vector<34x34xf32>
    %60 = tpu.matmul %59, %11, %cst_38 {dimension_numbers = #tpu.dot_dimension_numbers<[1], [1], [0], [0], [0, 0, 1, 0], [], []>} : vector<34x32xf32>, vector<34x32xf32>, vector<34x34xf32> -> vector<34x34xf32>
    %61 = arith.addf %60, %5 : vector<34x34xf32>
    %cst_39 = arith.constant dense<0xFF800000> : vector<34xf32>
    %62 = vector.multi_reduction <maximumf>, %61, %cst_39 [1] : vector<34x34xf32> to vector<34xf32>
    %63 = vector.shape_cast %62 : vector<34xf32> to vector<34x1xf32>
    %64 = vector.broadcast %63 : vector<34x1xf32> to vector<34x34xf32>
    %65 = arith.subf %61, %64 : vector<34x34xf32>
    %66 = math.exp %65 : vector<34x34xf32>
    %cst_40 = arith.constant dense<0.000000e+00> : vector<34xf32>
    %67 = vector.multi_reduction <add>, %66, %cst_40 [1] : vector<34x34xf32> to vector<34xf32>
    %68 = vector.shape_cast %67 : vector<34xf32> to vector<34x1xf32>
    %cst_41 = arith.constant dense<0.000000e+00> : vector<34x32xf32>
    %69 = tpu.matmul %66, %14, %cst_41 {dimension_numbers = #tpu.dot_dimension_numbers<[1], [0], [0], [1], [0, 0, 1, 1], [], []>} : vector<34x34xf32>, vector<34x32xf32>, vector<34x32xf32> -> vector<34x32xf32>
    %70 = vector.broadcast %57 : vector<1x32xf32> to vector<34x32xf32>
    %71 = arith.mulf %69, %70 : vector<34x32xf32>
    %72 = tpu.reciprocal %68 {approx = true} : vector<34x1xf32> -> vector<34x1xf32>
    %73 = vector.broadcast %72 : vector<34x1xf32> to vector<34x32xf32>
    %74 = arith.mulf %71, %73 : vector<34x32xf32>
    %75 = arith.addf %55, %74 : vector<34x32xf32>
    %c3 = arith.constant 3 : index
    %c0_42 = arith.constant 0 : index
    %c0_43 = arith.constant 0 : index
    %76 = vector.load %arg4[%c3, %c0_42, %c0_43] : memref<4x1x32xf32, #tpu.memory_space<vmem>>, vector<1x1x32xf32>
    %77 = vector.shape_cast %76 : vector<1x1x32xf32> to vector<1x32xf32>
    %78 = vector.broadcast %77 : vector<1x32xf32> to vector<34x32xf32>
    %79 = arith.mulf %8, %78 : vector<34x32xf32>
    %cst_44 = arith.constant dense<0.000000e+00> : vector<34x34xf32>
    %80 = tpu.matmul %79, %11, %cst_44 {dimension_numbers = #tpu.dot_dimension_numbers<[1], [1], [0], [0], [0, 0, 1, 0], [], []>} : vector<34x32xf32>, vector<34x32xf32>, vector<34x34xf32> -> vector<34x34xf32>
    %81 = arith.addf %80, %5 : vector<34x34xf32>
    %cst_45 = arith.constant dense<0xFF800000> : vector<34xf32>
    %82 = vector.multi_reduction <maximumf>, %81, %cst_45 [1] : vector<34x34xf32> to vector<34xf32>
    %83 = vector.shape_cast %82 : vector<34xf32> to vector<34x1xf32>
    %84 = vector.broadcast %83 : vector<34x1xf32> to vector<34x34xf32>
    %85 = arith.subf %81, %84 : vector<34x34xf32>
    %86 = math.exp %85 : vector<34x34xf32>
    %cst_46 = arith.constant dense<0.000000e+00> : vector<34xf32>
    %87 = vector.multi_reduction <add>, %86, %cst_46 [1] : vector<34x34xf32> to vector<34xf32>
    %88 = vector.shape_cast %87 : vector<34xf32> to vector<34x1xf32>
    %cst_47 = arith.constant dense<0.000000e+00> : vector<34x32xf32>
    %89 = tpu.matmul %86, %14, %cst_47 {dimension_numbers = #tpu.dot_dimension_numbers<[1], [0], [0], [1], [0, 0, 1, 1], [], []>} : vector<34x34xf32>, vector<34x32xf32>, vector<34x32xf32> -> vector<34x32xf32>
    %90 = vector.broadcast %77 : vector<1x32xf32> to vector<34x32xf32>
    %91 = arith.mulf %89, %90 : vector<34x32xf32>
    %92 = tpu.reciprocal %88 {approx = true} : vector<34x1xf32> -> vector<34x1xf32>
    %93 = vector.broadcast %92 : vector<34x1xf32> to vector<34x32xf32>
    %94 = arith.mulf %91, %93 : vector<34x32xf32>
    %95 = arith.addf %75, %94 : vector<34x32xf32>
    %c0_48 = arith.constant 0 : index
    %c0_49 = arith.constant 0 : index
    %c0_50 = arith.constant 0 : index
    %96 = vector.load %arg6[%c0_48, %c0_49, %c0_50] : memref<2x32x32xf32, #tpu.memory_space<vmem>>, vector<1x32x32xf32>
    %97 = vector.shape_cast %96 : vector<1x32x32xf32> to vector<32x32xf32>
    %cst_51 = arith.constant dense<0.000000e+00> : vector<34x32xf32>
    %98 = tpu.matmul %95, %97, %cst_51 {dimension_numbers = #tpu.dot_dimension_numbers<[1], [0], [0], [1], [0, 0, 1, 1], [], []>} : vector<34x32xf32>, vector<32x32xf32>, vector<34x32xf32> -> vector<34x32xf32>
    %99 = arith.addf %4, %98 : vector<34x32xf32>
    %c0_52 = arith.constant 0 : index
    %c0_53 = arith.constant 0 : index
    %c0_54 = arith.constant 0 : index
    %100 = vector.load %arg7[%c0_52, %c0_53, %c0_54] : memref<2x1x32xf32, #tpu.memory_space<vmem>>, vector<1x1x32xf32>
    %101 = vector.shape_cast %100 : vector<1x1x32xf32> to vector<1x32xf32>
    %c0_55 = arith.constant 0 : index
    %c0_56 = arith.constant 0 : index
    %c0_57 = arith.constant 0 : index
    %102 = vector.load %arg8[%c0_55, %c0_56, %c0_57] : memref<2x1x32xf32, #tpu.memory_space<vmem>>, vector<1x1x32xf32>
    %103 = vector.shape_cast %102 : vector<1x1x32xf32> to vector<1x32xf32>
    %cst_58 = arith.constant dense<0.000000e+00> : vector<34xf32>
    %104 = vector.multi_reduction <add>, %99, %cst_58 [1] : vector<34x32xf32> to vector<34xf32>
    %105 = vector.shape_cast %104 : vector<34xf32> to vector<34x1xf32>
    %cst_59 = arith.constant 3.200000e+01 : f32
    %106 = vector.broadcast %cst_59 : f32 to vector<34x1xf32>
    %107 = arith.divf %105, %106 : vector<34x1xf32>
    %108 = vector.broadcast %107 : vector<34x1xf32> to vector<34x32xf32>
    %109 = arith.subf %99, %108 : vector<34x32xf32>
    %110 = arith.mulf %109, %109 : vector<34x32xf32>
    %cst_60 = arith.constant dense<0.000000e+00> : vector<34xf32>
    %111 = vector.multi_reduction <add>, %110, %cst_60 [1] : vector<34x32xf32> to vector<34xf32>
    %112 = vector.shape_cast %111 : vector<34xf32> to vector<34x1xf32>
    %cst_61 = arith.constant 3.200000e+01 : f32
    %113 = vector.broadcast %cst_61 : f32 to vector<34x1xf32>
    %114 = arith.divf %112, %113 : vector<34x1xf32>
    %cst_62 = arith.constant 9.99999974E-6 : f32
    %115 = vector.broadcast %cst_62 : f32 to vector<34x1xf32>
    %116 = arith.addf %114, %115 : vector<34x1xf32>
    %117 = math.rsqrt %116 : vector<34x1xf32>
    %118 = vector.broadcast %117 : vector<34x1xf32> to vector<34x32xf32>
    %119 = arith.mulf %109, %118 : vector<34x32xf32>
    %120 = vector.broadcast %101 : vector<1x32xf32> to vector<34x32xf32>
    %121 = arith.mulf %119, %120 : vector<34x32xf32>
    %122 = vector.broadcast %103 : vector<1x32xf32> to vector<34x32xf32>
    %123 = arith.addf %121, %122 : vector<34x32xf32>
    %c0_63 = arith.constant 0 : index
    %c0_64 = arith.constant 0 : index
    %c0_65 = arith.constant 0 : index
    %124 = vector.load %arg9[%c0_63, %c0_64, %c0_65] : memref<2x32x64xf32, #tpu.memory_space<vmem>>, vector<1x32x64xf32>
    %125 = vector.shape_cast %124 : vector<1x32x64xf32> to vector<32x64xf32>
    %cst_66 = arith.constant dense<0.000000e+00> : vector<34x64xf32>
    %126 = tpu.matmul %123, %125, %cst_66 {dimension_numbers = #tpu.dot_dimension_numbers<[1], [0], [0], [1], [0, 0, 1, 1], [], []>} : vector<34x32xf32>, vector<32x64xf32>, vector<34x64xf32> -> vector<34x64xf32>
    %c0_67 = arith.constant 0 : index
    %c0_68 = arith.constant 0 : index
    %c0_69 = arith.constant 0 : index
    %127 = vector.load %arg10[%c0_67, %c0_68, %c0_69] : memref<2x1x64xf32, #tpu.memory_space<vmem>>, vector<1x1x64xf32>
    %128 = vector.shape_cast %127 : vector<1x1x64xf32> to vector<1x64xf32>
    %129 = vector.broadcast %128 : vector<1x64xf32> to vector<34x64xf32>
    %130 = arith.addf %126, %129 : vector<34x64xf32>
    %cst_70 = arith.constant 5.000000e-01 : f32
    %131 = vector.broadcast %cst_70 : f32 to vector<34x64xf32>
    %132 = arith.mulf %131, %130 : vector<34x64xf32>
    %133 = arith.mulf %130, %130 : vector<34x64xf32>
    %134 = arith.mulf %133, %130 : vector<34x64xf32>
    %cst_71 = arith.constant 4.471500e-02 : f32
    %135 = vector.broadcast %cst_71 : f32 to vector<34x64xf32>
    %136 = arith.mulf %135, %134 : vector<34x64xf32>
    %137 = arith.addf %130, %136 : vector<34x64xf32>
    %cst_72 = arith.constant 0.797884583 : f32
    %138 = vector.broadcast %cst_72 : f32 to vector<34x64xf32>
    %139 = arith.mulf %138, %137 : vector<34x64xf32>
    %140 = math.tanh %139 : vector<34x64xf32>
    %cst_73 = arith.constant 1.000000e+00 : f32
    %141 = vector.broadcast %cst_73 : f32 to vector<34x64xf32>
    %142 = arith.addf %141, %140 : vector<34x64xf32>
    %143 = arith.mulf %132, %142 : vector<34x64xf32>
    %c0_74 = arith.constant 0 : index
    %c0_75 = arith.constant 0 : index
    %c0_76 = arith.constant 0 : index
    %144 = vector.load %arg11[%c0_74, %c0_75, %c0_76] : memref<2x64x32xf32, #tpu.memory_space<vmem>>, vector<1x64x32xf32>
    %145 = vector.shape_cast %144 : vector<1x64x32xf32> to vector<64x32xf32>
    %cst_77 = arith.constant dense<0.000000e+00> : vector<34x32xf32>
    %146 = tpu.matmul %143, %145, %cst_77 {dimension_numbers = #tpu.dot_dimension_numbers<[1], [0], [0], [1], [0, 0, 1, 1], [], []>} : vector<34x64xf32>, vector<64x32xf32>, vector<34x32xf32> -> vector<34x32xf32>
    %c0_78 = arith.constant 0 : index
    %c0_79 = arith.constant 0 : index
    %c0_80 = arith.constant 0 : index
    %147 = vector.load %arg12[%c0_78, %c0_79, %c0_80] : memref<2x1x32xf32, #tpu.memory_space<vmem>>, vector<1x1x32xf32>
    %148 = vector.shape_cast %147 : vector<1x1x32xf32> to vector<1x32xf32>
    %149 = vector.broadcast %148 : vector<1x32xf32> to vector<34x32xf32>
    %150 = arith.addf %146, %149 : vector<34x32xf32>
    %151 = arith.addf %123, %150 : vector<34x32xf32>
    %c0_81 = arith.constant 0 : index
    %c0_82 = arith.constant 0 : index
    %c0_83 = arith.constant 0 : index
    %152 = vector.load %arg13[%c0_81, %c0_82, %c0_83] : memref<2x1x32xf32, #tpu.memory_space<vmem>>, vector<1x1x32xf32>
    %153 = vector.shape_cast %152 : vector<1x1x32xf32> to vector<1x32xf32>
    %c0_84 = arith.constant 0 : index
    %c0_85 = arith.constant 0 : index
    %c0_86 = arith.constant 0 : index
    %154 = vector.load %arg14[%c0_84, %c0_85, %c0_86] : memref<2x1x32xf32, #tpu.memory_space<vmem>>, vector<1x1x32xf32>
    %155 = vector.shape_cast %154 : vector<1x1x32xf32> to vector<1x32xf32>
    %cst_87 = arith.constant dense<0.000000e+00> : vector<34xf32>
    %156 = vector.multi_reduction <add>, %151, %cst_87 [1] : vector<34x32xf32> to vector<34xf32>
    %157 = vector.shape_cast %156 : vector<34xf32> to vector<34x1xf32>
    %cst_88 = arith.constant 3.200000e+01 : f32
    %158 = vector.broadcast %cst_88 : f32 to vector<34x1xf32>
    %159 = arith.divf %157, %158 : vector<34x1xf32>
    %160 = vector.broadcast %159 : vector<34x1xf32> to vector<34x32xf32>
    %161 = arith.subf %151, %160 : vector<34x32xf32>
    %162 = arith.mulf %161, %161 : vector<34x32xf32>
    %cst_89 = arith.constant dense<0.000000e+00> : vector<34xf32>
    %163 = vector.multi_reduction <add>, %162, %cst_89 [1] : vector<34x32xf32> to vector<34xf32>
    %164 = vector.shape_cast %163 : vector<34xf32> to vector<34x1xf32>
    %cst_90 = arith.constant 3.200000e+01 : f32
    %165 = vector.broadcast %cst_90 : f32 to vector<34x1xf32>
    %166 = arith.divf %164, %165 : vector<34x1xf32>
    %cst_91 = arith.constant 9.99999974E-6 : f32
    %167 = vector.broadcast %cst_91 : f32 to vector<34x1xf32>
    %168 = arith.addf %166, %167 : vector<34x1xf32>
    %169 = math.rsqrt %168 : vector<34x1xf32>
    %170 = vector.broadcast %169 : vector<34x1xf32> to vector<34x32xf32>
    %171 = arith.mulf %161, %170 : vector<34x32xf32>
    %172 = vector.broadcast %153 : vector<1x32xf32> to vector<34x32xf32>
    %173 = arith.mulf %171, %172 : vector<34x32xf32>
    %174 = vector.broadcast %155 : vector<1x32xf32> to vector<34x32xf32>
    %175 = arith.addf %173, %174 : vector<34x32xf32>
    %c1_92 = arith.constant 1 : index
    %c0_93 = arith.constant 0 : index
    %c0_94 = arith.constant 0 : index
    %c0_95 = arith.constant 0 : index
    %176 = vector.load %arg5[%c1_92, %c0_93, %c0_94, %c0_95] : memref<2x3x32x32xf32, #tpu.memory_space<vmem>>, vector<1x1x32x32xf32>
    %177 = vector.shape_cast %176 : vector<1x1x32x32xf32> to vector<32x32xf32>
    %cst_96 = arith.constant dense<0.000000e+00> : vector<34x32xf32>
    %178 = tpu.matmul %175, %177, %cst_96 {dimension_numbers = #tpu.dot_dimension_numbers<[1], [0], [0], [1], [0, 0, 1, 1], [], []>} : vector<34x32xf32>, vector<32x32xf32>, vector<34x32xf32> -> vector<34x32xf32>
    %c1_97 = arith.constant 1 : index
    %c1_98 = arith.constant 1 : index
    %c0_99 = arith.constant 0 : index
    %c0_100 = arith.constant 0 : index
    %179 = vector.load %arg5[%c1_97, %c1_98, %c0_99, %c0_100] : memref<2x3x32x32xf32, #tpu.memory_space<vmem>>, vector<1x1x32x32xf32>
    %180 = vector.shape_cast %179 : vector<1x1x32x32xf32> to vector<32x32xf32>
    %cst_101 = arith.constant dense<0.000000e+00> : vector<34x32xf32>
    %181 = tpu.matmul %175, %180, %cst_101 {dimension_numbers = #tpu.dot_dimension_numbers<[1], [0], [0], [1], [0, 0, 1, 1], [], []>} : vector<34x32xf32>, vector<32x32xf32>, vector<34x32xf32> -> vector<34x32xf32>
    %c1_102 = arith.constant 1 : index
    %c2_103 = arith.constant 2 : index
    %c0_104 = arith.constant 0 : index
    %c0_105 = arith.constant 0 : index
    %182 = vector.load %arg5[%c1_102, %c2_103, %c0_104, %c0_105] : memref<2x3x32x32xf32, #tpu.memory_space<vmem>>, vector<1x1x32x32xf32>
    %183 = vector.shape_cast %182 : vector<1x1x32x32xf32> to vector<32x32xf32>
    %cst_106 = arith.constant dense<0.000000e+00> : vector<34x32xf32>
    %184 = tpu.matmul %175, %183, %cst_106 {dimension_numbers = #tpu.dot_dimension_numbers<[1], [0], [0], [1], [0, 0, 1, 1], [], []>} : vector<34x32xf32>, vector<32x32xf32>, vector<34x32xf32> -> vector<34x32xf32>
    %cst_107 = arith.constant 0.000000e+00 : f32
    %185 = vector.broadcast %cst_107 : f32 to vector<34x32xf32>
    %c0_108 = arith.constant 0 : index
    %c0_109 = arith.constant 0 : index
    %c0_110 = arith.constant 0 : index
    %186 = vector.load %arg4[%c0_108, %c0_109, %c0_110] : memref<4x1x32xf32, #tpu.memory_space<vmem>>, vector<1x1x32xf32>
    %187 = vector.shape_cast %186 : vector<1x1x32xf32> to vector<1x32xf32>
    %188 = vector.broadcast %187 : vector<1x32xf32> to vector<34x32xf32>
    %189 = arith.mulf %178, %188 : vector<34x32xf32>
    %cst_111 = arith.constant dense<0.000000e+00> : vector<34x34xf32>
    %190 = tpu.matmul %189, %181, %cst_111 {dimension_numbers = #tpu.dot_dimension_numbers<[1], [1], [0], [0], [0, 0, 1, 0], [], []>} : vector<34x32xf32>, vector<34x32xf32>, vector<34x34xf32> -> vector<34x34xf32>
    %191 = arith.addf %190, %5 : vector<34x34xf32>
    %cst_112 = arith.constant dense<0xFF800000> : vector<34xf32>
    %192 = vector.multi_reduction <maximumf>, %191, %cst_112 [1] : vector<34x34xf32> to vector<34xf32>
    %193 = vector.shape_cast %192 : vector<34xf32> to vector<34x1xf32>
    %194 = vector.broadcast %193 : vector<34x1xf32> to vector<34x34xf32>
    %195 = arith.subf %191, %194 : vector<34x34xf32>
    %196 = math.exp %195 : vector<34x34xf32>
    %cst_113 = arith.constant dense<0.000000e+00> : vector<34xf32>
    %197 = vector.multi_reduction <add>, %196, %cst_113 [1] : vector<34x34xf32> to vector<34xf32>
    %198 = vector.shape_cast %197 : vector<34xf32> to vector<34x1xf32>
    %cst_114 = arith.constant dense<0.000000e+00> : vector<34x32xf32>
    %199 = tpu.matmul %196, %184, %cst_114 {dimension_numbers = #tpu.dot_dimension_numbers<[1], [0], [0], [1], [0, 0, 1, 1], [], []>} : vector<34x34xf32>, vector<34x32xf32>, vector<34x32xf32> -> vector<34x32xf32>
    %200 = vector.broadcast %187 : vector<1x32xf32> to vector<34x32xf32>
    %201 = arith.mulf %199, %200 : vector<34x32xf32>
    %202 = tpu.reciprocal %198 {approx = true} : vector<34x1xf32> -> vector<34x1xf32>
    %203 = vector.broadcast %202 : vector<34x1xf32> to vector<34x32xf32>
    %204 = arith.mulf %201, %203 : vector<34x32xf32>
    %205 = arith.addf %185, %204 : vector<34x32xf32>
    %c1_115 = arith.constant 1 : index
    %c0_116 = arith.constant 0 : index
    %c0_117 = arith.constant 0 : index
    %206 = vector.load %arg4[%c1_115, %c0_116, %c0_117] : memref<4x1x32xf32, #tpu.memory_space<vmem>>, vector<1x1x32xf32>
    %207 = vector.shape_cast %206 : vector<1x1x32xf32> to vector<1x32xf32>
    %208 = vector.broadcast %207 : vector<1x32xf32> to vector<34x32xf32>
    %209 = arith.mulf %178, %208 : vector<34x32xf32>
    %cst_118 = arith.constant dense<0.000000e+00> : vector<34x34xf32>
    %210 = tpu.matmul %209, %181, %cst_118 {dimension_numbers = #tpu.dot_dimension_numbers<[1], [1], [0], [0], [0, 0, 1, 0], [], []>} : vector<34x32xf32>, vector<34x32xf32>, vector<34x34xf32> -> vector<34x34xf32>
    %211 = arith.addf %210, %5 : vector<34x34xf32>
    %cst_119 = arith.constant dense<0xFF800000> : vector<34xf32>
    %212 = vector.multi_reduction <maximumf>, %211, %cst_119 [1] : vector<34x34xf32> to vector<34xf32>
    %213 = vector.shape_cast %212 : vector<34xf32> to vector<34x1xf32>
    %214 = vector.broadcast %213 : vector<34x1xf32> to vector<34x34xf32>
    %215 = arith.subf %211, %214 : vector<34x34xf32>
    %216 = math.exp %215 : vector<34x34xf32>
    %cst_120 = arith.constant dense<0.000000e+00> : vector<34xf32>
    %217 = vector.multi_reduction <add>, %216, %cst_120 [1] : vector<34x34xf32> to vector<34xf32>
    %218 = vector.shape_cast %217 : vector<34xf32> to vector<34x1xf32>
    %cst_121 = arith.constant dense<0.000000e+00> : vector<34x32xf32>
    %219 = tpu.matmul %216, %184, %cst_121 {dimension_numbers = #tpu.dot_dimension_numbers<[1], [0], [0], [1], [0, 0, 1, 1], [], []>} : vector<34x34xf32>, vector<34x32xf32>, vector<34x32xf32> -> vector<34x32xf32>
    %220 = vector.broadcast %207 : vector<1x32xf32> to vector<34x32xf32>
    %221 = arith.mulf %219, %220 : vector<34x32xf32>
    %222 = tpu.reciprocal %218 {approx = true} : vector<34x1xf32> -> vector<34x1xf32>
    %223 = vector.broadcast %222 : vector<34x1xf32> to vector<34x32xf32>
    %224 = arith.mulf %221, %223 : vector<34x32xf32>
    %225 = arith.addf %205, %224 : vector<34x32xf32>
    %c2_122 = arith.constant 2 : index
    %c0_123 = arith.constant 0 : index
    %c0_124 = arith.constant 0 : index
    %226 = vector.load %arg4[%c2_122, %c0_123, %c0_124] : memref<4x1x32xf32, #tpu.memory_space<vmem>>, vector<1x1x32xf32>
    %227 = vector.shape_cast %226 : vector<1x1x32xf32> to vector<1x32xf32>
    %228 = vector.broadcast %227 : vector<1x32xf32> to vector<34x32xf32>
    %229 = arith.mulf %178, %228 : vector<34x32xf32>
    %cst_125 = arith.constant dense<0.000000e+00> : vector<34x34xf32>
    %230 = tpu.matmul %229, %181, %cst_125 {dimension_numbers = #tpu.dot_dimension_numbers<[1], [1], [0], [0], [0, 0, 1, 0], [], []>} : vector<34x32xf32>, vector<34x32xf32>, vector<34x34xf32> -> vector<34x34xf32>
    %231 = arith.addf %230, %5 : vector<34x34xf32>
    %cst_126 = arith.constant dense<0xFF800000> : vector<34xf32>
    %232 = vector.multi_reduction <maximumf>, %231, %cst_126 [1] : vector<34x34xf32> to vector<34xf32>
    %233 = vector.shape_cast %232 : vector<34xf32> to vector<34x1xf32>
    %234 = vector.broadcast %233 : vector<34x1xf32> to vector<34x34xf32>
    %235 = arith.subf %231, %234 : vector<34x34xf32>
    %236 = math.exp %235 : vector<34x34xf32>
    %cst_127 = arith.constant dense<0.000000e+00> : vector<34xf32>
    %237 = vector.multi_reduction <add>, %236, %cst_127 [1] : vector<34x34xf32> to vector<34xf32>
    %238 = vector.shape_cast %237 : vector<34xf32> to vector<34x1xf32>
    %cst_128 = arith.constant dense<0.000000e+00> : vector<34x32xf32>
    %239 = tpu.matmul %236, %184, %cst_128 {dimension_numbers = #tpu.dot_dimension_numbers<[1], [0], [0], [1], [0, 0, 1, 1], [], []>} : vector<34x34xf32>, vector<34x32xf32>, vector<34x32xf32> -> vector<34x32xf32>
    %240 = vector.broadcast %227 : vector<1x32xf32> to vector<34x32xf32>
    %241 = arith.mulf %239, %240 : vector<34x32xf32>
    %242 = tpu.reciprocal %238 {approx = true} : vector<34x1xf32> -> vector<34x1xf32>
    %243 = vector.broadcast %242 : vector<34x1xf32> to vector<34x32xf32>
    %244 = arith.mulf %241, %243 : vector<34x32xf32>
    %245 = arith.addf %225, %244 : vector<34x32xf32>
    %c3_129 = arith.constant 3 : index
    %c0_130 = arith.constant 0 : index
    %c0_131 = arith.constant 0 : index
    %246 = vector.load %arg4[%c3_129, %c0_130, %c0_131] : memref<4x1x32xf32, #tpu.memory_space<vmem>>, vector<1x1x32xf32>
    %247 = vector.shape_cast %246 : vector<1x1x32xf32> to vector<1x32xf32>
    %248 = vector.broadcast %247 : vector<1x32xf32> to vector<34x32xf32>
    %249 = arith.mulf %178, %248 : vector<34x32xf32>
    %cst_132 = arith.constant dense<0.000000e+00> : vector<34x34xf32>
    %250 = tpu.matmul %249, %181, %cst_132 {dimension_numbers = #tpu.dot_dimension_numbers<[1], [1], [0], [0], [0, 0, 1, 0], [], []>} : vector<34x32xf32>, vector<34x32xf32>, vector<34x34xf32> -> vector<34x34xf32>
    %251 = arith.addf %250, %5 : vector<34x34xf32>
    %cst_133 = arith.constant dense<0xFF800000> : vector<34xf32>
    %252 = vector.multi_reduction <maximumf>, %251, %cst_133 [1] : vector<34x34xf32> to vector<34xf32>
    %253 = vector.shape_cast %252 : vector<34xf32> to vector<34x1xf32>
    %254 = vector.broadcast %253 : vector<34x1xf32> to vector<34x34xf32>
    %255 = arith.subf %251, %254 : vector<34x34xf32>
    %256 = math.exp %255 : vector<34x34xf32>
    %cst_134 = arith.constant dense<0.000000e+00> : vector<34xf32>
    %257 = vector.multi_reduction <add>, %256, %cst_134 [1] : vector<34x34xf32> to vector<34xf32>
    %258 = vector.shape_cast %257 : vector<34xf32> to vector<34x1xf32>
    %cst_135 = arith.constant dense<0.000000e+00> : vector<34x32xf32>
    %259 = tpu.matmul %256, %184, %cst_135 {dimension_numbers = #tpu.dot_dimension_numbers<[1], [0], [0], [1], [0, 0, 1, 1], [], []>} : vector<34x34xf32>, vector<34x32xf32>, vector<34x32xf32> -> vector<34x32xf32>
    %260 = vector.broadcast %247 : vector<1x32xf32> to vector<34x32xf32>
    %261 = arith.mulf %259, %260 : vector<34x32xf32>
    %262 = tpu.reciprocal %258 {approx = true} : vector<34x1xf32> -> vector<34x1xf32>
    %263 = vector.broadcast %262 : vector<34x1xf32> to vector<34x32xf32>
    %264 = arith.mulf %261, %263 : vector<34x32xf32>
    %265 = arith.addf %245, %264 : vector<34x32xf32>
    %c1_136 = arith.constant 1 : index
    %c0_137 = arith.constant 0 : index
    %c0_138 = arith.constant 0 : index
    %266 = vector.load %arg6[%c1_136, %c0_137, %c0_138] : memref<2x32x32xf32, #tpu.memory_space<vmem>>, vector<1x32x32xf32>
    %267 = vector.shape_cast %266 : vector<1x32x32xf32> to vector<32x32xf32>
    %cst_139 = arith.constant dense<0.000000e+00> : vector<34x32xf32>
    %268 = tpu.matmul %265, %267, %cst_139 {dimension_numbers = #tpu.dot_dimension_numbers<[1], [0], [0], [1], [0, 0, 1, 1], [], []>} : vector<34x32xf32>, vector<32x32xf32>, vector<34x32xf32> -> vector<34x32xf32>
    %269 = arith.addf %175, %268 : vector<34x32xf32>
    %c1_140 = arith.constant 1 : index
    %c0_141 = arith.constant 0 : index
    %c0_142 = arith.constant 0 : index
    %270 = vector.load %arg7[%c1_140, %c0_141, %c0_142] : memref<2x1x32xf32, #tpu.memory_space<vmem>>, vector<1x1x32xf32>
    %271 = vector.shape_cast %270 : vector<1x1x32xf32> to vector<1x32xf32>
    %c1_143 = arith.constant 1 : index
    %c0_144 = arith.constant 0 : index
    %c0_145 = arith.constant 0 : index
    %272 = vector.load %arg8[%c1_143, %c0_144, %c0_145] : memref<2x1x32xf32, #tpu.memory_space<vmem>>, vector<1x1x32xf32>
    %273 = vector.shape_cast %272 : vector<1x1x32xf32> to vector<1x32xf32>
    %cst_146 = arith.constant dense<0.000000e+00> : vector<34xf32>
    %274 = vector.multi_reduction <add>, %269, %cst_146 [1] : vector<34x32xf32> to vector<34xf32>
    %275 = vector.shape_cast %274 : vector<34xf32> to vector<34x1xf32>
    %cst_147 = arith.constant 3.200000e+01 : f32
    %276 = vector.broadcast %cst_147 : f32 to vector<34x1xf32>
    %277 = arith.divf %275, %276 : vector<34x1xf32>
    %278 = vector.broadcast %277 : vector<34x1xf32> to vector<34x32xf32>
    %279 = arith.subf %269, %278 : vector<34x32xf32>
    %280 = arith.mulf %279, %279 : vector<34x32xf32>
    %cst_148 = arith.constant dense<0.000000e+00> : vector<34xf32>
    %281 = vector.multi_reduction <add>, %280, %cst_148 [1] : vector<34x32xf32> to vector<34xf32>
    %282 = vector.shape_cast %281 : vector<34xf32> to vector<34x1xf32>
    %cst_149 = arith.constant 3.200000e+01 : f32
    %283 = vector.broadcast %cst_149 : f32 to vector<34x1xf32>
    %284 = arith.divf %282, %283 : vector<34x1xf32>
    %cst_150 = arith.constant 9.99999974E-6 : f32
    %285 = vector.broadcast %cst_150 : f32 to vector<34x1xf32>
    %286 = arith.addf %284, %285 : vector<34x1xf32>
    %287 = math.rsqrt %286 : vector<34x1xf32>
    %288 = vector.broadcast %287 : vector<34x1xf32> to vector<34x32xf32>
    %289 = arith.mulf %279, %288 : vector<34x32xf32>
    %290 = vector.broadcast %271 : vector<1x32xf32> to vector<34x32xf32>
    %291 = arith.mulf %289, %290 : vector<34x32xf32>
    %292 = vector.broadcast %273 : vector<1x32xf32> to vector<34x32xf32>
    %293 = arith.addf %291, %292 : vector<34x32xf32>
    %c1_151 = arith.constant 1 : index
    %c0_152 = arith.constant 0 : index
    %c0_153 = arith.constant 0 : index
    %294 = vector.load %arg9[%c1_151, %c0_152, %c0_153] : memref<2x32x64xf32, #tpu.memory_space<vmem>>, vector<1x32x64xf32>
    %295 = vector.shape_cast %294 : vector<1x32x64xf32> to vector<32x64xf32>
    %cst_154 = arith.constant dense<0.000000e+00> : vector<34x64xf32>
    %296 = tpu.matmul %293, %295, %cst_154 {dimension_numbers = #tpu.dot_dimension_numbers<[1], [0], [0], [1], [0, 0, 1, 1], [], []>} : vector<34x32xf32>, vector<32x64xf32>, vector<34x64xf32> -> vector<34x64xf32>
    %c1_155 = arith.constant 1 : index
    %c0_156 = arith.constant 0 : index
    %c0_157 = arith.constant 0 : index
    %297 = vector.load %arg10[%c1_155, %c0_156, %c0_157] : memref<2x1x64xf32, #tpu.memory_space<vmem>>, vector<1x1x64xf32>
    %298 = vector.shape_cast %297 : vector<1x1x64xf32> to vector<1x64xf32>
    %299 = vector.broadcast %298 : vector<1x64xf32> to vector<34x64xf32>
    %300 = arith.addf %296, %299 : vector<34x64xf32>
    %cst_158 = arith.constant 5.000000e-01 : f32
    %301 = vector.broadcast %cst_158 : f32 to vector<34x64xf32>
    %302 = arith.mulf %301, %300 : vector<34x64xf32>
    %303 = arith.mulf %300, %300 : vector<34x64xf32>
    %304 = arith.mulf %303, %300 : vector<34x64xf32>
    %cst_159 = arith.constant 4.471500e-02 : f32
    %305 = vector.broadcast %cst_159 : f32 to vector<34x64xf32>
    %306 = arith.mulf %305, %304 : vector<34x64xf32>
    %307 = arith.addf %300, %306 : vector<34x64xf32>
    %cst_160 = arith.constant 0.797884583 : f32
    %308 = vector.broadcast %cst_160 : f32 to vector<34x64xf32>
    %309 = arith.mulf %308, %307 : vector<34x64xf32>
    %310 = math.tanh %309 : vector<34x64xf32>
    %cst_161 = arith.constant 1.000000e+00 : f32
    %311 = vector.broadcast %cst_161 : f32 to vector<34x64xf32>
    %312 = arith.addf %311, %310 : vector<34x64xf32>
    %313 = arith.mulf %302, %312 : vector<34x64xf32>
    %c1_162 = arith.constant 1 : index
    %c0_163 = arith.constant 0 : index
    %c0_164 = arith.constant 0 : index
    %314 = vector.load %arg11[%c1_162, %c0_163, %c0_164] : memref<2x64x32xf32, #tpu.memory_space<vmem>>, vector<1x64x32xf32>
    %315 = vector.shape_cast %314 : vector<1x64x32xf32> to vector<64x32xf32>
    %cst_165 = arith.constant dense<0.000000e+00> : vector<34x32xf32>
    %316 = tpu.matmul %313, %315, %cst_165 {dimension_numbers = #tpu.dot_dimension_numbers<[1], [0], [0], [1], [0, 0, 1, 1], [], []>} : vector<34x64xf32>, vector<64x32xf32>, vector<34x32xf32> -> vector<34x32xf32>
    %c1_166 = arith.constant 1 : index
    %c0_167 = arith.constant 0 : index
    %c0_168 = arith.constant 0 : index
    %317 = vector.load %arg12[%c1_166, %c0_167, %c0_168] : memref<2x1x32xf32, #tpu.memory_space<vmem>>, vector<1x1x32xf32>
    %318 = vector.shape_cast %317 : vector<1x1x32xf32> to vector<1x32xf32>
    %319 = vector.broadcast %318 : vector<1x32xf32> to vector<34x32xf32>
    %320 = arith.addf %316, %319 : vector<34x32xf32>
    %321 = arith.addf %293, %320 : vector<34x32xf32>
    %c1_169 = arith.constant 1 : index
    %c0_170 = arith.constant 0 : index
    %c0_171 = arith.constant 0 : index
    %322 = vector.load %arg13[%c1_169, %c0_170, %c0_171] : memref<2x1x32xf32, #tpu.memory_space<vmem>>, vector<1x1x32xf32>
    %323 = vector.shape_cast %322 : vector<1x1x32xf32> to vector<1x32xf32>
    %c1_172 = arith.constant 1 : index
    %c0_173 = arith.constant 0 : index
    %c0_174 = arith.constant 0 : index
    %324 = vector.load %arg14[%c1_172, %c0_173, %c0_174] : memref<2x1x32xf32, #tpu.memory_space<vmem>>, vector<1x1x32xf32>
    %325 = vector.shape_cast %324 : vector<1x1x32xf32> to vector<1x32xf32>
    %cst_175 = arith.constant dense<0.000000e+00> : vector<34xf32>
    %326 = vector.multi_reduction <add>, %321, %cst_175 [1] : vector<34x32xf32> to vector<34xf32>
    %327 = vector.shape_cast %326 : vector<34xf32> to vector<34x1xf32>
    %cst_176 = arith.constant 3.200000e+01 : f32
    %328 = vector.broadcast %cst_176 : f32 to vector<34x1xf32>
    %329 = arith.divf %327, %328 : vector<34x1xf32>
    %330 = vector.broadcast %329 : vector<34x1xf32> to vector<34x32xf32>
    %331 = arith.subf %321, %330 : vector<34x32xf32>
    %332 = arith.mulf %331, %331 : vector<34x32xf32>
    %cst_177 = arith.constant dense<0.000000e+00> : vector<34xf32>
    %333 = vector.multi_reduction <add>, %332, %cst_177 [1] : vector<34x32xf32> to vector<34xf32>
    %334 = vector.shape_cast %333 : vector<34xf32> to vector<34x1xf32>
    %cst_178 = arith.constant 3.200000e+01 : f32
    %335 = vector.broadcast %cst_178 : f32 to vector<34x1xf32>
    %336 = arith.divf %334, %335 : vector<34x1xf32>
    %cst_179 = arith.constant 9.99999974E-6 : f32
    %337 = vector.broadcast %cst_179 : f32 to vector<34x1xf32>
    %338 = arith.addf %336, %337 : vector<34x1xf32>
    %339 = math.rsqrt %338 : vector<34x1xf32>
    %340 = vector.broadcast %339 : vector<34x1xf32> to vector<34x32xf32>
    %341 = arith.mulf %331, %340 : vector<34x32xf32>
    %342 = vector.broadcast %323 : vector<1x32xf32> to vector<34x32xf32>
    %343 = arith.mulf %341, %342 : vector<34x32xf32>
    %344 = vector.broadcast %325 : vector<1x32xf32> to vector<34x32xf32>
    %345 = arith.addf %343, %344 : vector<34x32xf32>
    %c0_180 = arith.constant 0 : index
    %c0_181 = arith.constant 0 : index
    %346 = vector.load %arg15[%c0_180, %c0_181] : memref<2x34xf32, #tpu.memory_space<vmem>>, vector<2x34xf32>
    %cst_182 = arith.constant dense<0.000000e+00> : vector<2x32xf32>
    %347 = tpu.matmul %346, %345, %cst_182 {dimension_numbers = #tpu.dot_dimension_numbers<[1], [0], [0], [1], [0, 0, 1, 1], [], []>} : vector<2x34xf32>, vector<34x32xf32>, vector<2x32xf32> -> vector<2x32xf32>
    %c0_183 = arith.constant 0 : index
    %c0_184 = arith.constant 0 : index
    %348 = vector.load %arg16[%c0_183, %c0_184] : memref<32x10xf32, #tpu.memory_space<vmem>>, vector<32x10xf32>
    %cst_185 = arith.constant dense<0.000000e+00> : vector<2x10xf32>
    %349 = tpu.matmul %347, %348, %cst_185 {dimension_numbers = #tpu.dot_dimension_numbers<[1], [0], [0], [1], [0, 0, 1, 1], [], []>} : vector<2x32xf32>, vector<32x10xf32>, vector<2x10xf32> -> vector<2x10xf32>
    %c0_186 = arith.constant 0 : index
    %c0_187 = arith.constant 0 : index
    %350 = vector.load %arg17[%c0_186, %c0_187] : memref<1x10xf32, #tpu.memory_space<vmem>>, vector<1x10xf32>
    %351 = vector.broadcast %350 : vector<1x10xf32> to vector<2x10xf32>
    %352 = arith.addf %349, %351 : vector<2x10xf32>
    %c0_188 = arith.constant 0 : index
    %c0_189 = arith.constant 0 : index
    %353 = vector.load %arg18[%c0_188, %c0_189] : memref<2x10xf32, #tpu.memory_space<vmem>>, vector<2x10xf32>
    tpu.vector_store %arg18[%c0_188, %c0_189], %352 {strides = array<i32>} : memref<2x10xf32, #tpu.memory_space<vmem>>, vector<2x10xf32>,
    return
  }
}

</mosaic_0001>

<bundles_post_ra>
// kernel: vit_forward.1
= control target key start
LH: loop header
LB: loop body
LE: loop exit
PB: predicated region body
PF: predicated region fallthrough
CT: control target
= control target key end

     0   :  { %s7969_s0 = inlined_call_operand.vmem [shape: f32[34,48], index: 0, kind: input, shape index: {}]   ;;  %s7970_s1 = inlined_call_operand.vmem [shape: f32[48,32], index: 1, kind: input, shape index: {}]   ;;  %s7971_s2 = inlined_call_operand.vmem [shape: f32[34,32], index: 2, kind: input, shape index: {}]   ;;  %s7972_s3 = inlined_call_operand.vmem [shape: f32[34,34], index: 3, kind: input, shape index: {}]   ;;  %s7973_s4 = inlined_call_operand.vmem [shape: f32[4,1,32], index: 4, kind: input, shape index: {}]   ;;  %s7974_s5 = inlined_call_operand.vmem [shape: f32[2,3,32,32], index: 5, kind: input, shape index: {}]   ;;  %s7975_s6 = inlined_call_operand.vmem [shape: f32[2,32,32], index: 6, kind: input, shape index: {}]   ;;  %s7976_s7 = inlined_call_operand.vmem [shape: f32[2,1,32], index: 7, kind: input, shape index: {}]   ;;  %s7977_s8 = inlined_call_operand.vmem [shape: f32[2,1,32], index: 8, kind: input, shape index: {}]   ;;  %s7978_s9 = inlined_call_operand.vmem [shape: f32[2,32,64], index: 9, kind: input, shape index: {}]   ;;  %s7979_s10 = inlined_call_operand.vmem [shape: f32[2,1,64], index: 10, kind: input, shape index: {}]   ;;  %s7980_s11 = inlined_call_operand.vmem [shape: f32[2,64,32], index: 11, kind: input, shape index: {}]   ;;  %s7981_s12 = inlined_call_operand.vmem [shape: f32[2,1,32], index: 12, kind: input, shape index: {}]   ;;  %s7982_s13 = inlined_call_operand.vmem [shape: f32[2,1,32], index: 13, kind: input, shape index: {}]   ;;  %s7983_s14 = inlined_call_operand.vmem [shape: f32[2,1,32], index: 14, kind: input, shape index: {}]   ;;  %s7984_s15 = inlined_call_operand.vmem [shape: f32[2,34], index: 15, kind: input, shape index: {}]   ;;  %s7985_s16 = inlined_call_operand.vmem [shape: f32[32,10], index: 16, kind: input, shape index: {}]   ;;  %s7986_s17 = inlined_call_operand.vmem [shape: f32[1,10], index: 17, kind: input, shape index: {}]   ;;  %s7987_s18 = inlined_call_operand.hbm [shape: f32[2,10], index: 18, kind: output, shape index: {}]  }
   0x1   :  { %7991 = sst [smem:[#allocation5_spill]] %s7969_s0 }
   0x2   :  { %7992 = sst [smem:[#allocation6_spill]] %s7970_s1 }
   0x3   :  { %7993 = sst [smem:[#allocation7_spill]] %s7971_s2 }
   0x4   :  { %s7994_s29 = sld [smem:[#allocation6_spill]]  ;;  %v6215_v3 = vmov 0.0|0.0   ;;  %vm6216_vm0 = vmmov 0   ;;  %v6217_v6 = vmov 0.0   ;;  %v187_v8 = vld [vmem:[%s7974_s5] sm:$0xff]  ;;  %v188_v11 = vld [vmem:[%s7974_s5 + $0x8] sm:$0xff] }
   0x5   :  { %5741 = vmatprep.subr.bf16.mxu0 %v6215_v3  ;;  %5010 = vmatprep.mubr.msk.f32.mxu0 %vm6216_vm0, %v6217_v6  ;;  %v5751_v12 = vpack.c.bf16 %v188_v11, %v187_v8 }
   0x6   :  { %5750 = vmatprep.subr.bf16.mxu1 %v6215_v3  ;;  %5033 = vmatprep.mubr.msk.f32.mxu1 %vm6216_vm0, %v6217_v6 }
   0xa   :  { %v65_v0 = vld [vmem:[%s7994_s29] sm:$0xff]  ;;  %v66_v1 = vld [vmem:[%s7994_s29 + $0x8] sm:$0xff]  ;;  %v67_v2 = vld [vmem:[%s7994_s29 + $0x10] sm:$0xff] }
   0xb   :  { %v5742_v4 = vpack.c.bf16 %v66_v1, %v65_v0  ;;  %v68_v5 = vld [vmem:[%s7994_s29 + $0x18] sm:$0xff]  ;;  %v69_v9 = vld [vmem:[%s7994_s29 + $0x20] sm:$0xff]  ;;  %v70_v10 = vld [vmem:[%s7994_s29 + $0x28] sm:$0xff] }
   0xc   :  { %v5745_v7 = vpack.c.bf16 %v68_v5, %v67_v2 }
   0xd   :  { %5743 = vmatpush3.bf16.msra.mxu0 %v5742_v4 }
   0xe   :  { %5744 = vmatprep.subr.bf16.mxu0 %v6215_v3 }
   0xf   :  { %23 = vsyncpa [#allocation3], 0  ;;  %v5748_v13 = vpack.c.bf16 %v70_v10, %v69_v9  ;;  %5752 = vmatpush3.bf16.msra.mxu1 %v5751_v12  ;;  %v4461_v14 = vld [vmem:[%s7974_s5 + $0x40] sm:$0xff]  ;;  %v4462_v15 = vld [vmem:[%s7974_s5 + $0x48] sm:$0xff]  ;;  %s7995_s21 = sld [smem:[#allocation5_spill]]  ;;  %vm76_vm1 = vcmask 392192  }
  0x10   :  { %5753 = vmatprep.subr.bf16.mxu1 %v6215_v3  ;;  %v5763_v17 = vpack.c.bf16 %v4462_v15, %v4461_v14  ;;  %v189_v22 = vld [vmem:[%s7974_s5 + $0x10] sm:$0xff]  ;;  %v190_v23 = vld [vmem:[%s7974_s5 + $0x18] sm:$0xff]  ;;  %s7996_s24 = sld [smem:[#allocation7_spill]]  ;;  %v4452_v29 = vld [vmem:[%s7974_s5 + $0x20] sm:$0xff]  ;;  %vm191_vm2 = vcmask 261120   ;;  %vm681_vm3 = vcmask 1041408  }
  0x11   :  { %5746 = vmatpush3.bf16.msra.mxu0 %v5745_v7  ;;  %v4463_v24 = vld [vmem:[%s7974_s5 + $0x50] sm:$0xff]  ;;  %v5754_v25 = vpack.c.bf16 %v190_v23, %v189_v22  ;;  %v4464_v26 = vld [vmem:[%s7974_s5 + $0x58] sm:$0xff]  ;;  %v4453_v30 = vld [vmem:[%s7974_s5 + $0x28] sm:$0xff]  ;;  %vm619_vm5 = vcmask 277504   ;;  %vm632_vm6 = vcmask 271360   ;;  %vm1787_vm7 = vcmask 254976  }
  0x12   :  { %5747 = vmatprep.subr.bf16.mxu0 %v6215_v3  ;;  %v5766_v27 = vpack.c.bf16 %v4464_v26, %v4463_v24  ;;  %v5757_v34 = vpack.c.bf16 %v4453_v30, %v4452_v29  ;;  %v4454_v36 = vld [vmem:[%s7974_s5 + $0x30] sm:$0xff]  ;;  %v4455_v37 = vld [vmem:[%s7974_s5 + $0x38] sm:$0xff]  ;;  %vm6523_vm4 = vmpackc.low %vm191_vm2, %vm191_vm2  ;;  %vm2040_vm8 = vcmask 523264   ;;  %vm4426_vm9 = vcmask 74752  }
  0x13   :  { %5755 = vmatpush3.bf16.msra.mxu1 %v5754_v25  ;;  %v5760_v41 = vpack.c.bf16 %v4455_v37, %v4454_v36 }
  0x14   :  { %5756 = vmatprep.subr.bf16.mxu1 %v6215_v3 }
  0x15   :  { %5749 = vmatpush3.bf16.msra.mxu0 %v5748_v13  ;;  %v60_v16 = vld [vmem:[%s7995_s21] sm:$0xff]  ;;  %v61_v18 = vld [vmem:[%s7995_s21 + $0x8] sm:$0xff]  ;;  %v62_v19 = vld [vmem:[%s7995_s21 + $0x10] sm:$0xff] }
  0x16   :  { %5762 = vmatprep.subr.bf16.mxu0 %v6215_v3  ;;  %v63_v20 = vld [vmem:[%s7995_s21 + $0x18] sm:$0xff]  ;;  %v64_v21 = vld [vmem:[%s7995_s21 + $0x20] sm:$0x3]  ;;  %v72_v35 = vld [vmem:[%s7996_s24 + $0x8] sm:$0xff] }
  0x17   :  { %v71_v28 = vld [vmem:[%s7996_s24] sm:$0xff]  ;;  %v73_v42 = vld [vmem:[%s7996_s24 + $0x10] sm:$0xff]  ;;  %v74_v46 = vld [vmem:[%s7996_s24 + $0x18] sm:$0xff] }
  0x18   :  { %5011 = vmatmul.mubr.msk.f32.vlgmr.msra.gmra.mrb[0].mxu0 %vm76_vm1, %v60_v16  ;;  %v75_v50 = vld [vmem:[%s7996_s24 + $0x20] sm:$0x3]  ;;  %s6218_s24 = smov [#allocation2]  }
  0x19   :  { %5013 = vmatprep.mubr.msk.f32.mxu0 %vm6216_vm0, %v6217_v6  ;;  %5764 = vmatpush3.bf16.msra.mxu0 %v5763_v17  ;;  %v7449_v17 = vld [vmem:[%s7973_s4 + $0x3] ss:$0 sm:$0xff]  ;;  %s4434_s27 = sshll.u32 %s6218_s24, 4  ;;  %s4435_s27 = int_to_ptr.vmem [resolvable:$true] %s4434_s27 }
  0x1a   :  { %5765 = vmatprep.subr.bf16.mxu0 %v6215_v3  ;;  %s6191_s28 = scalar_lea.vmem %s4435_s27, 32  ;;  %p6196_p1 = scmp.lt.s32.totalorder %s4435_s27, %s4435_s27 }
  0x1b   :  { %p6192_p0 = scmp.ne.s32.totalorder %s4435_s27, %s6191_s28  ;;  %p6197_p2 = scmp.lt.s32.totalorder %s6191_s28, %s6191_s28 }
  0x1c   :  { %5014 = vmatmul.mubr.msk.f32.gmra.mrb[2].mxu0 %vm76_vm1, %v61_v18 }
  0x1d   :  { %5016 = vmatprep.mubr.msk.f32.mxu0 %vm6216_vm0, %v6217_v6  ;;  %5767 = vmatpush3.bf16.msra.mxu0 %v5766_v27  ;;  %v6541_v27 = vld [vmem:[%s7973_s4] ss:$0 sm:$0xff]  ;;  %p6198_p3 = por %p6197_p2, %p6196_p1 }
  0x1e   :  { %5776 = vmatprep.subr.bf16.mxu0 %v6215_v3 }
  0x1f   :  { %p6199_p4 = pnand %p6198_p3, %p6192_p0 }
  0x20   :  { %5017 = vmatmul.mubr.msk.f32.gmra.mrb[4].mxu0 %vm76_vm1, %v62_v19 }
  0x21   :  { %5019 = vmatprep.mubr.msk.f32.mxu0 %vm6216_vm0, %v6217_v6 }
  0x24   :  { %5020 = vmatmul.mubr.msk.f32.gmra.mrb[6].mxu0 %vm76_vm1, %v63_v20 }
  0x25   :  { %5022 = vmatprep.mubr.msk.f32.mxu0 %vm6216_vm0, %v6217_v6 }
  0x28   :  { %5023 = vmatmul.mubr.msk.f32.gmra.mrb[8].mxu0 %vm76_vm1, %v64_v21 }
  0x29   :  { %5079 = vmatprep.mubr.msk.f32.mxu0 %vm6216_vm0, %v6217_v6 }
  0xeb   :  { %v158_v31 = vpop.f32.mrb[0].mxu0 }
  0xec   :  { %v6408_v32 = vadd.f32 %v158_v31, %v71_v28  ;;  %v5012_v33 = vpop.f32.mrb[1].mxu0 }
  0xee   :  { %5034 = vmatmul.mubr.msk.f32.vlgmr.msra.gmra.mrb[0].mxu1 %vm191_vm2, %v6408_v32  ;;  %5080 = vmatmul.mubr.msk.f32.vlgmr.msra.gmra.mrb[10].mxu0 %vm191_vm2, %v6408_v32 }
  0xef   :  { %v163_v38 = vpop.f32.mrb[2].mxu0  ;;  %5036 = vmatprep.mubr.msk.f32.mxu1 %vm6216_vm0, %v6217_v6  ;;  %5082 = vmatprep.mubr.msk.f32.mxu0 %vm6216_vm0, %v6217_v6 }
  0xf0   :  { %v6427_v39 = vadd.f32 %v163_v38, %v72_v35  ;;  %v5015_v40 = vpop.f32.mrb[3].mxu0  ;;  %5758 = vmatpush3.bf16.msra.mxu1 %v5757_v34  ;;  %v6578_v34 = vld [vmem:[%s7973_s4 + $0x1] ss:$0 sm:$0xff] }
  0xf1   :  { %5759 = vmatprep.subr.bf16.mxu1 %v6215_v3 }
  0xf2   :  { %5037 = vmatmul.mubr.msk.f32.gmra.mrb[2].mxu1 %vm191_vm2, %v6427_v39  ;;  %5083 = vmatmul.mubr.msk.f32.gmra.mrb[12].mxu0 %vm191_vm2, %v6427_v39 }
  0xf3   :  { %v168_v43 = vpop.f32.mrb[4].mxu0  ;;  %5039 = vmatprep.mubr.msk.f32.mxu1 %vm6216_vm0, %v6217_v6  ;;  %5085 = vmatprep.mubr.msk.f32.mxu0 %vm6216_vm0, %v6217_v6 }
  0xf4   :  { %v6441_v44 = vadd.f32 %v168_v43, %v73_v42  ;;  %v5018_v45 = vpop.f32.mrb[5].mxu0  ;;  %5761 = vmatpush3.bf16.msra.mxu1 %v5760_v41  ;;  %v6618_v41 = vld [vmem:[%s7973_s4 + $0x2] ss:$0 sm:$0xff] }
  0xf5   :  { %5768 = vmatprep.subr.bf16.mxu1 %v6215_v3 }
  0xf6   :  { %5040 = vmatmul.mubr.msk.f32.gmra.mrb[4].mxu1 %vm191_vm2, %v6441_v44  ;;  %5086 = vmatmul.mubr.msk.f32.gmra.mrb[14].mxu0 %vm191_vm2, %v6441_v44 }
  0xf7   :  { %v173_v47 = vpop.f32.mrb[6].mxu0  ;;  %5042 = vmatprep.mubr.msk.f32.mxu1 %vm6216_vm0, %v6217_v6  ;;  %5088 = vmatprep.mubr.msk.f32.mxu0 %vm6216_vm0, %v6217_v6 }
  0xf8   :  { %v6455_v48 = vadd.f32 %v173_v47, %v74_v46  ;;  %v5021_v49 = vpop.f32.mrb[7].mxu0 }
  0xf9   :  { %v6658_v49 = vld [vmem:[%s7973_s4 + $0x3] ss:$0 sm:$0xff] }
  0xfa   :  { %5043 = vmatmul.mubr.msk.f32.gmra.mrb[6].mxu1 %vm191_vm2, %v6455_v48  ;;  %5089 = vmatmul.mubr.msk.f32.gmra.mrb[16].mxu0 %vm191_vm2, %v6455_v48 }
  0xfb   :  { %v178_v51 = vpop.f32.mrb[8].mxu0  ;;  %5045 = vmatprep.mubr.msk.f32.mxu1 %vm6216_vm0, %v6217_v6  ;;  %5091 = vmatprep.mubr.msk.f32.mxu0 %vm6216_vm0, %v6217_v6 }
  0xfc   :  { %v6468_v52 = vadd.f32 %v178_v51, %v75_v50  ;;  %v5024_v53 = vpop.f32.mrb[9].mxu0 }
  0xfe   :  { %5046 = vmatmul.mubr.msk.f32.gmra.mrb[8].mxu1 %vm191_vm2, %v6468_v52  ;;  %5092 = vmatmul.mubr.msk.f32.gmra.mrb[18].mxu0 %vm191_vm2, %v6468_v52 }
  0xff   :  { %5056 = vmatprep.mubr.msk.f32.mxu1 %vm6216_vm0, %v6217_v6  ;;  %5129 = vmatprep.mubr.msk.f32.mxu0 %vm6216_vm0, %v6217_v6 }
 0x102   :  { %5057 = vmatmul.mubr.msk.f32.vlgmr.msra.gmra.mrb[10].mxu1 %vm191_vm2, %v6408_v32 }
 0x103   :  { %5059 = vmatprep.mubr.msk.f32.mxu1 %vm6216_vm0, %v6217_v6 }
 0x106   :  { %5060 = vmatmul.mubr.msk.f32.gmra.mrb[12].mxu1 %vm191_vm2, %v6427_v39 }
 0x107   :  { %5062 = vmatprep.mubr.msk.f32.mxu1 %vm6216_vm0, %v6217_v6 }
 0x10a   :  { %5063 = vmatmul.mubr.msk.f32.gmra.mrb[14].mxu1 %vm191_vm2, %v6441_v44 }
 0x10b   :  { %5065 = vmatprep.mubr.msk.f32.mxu1 %vm6216_vm0, %v6217_v6 }
 0x10e   :  { %5066 = vmatmul.mubr.msk.f32.gmra.mrb[16].mxu1 %vm191_vm2, %v6455_v48 }
 0x10f   :  { %5068 = vmatprep.mubr.msk.f32.mxu1 %vm6216_vm0, %v6217_v6 }
 0x112   :  { %5069 = vmatmul.mubr.msk.f32.gmra.mrb[18].mxu1 %vm191_vm2, %v6468_v52 }
 0x113   :  { %5104 = vmatprep.mubr.msk.f32.mxu1 %vm6216_vm0, %v6217_v6 }
 0x1c1   :  { %v6498_v54 = vpop.f32.mrb[0].mxu1  ;;  %v463_v55 = vpop.f32.mrb[10].mxu0 }
 0x1c2   :  { %v5035_v56 = vpop.f32.mrb[1].mxu1  ;;  %v5081_v57 = vpop.f32.mrb[11].mxu0  ;;  %v494_v28 = vmul.f32 %v6541_v27, %v6498_v54  ;;  %v803_v35 = vmul.f32 %v6578_v34, %v6498_v54  ;;  %v1091_v42 = vmul.f32 %v6618_v41, %v6498_v54  ;;  %v1379_v50 = vmul.f32 %v6658_v49, %v6498_v54 }
 0x1c3   :  { %v6694_v56 = vld [vmem:[%s7972_s3] sm:$0xff] }
 0x1c5   :  { %v6500_v58 = vpop.f32.mrb[2].mxu1  ;;  %v468_v59 = vpop.f32.mrb[12].mxu0 }
 0x1c6   :  { %v5038_v60 = vpop.f32.mrb[3].mxu1  ;;  %v5084_v61 = vpop.f32.mrb[13].mxu0  ;;  %v6502_v62 = vpack.c.bf16 %v468_v59, %v463_v55  ;;  %v495_v29 = vmul.f32 %v6541_v27, %v6500_v58  ;;  %v804_v36 = vmul.f32 %v6578_v34, %v6500_v58  ;;  %v1092_v43 = vmul.f32 %v6618_v41, %v6500_v58 }
 0x1c7   :  { %v1380_v51 = vmul.f32 %v6658_v49, %v6500_v58  ;;  %v6702_v60 = vld [vmem:[%s7972_s3 + $0x8] sm:$0xff] }
 0x1c8   :  { %5778 = vmatpush3.bf16.msra.mxu0 %v6502_v62 }
 0x1c9   :  { %v6505_v63 = vpop.f32.mrb[4].mxu1  ;;  %v473_v0 = vpop.f32.mrb[14].mxu0  ;;  %5779 = vmatprep.subr.bf16.mxu0 %v6215_v3 }
 0x1ca   :  { %v5041_v1 = vpop.f32.mrb[5].mxu1  ;;  %v5087_v2 = vpop.f32.mrb[15].mxu0  ;;  %v496_v30 = vmul.f32 %v6541_v27, %v6505_v63  ;;  %v805_v37 = vmul.f32 %v6578_v34, %v6505_v63  ;;  %v1093_v45 = vmul.f32 %v6618_v41, %v6505_v63  ;;  %v1381_v53 = vmul.f32 %v6658_v49, %v6505_v63 }
 0x1cb   :  { %v6712_v2 = vld [vmem:[%s7972_s3 + $0x10] sm:$0xff] }
 0x1cd   :  { %v6508_v4 = vpop.f32.mrb[6].mxu1  ;;  %v478_v5 = vpop.f32.mrb[16].mxu0 }
 0x1ce   :  { %v5044_v7 = vpop.f32.mrb[7].mxu1  ;;  %v5090_v8 = vpop.f32.mrb[17].mxu0  ;;  %v6510_v9 = vpack.c.bf16 %v478_v5, %v473_v0  ;;  %v497_v31 = vmul.f32 %v6541_v27, %v6508_v4  ;;  %v806_v38 = vmul.f32 %v6578_v34, %v6508_v4  ;;  %v1094_v46 = vmul.f32 %v6618_v41, %v6508_v4 }
 0x1cf   :  { %v1382_v54 = vmul.f32 %v6658_v49, %v6508_v4 }
 0x1d0   :  { %5781 = vmatpush3.bf16.msra.mxu0 %v6510_v9 }
 0x1d1   :  { %v6513_v10 = vpop.f32.mrb[8].mxu1  ;;  %v6515_v11 = vpop.f32.mrb[18].mxu0  ;;  %5127 = vmatprep.subr.mxu0 %v6217_v6 }
 0x1d2   :  { %v5047_v12 = vpop.f32.mrb[9].mxu1  ;;  %v5093_v13 = vpop.f32.mrb[19].mxu0  ;;  %v498_v33 = vmul.f32 %v6541_v27, %v6513_v10  ;;  %v807_v40 = vmul.f32 %v6578_v34, %v6513_v10  ;;  %v1095_v47 = vmul.f32 %v6618_v41, %v6513_v10  ;;  %v1383_v55 = vmul.f32 %v6658_v49, %v6513_v10  ;;  %v6722_v10 = vld [vmem:[%s7972_s3 + $0x18] sm:$0xff] }
 0x1d4   :  { %5128 = vmatpush3.msk.msra.mxu0 %vm681_vm3, %v6515_v11 }
 0x1d5   :  { %v368_v14 = vpop.f32.mrb[10].mxu1  ;;  %5790 = vmatprep.subr.bf16.mxu0 %v6215_v3 }
 0x1d6   :  { %v5058_v15 = vpop.f32.mrb[11].mxu1 }
 0x1d9   :  { %v373_v16 = vpop.f32.mrb[12].mxu1 }
 0x1da   :  { %v5769_v18 = vpack.c.bf16 %v373_v16, %v368_v14  ;;  %v5061_v19 = vpop.f32.mrb[13].mxu1  ;;  %v6732_v16 = vld [vmem:[%s7972_s3 + $0x20] sm:$0x3] }
 0x1dc   :  { %5771 = vmatpush3.bf16.xpose.msk.msra.mxu1 %vm6523_vm4, %v5769_v18 }
 0x1dd   :  { %v378_v20 = vpop.f32.mrb[14].mxu1  ;;  %5772 = vmatprep.subr.bf16.mxu1 %v6215_v3 }
 0x1de   :  { %v5064_v21 = vpop.f32.mrb[15].mxu1 }
 0x1e1   :  { %v383_v22 = vpop.f32.mrb[16].mxu1 }
 0x1e2   :  { %v6530_v23 = vpack.c.bf16 %v383_v22, %v378_v20  ;;  %v5067_v24 = vpop.f32.mrb[17].mxu1 }
 0x1e4   :  { %5775 = vmatpush3.bf16.xpose.msk.msra.mxu1 %vm6523_vm4, %v6530_v23 }
 0x1e5   :  { %v6535_v25 = vpop.f32.mrb[18].mxu1  ;;  %5102 = vmatprep.subr.mxu1 %v6217_v6 }
 0x1e6   :  { %v5070_v26 = vpop.f32.mrb[19].mxu1 }
 0x1ec   :  { %5103 = vmatpush3.xpose.msk.msra.mxu1 %vm191_vm2, %v6535_v25 }
 0x1ed   :  { %5782 = vmatprep.subr.bf16.mxu1 %v6215_v3 }
 0x1ef   :  { %5105 = vmatmul.mubr.msk.f32.vlgmr.msra.gmra.mrb[20].mxu1 %vm191_vm2, %v494_v28 }
 0x1f0   :  { %5785 = vmatpush3.bf16.xpose.msk.msra.mxu1 %vm6523_vm4, %v5769_v18  ;;  %5107 = vmatprep.mubr.msk.f32.mxu1 %vm6216_vm0, %v6217_v6 }
 0x1f1   :  { %5786 = vmatprep.subr.bf16.mxu1 %v6215_v3 }
 0x1f3   :  { %5108 = vmatmul.mubr.msk.f32.gmra.mrb[22].mxu1 %vm191_vm2, %v495_v29 }
 0x1f4   :  { %5110 = vmatprep.mubr.msk.f32.mxu1 %vm6216_vm0, %v6217_v6 }
 0x1f7   :  { %5111 = vmatmul.mubr.msk.f32.gmra.mrb[24].mxu1 %vm191_vm2, %v496_v30 }
 0x1f8   :  { %5789 = vmatpush3.bf16.xpose.msk.msra.mxu1 %vm6523_vm4, %v6530_v23  ;;  %5113 = vmatprep.mubr.msk.f32.mxu1 %vm6216_vm0, %v6217_v6 }
 0x1f9   :  { %5152 = vmatprep.subr.mxu1 %v6217_v6 }
 0x1fb   :  { %5114 = vmatmul.mubr.msk.f32.gmra.mrb[26].mxu1 %vm191_vm2, %v497_v31 }
 0x1fc   :  { %5116 = vmatprep.mubr.msk.f32.mxu1 %vm6216_vm0, %v6217_v6 }
 0x1ff   :  { %5117 = vmatmul.mubr.msk.f32.gmra.mrb[28].mxu1 %vm191_vm2, %v498_v33 }
 0x200   :  { %5153 = vmatpush3.xpose.msk.msra.mxu1 %vm191_vm2, %v6535_v25  ;;  %5154 = vmatprep.mubr.msk.f32.mxu1 %vm6216_vm0, %v6217_v6 }
 0x201   :  { %5796 = vmatprep.subr.bf16.mxu1 %v6215_v3 }
 0x203   :  { %5155 = vmatmul.mubr.msk.f32.vlgmr.msra.gmra.mrb[30].mxu1 %vm191_vm2, %v803_v35 }
 0x204   :  { %5799 = vmatpush3.bf16.xpose.msk.msra.mxu1 %vm6523_vm4, %v5769_v18  ;;  %5157 = vmatprep.mubr.msk.f32.mxu1 %vm6216_vm0, %v6217_v6 }
 0x205   :  { %5800 = vmatprep.subr.bf16.mxu1 %v6215_v3 }
 0x207   :  { %5158 = vmatmul.mubr.msk.f32.gmra.mrb[32].mxu1 %vm191_vm2, %v804_v36 }
 0x208   :  { %5160 = vmatprep.mubr.msk.f32.mxu1 %vm6216_vm0, %v6217_v6 }
 0x20b   :  { %5161 = vmatmul.mubr.msk.f32.gmra.mrb[34].mxu1 %vm191_vm2, %v805_v37 }
 0x20c   :  { %5803 = vmatpush3.bf16.xpose.msk.msra.mxu1 %vm6523_vm4, %v6530_v23  ;;  %5163 = vmatprep.mubr.msk.f32.mxu1 %vm6216_vm0, %v6217_v6 }
 0x20d   :  { %5202 = vmatprep.subr.mxu1 %v6217_v6 }
 0x20f   :  { %5164 = vmatmul.mubr.msk.f32.gmra.mrb[36].mxu1 %vm191_vm2, %v806_v38 }
 0x210   :  { %5166 = vmatprep.mubr.msk.f32.mxu1 %vm6216_vm0, %v6217_v6 }
 0x213   :  { %5167 = vmatmul.mubr.msk.f32.gmra.mrb[38].mxu1 %vm191_vm2, %v807_v40 }
 0x214   :  { %5203 = vmatpush3.xpose.msk.msra.mxu1 %vm191_vm2, %v6535_v25  ;;  %5204 = vmatprep.mubr.msk.f32.mxu1 %vm6216_vm0, %v6217_v6 }
 0x215   :  { %5810 = vmatprep.subr.bf16.mxu1 %v6215_v3 }
 0x217   :  { %5205 = vmatmul.mubr.msk.f32.vlgmr.msra.gmra.mrb[40].mxu1 %vm191_vm2, %v1091_v42 }
 0x218   :  { %5813 = vmatpush3.bf16.xpose.msk.msra.mxu1 %vm6523_vm4, %v5769_v18  ;;  %5207 = vmatprep.mubr.msk.f32.mxu1 %vm6216_vm0, %v6217_v6 }
 0x219   :  { %5814 = vmatprep.subr.bf16.mxu1 %v6215_v3 }
 0x21b   :  { %5208 = vmatmul.mubr.msk.f32.gmra.mrb[42].mxu1 %vm191_vm2, %v1092_v43 }
 0x21c   :  { %5210 = vmatprep.mubr.msk.f32.mxu1 %vm6216_vm0, %v6217_v6 }
 0x21f   :  { %5211 = vmatmul.mubr.msk.f32.gmra.mrb[44].mxu1 %vm191_vm2, %v1093_v45 }
 0x220   :  { %5817 = vmatpush3.bf16.xpose.msk.msra.mxu1 %vm6523_vm4, %v6530_v23  ;;  %5213 = vmatprep.mubr.msk.f32.mxu1 %vm6216_vm0, %v6217_v6 }
 0x221   :  { %5252 = vmatprep.subr.mxu1 %v6217_v6 }
 0x223   :  { %5214 = vmatmul.mubr.msk.f32.gmra.mrb[46].mxu1 %vm191_vm2, %v1094_v46 }
 0x224   :  { %5216 = vmatprep.mubr.msk.f32.mxu1 %vm6216_vm0, %v6217_v6 }
 0x227   :  { %5217 = vmatmul.mubr.msk.f32.gmra.mrb[48].mxu1 %vm191_vm2, %v1095_v47 }
 0x228   :  { %5253 = vmatpush3.xpose.msk.msra.mxu1 %vm191_vm2, %v6535_v25  ;;  %5254 = vmatprep.mubr.msk.f32.mxu1 %vm6216_vm0, %v6217_v6 }
 0x229   :  { %5824 = vmatprep.subr.bf16.mxu1 %v6215_v3 }
 0x22b   :  { %5255 = vmatmul.mubr.msk.f32.vlgmr.msra.gmra.mrb[50].mxu1 %vm191_vm2, %v1379_v50 }
 0x22c   :  { %5257 = vmatprep.mubr.msk.f32.mxu1 %vm6216_vm0, %v6217_v6 }
 0x22f   :  { %5258 = vmatmul.mubr.msk.f32.gmra.mrb[52].mxu1 %vm191_vm2, %v1380_v51 }
 0x230   :  { %5260 = vmatprep.mubr.msk.f32.mxu1 %vm6216_vm0, %v6217_v6 }
 0x233   :  { %5261 = vmatmul.mubr.msk.f32.gmra.mrb[54].mxu1 %vm191_vm2, %v1381_v53 }
 0x234   :  { %5263 = vmatprep.mubr.msk.f32.mxu1 %vm6216_vm0, %v6217_v6 }
 0x237   :  { %5264 = vmatmul.mubr.msk.f32.gmra.mrb[56].mxu1 %vm191_vm2, %v1382_v54 }
 0x238   :  { %5266 = vmatprep.mubr.msk.f32.mxu1 %vm6216_vm0, %v6217_v6 }
 0x23b   :  { %5267 = vmatmul.mubr.msk.f32.gmra.mrb[58].mxu1 %vm191_vm2, %v1383_v55 }
 0x23c   :  { %5302 = vmatprep.mubr.msk.f32.mxu1 %vm6216_vm0, %v6217_v6 }
 0x2c2   :  { %v595_v57 = vpop.f32.mrb[20].mxu1 }
 0x2c3   :  { %v6697_v58 = vadd.f32 %v595_v57, %v6694_v56  ;;  %v5106_v59 = vpop.f32.mrb[21].mxu1 }
 0x2c5   :  { %v620_v61 = vsel %vm619_vm5, %v6697_v58, -inf }
 0x2c6   :  { %621 = vmax.xlane.f32.xlu0 %v620_v61  ;;  %v600_v63 = vpop.f32.mrb[22].mxu1 }
 0x2c7   :  { %v6707_v0 = vadd.f32 %v600_v63, %v6702_v60  ;;  %v5109_v1 = vpop.f32.mrb[23].mxu1 }
 0x2c9   :  { %v623_v4 = vsel %vm619_vm5, %v6707_v0, -inf }
 0x2ca   :  { %624 = vmax.xlane.f32.xlu0 %v623_v4  ;;  %v605_v5 = vpop.f32.mrb[24].mxu1 }
 0x2cb   :  { %v6717_v7 = vadd.f32 %v605_v5, %v6712_v2  ;;  %v5112_v8 = vpop.f32.mrb[25].mxu1 }
 0x2cd   :  { %v626_v12 = vsel %vm619_vm5, %v6717_v7, -inf }
 0x2ce   :  { %627 = vmax.xlane.f32.xlu1 %v626_v12  ;;  %v610_v13 = vpop.f32.mrb[26].mxu1 }
 0x2cf   :  { %v6727_v14 = vadd.f32 %v610_v13, %v6722_v10  ;;  %v5115_v15 = vpop.f32.mrb[27].mxu1 }
 0x2d1   :  { %v629_v18 = vsel %vm619_vm5, %v6727_v14, -inf }
 0x2d2   :  { %630 = vmax.xlane.f32.xlu1 %v629_v18  ;;  %v615_v19 = vpop.f32.mrb[28].mxu1 }
 0x2d3   :  { %v6737_v20 = vadd.f32 %v615_v19, %v6732_v16  ;;  %v5118_v21 = vpop.f32.mrb[29].mxu1 }
 0x2d5   :  { %v633_v22 = vsel %vm632_vm6, %v6737_v20, -inf }
 0x2d6   :  { %634 = vmax.xlane.f32.xlu0 %v633_v22  ;;  %v889_v23 = vpop.f32.mrb[30].mxu1 }
 0x2d7   :  { %v6742_v24 = vadd.f32 %v889_v23, %v6694_v56  ;;  %v5156_v25 = vpop.f32.mrb[31].mxu1 }
 0x2d9   :  { %v913_v26 = vsel %vm619_vm5, %v6742_v24, -inf }
 0x2da   :  { %914 = vmax.xlane.f32.xlu1 %v913_v26  ;;  %v894_v28 = vpop.f32.mrb[32].mxu1 }
 0x2db   :  { %v6747_v29 = vadd.f32 %v894_v28, %v6702_v60  ;;  %v5159_v30 = vpop.f32.mrb[33].mxu1 }
 0x2dd   :  { %v916_v31 = vsel %vm619_vm5, %v6747_v29, -inf }
 0x2de   :  { %917 = vmax.xlane.f32.xlu0 %v916_v31  ;;  %v899_v33 = vpop.f32.mrb[34].mxu1 }
 0x2df   :  { %v6752_v35 = vadd.f32 %v899_v33, %v6712_v2  ;;  %v5162_v36 = vpop.f32.mrb[35].mxu1 }
 0x2e1   :  { %v919_v37 = vsel %vm619_vm5, %v6752_v35, -inf }
 0x2e2   :  { %920 = vmax.xlane.f32.xlu1 %v919_v37  ;;  %v904_v38 = vpop.f32.mrb[36].mxu1 }
 0x2e3   :  { %v6757_v40 = vadd.f32 %v904_v38, %v6722_v10  ;;  %v5165_v42 = vpop.f32.mrb[37].mxu1 }
 0x2e5   :  { %v922_v43 = vsel %vm619_vm5, %v6757_v40, -inf }
 0x2e6   :  { %923 = vmax.xlane.f32.xlu0 %v922_v43  ;;  %v909_v45 = vpop.f32.mrb[38].mxu1 }
 0x2e7   :  { %v6762_v46 = vadd.f32 %v909_v45, %v6732_v16  ;;  %v5168_v47 = vpop.f32.mrb[39].mxu1 }
 0x2e9   :  { %v925_v50 = vsel %vm632_vm6, %v6762_v46, -inf }
 0x2ea   :  { %926 = vmax.xlane.f32.xlu1 %v925_v50  ;;  %v1177_v51 = vpop.f32.mrb[40].mxu1 }
 0x2eb   :  { %v6767_v53 = vadd.f32 %v1177_v51, %v6694_v56  ;;  %v5206_v54 = vpop.f32.mrb[41].mxu1 }
 0x2ed   :  { %v1201_v55 = vsel %vm619_vm5, %v6767_v53, -inf }
 0x2ee   :  { %1202 = vmax.xlane.f32.xlu0 %v1201_v55  ;;  %v1182_v57 = vpop.f32.mrb[42].mxu1 }
 0x2ef   :  { %v6772_v59 = vadd.f32 %v1182_v57, %v6702_v60  ;;  %v5209_v61 = vpop.f32.mrb[43].mxu1 }
 0x2f1   :  { %v1204_v63 = vsel %vm619_vm5, %v6772_v59, -inf }
 0x2f2   :  { %1205 = vmax.xlane.f32.xlu1 %v1204_v63  ;;  %v1187_v1 = vpop.f32.mrb[44].mxu1 }
 0x2f3   :  { %v6777_v4 = vadd.f32 %v1187_v1, %v6712_v2  ;;  %v5212_v5 = vpop.f32.mrb[45].mxu1 }
 0x2f5   :  { %v1207_v8 = vsel %vm619_vm5, %v6777_v4, -inf }
 0x2f6   :  { %1208 = vmax.xlane.f32.xlu0 %v1207_v8  ;;  %v1192_v12 = vpop.f32.mrb[46].mxu1 }
 0x2f7   :  { %v6782_v13 = vadd.f32 %v1192_v12, %v6722_v10  ;;  %v5215_v15 = vpop.f32.mrb[47].mxu1 }
 0x2f9   :  { %v1210_v18 = vsel %vm619_vm5, %v6782_v13, -inf }
 0x2fa   :  { %1211 = vmax.xlane.f32.xlu1 %v1210_v18  ;;  %v1197_v19 = vpop.f32.mrb[48].mxu1 }
 0x2fb   :  { %v6787_v21 = vadd.f32 %v1197_v19, %v6732_v16  ;;  %v5218_v22 = vpop.f32.mrb[49].mxu1 }
 0x2fd   :  { %v1213_v23 = vsel %vm632_vm6, %v6787_v21, -inf }
 0x2fe   :  { %1214 = vmax.xlane.f32.xlu0 %v1213_v23  ;;  %v1465_v25 = vpop.f32.mrb[50].mxu1 }
 0x2ff   :  { %v6792_v26 = vadd.f32 %v1465_v25, %v6694_v56  ;;  %v5256_v28 = vpop.f32.mrb[51].mxu1 }
 0x301   :  { %v1489_v30 = vsel %vm619_vm5, %v6792_v26, -inf }
 0x302   :  { %1490 = vmax.xlane.f32.xlu1 %v1489_v30  ;;  %v1470_v31 = vpop.f32.mrb[52].mxu1 }
 0x303   :  { %v6797_v33 = vadd.f32 %v1470_v31, %v6702_v60  ;;  %v5259_v36 = vpop.f32.mrb[53].mxu1 }
 0x305   :  { %v1492_v37 = vsel %vm619_vm5, %v6797_v33, -inf }
 0x306   :  { %1493 = vmax.xlane.f32.xlu0 %v1492_v37  ;;  %v1475_v38 = vpop.f32.mrb[54].mxu1 }
 0x307   :  { %v6802_v42 = vadd.f32 %v1475_v38, %v6712_v2  ;;  %v5262_v56 = vpop.f32.mrb[55].mxu1 }
 0x309   :  { %v1495_v43 = vsel %vm619_vm5, %v6802_v42, -inf }
 0x30a   :  { %1496 = vmax.xlane.f32.xlu1 %v1495_v43  ;;  %v1480_v45 = vpop.f32.mrb[56].mxu1 }
 0x30b   :  { %v6807_v47 = vadd.f32 %v1480_v45, %v6722_v10  ;;  %v5265_v60 = vpop.f32.mrb[57].mxu1 }
 0x30d   :  { %v1498_v50 = vsel %vm619_vm5, %v6807_v47, -inf }
 0x30e   :  { %1499 = vmax.xlane.f32.xlu0 %v1498_v50  ;;  %v1485_v51 = vpop.f32.mrb[58].mxu1 }
 0x30f   :  { %v6812_v54 = vadd.f32 %v1485_v51, %v6732_v16  ;;  %v5268_v2 = vpop.f32.mrb[59].mxu1 }
 0x311   :  { %v1501_v55 = vsel %vm632_vm6, %v6812_v54, -inf }
 0x312   :  { %1502 = vmax.xlane.f32.xlu1 %v1501_v55 }
 0x353   :  { %v622_v57 = vpop.xlane.xlu0 %621 }
 0x354   :  { %v636_v61 = vsub.f32 %v6697_v58, %v622_v57 }
 0x356   :  { %v641_v63 = vmul.f32 1.442695, %v636_v61 }
 0x357   :  { %v625_v10 = vpop.xlane.xlu0 %624 }
 0x358   :  { %5962 = vpow2.f32 %v641_v63  ;;  %v637_v1 = vsub.f32 %v6707_v0, %v625_v10 }
 0x35a   :  { %v643_v5 = vmul.f32 1.442695, %v637_v1 }
 0x35b   :  { %v628_v8 = vpop.xlane.xlu1 %627 }
 0x35c   :  { %5964 = vpow2.f32 %v643_v5  ;;  %v638_v12 = vsub.f32 %v6717_v7, %v628_v8 }
 0x35e   :  { %v645_v16 = vmul.f32 1.442695, %v638_v12 }
 0x35f   :  { %v631_v15 = vpop.xlane.xlu1 %630 }
 0x360   :  { %5966 = vpow2.f32 %v645_v16  ;;  %v639_v18 = vsub.f32 %v6727_v14, %v631_v15 }
 0x362   :  { %v5963_v19 = vpop.eup %5962  ;;  %v647_v22 = vmul.f32 1.442695, %v639_v18 }
 0x363   :  { %v635_v23 = vpop.xlane.xlu0 %634  ;;  %5130 = vmatmul.mubr.msk.f32.vlgmr.msra.gmra.mrb[20].mxu0 %vm619_vm5, %v5963_v19  ;;  %v651_v58 = vsel %vm619_vm5, %v5963_v19, 0.0 }
 0x364   :  { %5968 = vpow2.f32 %v647_v22  ;;  %v640_v0 = vsub.f32 %v6737_v20, %v635_v23  ;;  %5792 = vmatpush3.bf16.msra.mxu0 %v6502_v62  ;;  %652 = vadd.xlane.f32.xlu0 %v651_v58 }
 0x365   :  { %5132 = vmatprep.mubr.msk.f32.mxu0 %vm6216_vm0, %v6217_v6  ;;  %5793 = vmatprep.subr.bf16.mxu0 %v6215_v3 }
 0x366   :  { %v5965_v7 = vpop.eup %5964  ;;  %v649_v14 = vmul.f32 1.442695, %v640_v0 }
 0x367   :  { %v915_v25 = vpop.xlane.xlu1 %914  ;;  %5133 = vmatmul.mubr.msk.f32.gmra.mrb[22].mxu0 %vm619_vm5, %v5965_v7  ;;  %v654_v28 = vsel %vm619_vm5, %v5965_v7, 0.0 }
 0x368   :  { %5970 = vpow2.f32 %v649_v14  ;;  %v928_v30 = vsub.f32 %v6742_v24, %v915_v25  ;;  %5795 = vmatpush3.bf16.msra.mxu0 %v6510_v9  ;;  %655 = vadd.xlane.f32.xlu1 %v654_v28 }
 0x369   :  { %5135 = vmatprep.mubr.msk.f32.mxu0 %vm6216_vm0, %v6217_v6  ;;  %5177 = vmatprep.subr.mxu0 %v6217_v6 }
 0x36a   :  { %v5967_v20 = vpop.eup %5966  ;;  %v933_v31 = vmul.f32 1.442695, %v928_v30 }
 0x36b   :  { %v918_v36 = vpop.xlane.xlu0 %917  ;;  %5136 = vmatmul.mubr.msk.f32.gmra.mrb[24].mxu0 %vm619_vm5, %v5967_v20  ;;  %v657_v37 = vsel %vm619_vm5, %v5967_v20, 0.0 }
 0x36c   :  { %5972 = vpow2.f32 %v933_v31  ;;  %v929_v38 = vsub.f32 %v6747_v29, %v918_v36  ;;  %5178 = vmatpush3.msk.msra.mxu0 %vm681_vm3, %v6515_v11  ;;  %658 = vadd.xlane.f32.xlu1 %v657_v37 }
 0x36d   :  { %5138 = vmatprep.mubr.msk.f32.mxu0 %vm6216_vm0, %v6217_v6  ;;  %5804 = vmatprep.subr.bf16.mxu0 %v6215_v3 }
 0x36e   :  { %v5969_v24 = vpop.eup %5968  ;;  %v935_v56 = vmul.f32 1.442695, %v929_v38 }
 0x36f   :  { %v921_v43 = vpop.xlane.xlu1 %920  ;;  %5139 = vmatmul.mubr.msk.f32.gmra.mrb[26].mxu0 %vm619_vm5, %v5969_v24  ;;  %v660_v45 = vsel %vm619_vm5, %v5969_v24, 0.0 }
 0x370   :  { %5974 = vpow2.f32 %v935_v56  ;;  %v930_v60 = vsub.f32 %v6752_v35, %v921_v43  ;;  %661 = vadd.xlane.f32.xlu1 %v660_v45  ;;  %5141 = vmatprep.mubr.msk.f32.mxu0 %vm6216_vm0, %v6217_v6 }
 0x372   :  { %v6847_v29 = vpop.eup %5970  ;;  %v937_v50 = vmul.f32 1.442695, %v930_v60 }
 0x373   :  { %v924_v51 = vpop.xlane.xlu0 %923  ;;  %5142 = vmatmul.mubr.msk.f32.gmra.mrb[28].mxu0 %vm619_vm5, %v6847_v29 }
 0x374   :  { %5976 = vpow2.f32 %v937_v50  ;;  %v931_v2 = vsub.f32 %v6757_v40, %v924_v51  ;;  %5179 = vmatprep.mubr.msk.f32.mxu0 %vm6216_vm0, %v6217_v6 }
 0x376   :  { %v5973_v55 = vpop.eup %5972  ;;  %v939_v57 = vmul.f32 1.442695, %v931_v2  ;;  %v663_v2 = vsel %vm632_vm6, %v6847_v29, 0.0 }
 0x377   :  { %v927_v35 = vpop.xlane.xlu1 %926  ;;  %5180 = vmatmul.mubr.msk.f32.vlgmr.msra.gmra.mrb[30].mxu0 %vm619_vm5, %v5973_v55  ;;  %v943_v61 = vsel %vm619_vm5, %v5973_v55, 0.0 }
 0x378   :  { %5978 = vpow2.f32 %v939_v57  ;;  %v932_v63 = vsub.f32 %v6762_v46, %v927_v35  ;;  %5806 = vmatpush3.bf16.msra.mxu0 %v6502_v62  ;;  %944 = vadd.xlane.f32.xlu1 %v943_v61 }
 0x379   :  { %5182 = vmatprep.mubr.msk.f32.mxu0 %vm6216_vm0, %v6217_v6  ;;  %5807 = vmatprep.subr.bf16.mxu0 %v6215_v3 }
 0x37a   :  { %v5975_v40 = vpop.eup %5974  ;;  %v941_v10 = vmul.f32 1.442695, %v932_v63 }
 0x37b   :  { %v1203_v1 = vpop.xlane.xlu0 %1202  ;;  %5183 = vmatmul.mubr.msk.f32.gmra.mrb[32].mxu0 %vm619_vm5, %v5975_v40  ;;  %v946_v5 = vsel %vm619_vm5, %v5975_v40, 0.0 }
 0x37c   :  { %5980 = vpow2.f32 %v941_v10  ;;  %v1216_v8 = vsub.f32 %v6767_v53, %v1203_v1  ;;  %5809 = vmatpush3.bf16.msra.mxu0 %v6510_v9  ;;  %947 = vadd.xlane.f32.xlu0 %v946_v5 }
 0x37d   :  { %5185 = vmatprep.mubr.msk.f32.mxu0 %vm6216_vm0, %v6217_v6  ;;  %5227 = vmatprep.subr.mxu0 %v6217_v6 }
 0x37e   :  { %v5977_v46 = vpop.eup %5976  ;;  %v1221_v12 = vmul.f32 1.442695, %v1216_v8 }
 0x37f   :  { %v1206_v16 = vpop.xlane.xlu1 %1205  ;;  %5186 = vmatmul.mubr.msk.f32.gmra.mrb[34].mxu0 %vm619_vm5, %v5977_v46  ;;  %v949_v15 = vsel %vm619_vm5, %v5977_v46, 0.0 }
 0x380   :  { %5982 = vpow2.f32 %v1221_v12  ;;  %v1217_v18 = vsub.f32 %v6772_v59, %v1206_v16  ;;  %5228 = vmatpush3.msk.msra.mxu0 %vm681_vm3, %v6515_v11  ;;  %950 = vadd.xlane.f32.xlu0 %v949_v15  ;;  %v1659_v15 = vld [vmem:[%s7975_s6] sm:$0xff] }
 0x381   :  { %5188 = vmatprep.mubr.msk.f32.mxu0 %vm6216_vm0, %v6217_v6  ;;  %5818 = vmatprep.subr.bf16.mxu0 %v6215_v3 }
 0x382   :  { %v5979_v53 = vpop.eup %5978  ;;  %v1223_v19 = vmul.f32 1.442695, %v1217_v18  ;;  %v1660_v18 = vld [vmem:[%s7975_s6 + $0x8] sm:$0xff] }
 0x383   :  { %v1209_v22 = vpop.xlane.xlu0 %1208  ;;  %5189 = vmatmul.mubr.msk.f32.gmra.mrb[36].mxu0 %vm619_vm5, %v5979_v53  ;;  %v952_v23 = vsel %vm619_vm5, %v5979_v53, 0.0  ;;  %v5825_v53 = vpack.c.bf16 %v1660_v18, %v1659_v15 }
 0x384   :  { %5984 = vpow2.f32 %v1223_v19  ;;  %v1218_v58 = vsub.f32 %v6777_v4, %v1209_v22  ;;  %953 = vadd.xlane.f32.xlu0 %v952_v23  ;;  %5191 = vmatprep.mubr.msk.f32.mxu0 %vm6216_vm0, %v6217_v6  ;;  %v1661_v19 = vld [vmem:[%s7975_s6 + $0x10] sm:$0xff]  ;;  %v1662_v22 = vld [vmem:[%s7975_s6 + $0x18] sm:$0xff] }
 0x385   :  { %5826 = vmatpush3.bf16.msra.mxu1 %v5825_v53  ;;  %v5828_v23 = vpack.c.bf16 %v1662_v22, %v1661_v19 }
 0x386   :  { %v6881_v59 = vpop.eup %5980  ;;  %v1225_v0 = vmul.f32 1.442695, %v1218_v58  ;;  %5827 = vmatprep.subr.bf16.mxu1 %v6215_v3 }
 0x387   :  { %v1212_v7 = vpop.xlane.xlu1 %1211  ;;  %5192 = vmatmul.mubr.msk.f32.gmra.mrb[38].mxu0 %vm619_vm5, %v6881_v59  ;;  %v955_v12 = vsel %vm632_vm6, %v6881_v59, 0.0 }
 0x388   :  { %5986 = vpow2.f32 %v1225_v0  ;;  %v1219_v14 = vsub.f32 %v6782_v13, %v1212_v7  ;;  %5229 = vmatprep.mubr.msk.f32.mxu0 %vm6216_vm0, %v6217_v6 }
 0x389   :  { %5829 = vmatpush3.bf16.msra.mxu1 %v5828_v23 }
 0x38a   :  { %v5983_v25 = vpop.eup %5982  ;;  %v1227_v28 = vmul.f32 1.442695, %v1219_v14  ;;  %5836 = vmatprep.subr.bf16.mxu1 %v6215_v3 }
 0x38b   :  { %v1215_v4 = vpop.xlane.xlu0 %1214  ;;  %5230 = vmatmul.mubr.msk.f32.vlgmr.msra.gmra.mrb[40].mxu0 %vm619_vm5, %v5983_v25  ;;  %v1231_v30 = vsel %vm619_vm5, %v5983_v25, 0.0 }
 0x38c   :  { %5988 = vpow2.f32 %v1227_v28  ;;  %v1220_v20 = vsub.f32 %v6787_v21, %v1215_v4  ;;  %5820 = vmatpush3.bf16.msra.mxu0 %v6502_v62  ;;  %1232 = vadd.xlane.f32.xlu0 %v1231_v30 }
 0x38d   :  { %5232 = vmatprep.mubr.msk.f32.mxu0 %vm6216_vm0, %v6217_v6  ;;  %5821 = vmatprep.subr.bf16.mxu0 %v6215_v3 }
 0x38e   :  { %v5985_v13 = vpop.eup %5984  ;;  %v1229_v31 = vmul.f32 1.442695, %v1220_v20 }
 0x38f   :  { %v1491_v36 = vpop.xlane.xlu1 %1490  ;;  %5233 = vmatmul.mubr.msk.f32.gmra.mrb[42].mxu0 %vm619_vm5, %v5985_v13  ;;  %v1234_v37 = vsel %vm619_vm5, %v5985_v13, 0.0 }
 0x390   :  { %5990 = vpow2.f32 %v1229_v31  ;;  %v1504_v38 = vsub.f32 %v6792_v26, %v1491_v36  ;;  %5823 = vmatpush3.bf16.msra.mxu0 %v6510_v9  ;;  %1235 = vadd.xlane.f32.xlu0 %v1234_v37 }
 0x391   :  { %5235 = vmatprep.mubr.msk.f32.mxu0 %vm6216_vm0, %v6217_v6  ;;  %5277 = vmatprep.subr.mxu0 %v6217_v6 }
 0x392   :  { %v5987_v62 = vpop.eup %5986  ;;  %v1509_v21 = vmul.f32 1.442695, %v1504_v38 }
 0x393   :  { %v1494_v24 = vpop.xlane.xlu0 %1493  ;;  %5236 = vmatmul.mubr.msk.f32.gmra.mrb[44].mxu0 %vm619_vm5, %v5987_v62  ;;  %v1237_v56 = vsel %vm619_vm5, %v5987_v62, 0.0 }
 0x394   :  { %5992 = vpow2.f32 %v1509_v21  ;;  %v1505_v43 = vsub.f32 %v6797_v33, %v1494_v24  ;;  %5278 = vmatpush3.msk.msra.mxu0 %vm681_vm3, %v6515_v11  ;;  %1238 = vadd.xlane.f32.xlu0 %v1237_v56 }
 0x395   :  { %5238 = vmatprep.mubr.msk.f32.mxu0 %vm6216_vm0, %v6217_v6  ;;  %5830 = vmatprep.subr.bf16.mxu0 %v6215_v3 }
 0x396   :  { %v5989_v9 = vpop.eup %5988  ;;  %v1511_v26 = vmul.f32 1.442695, %v1505_v43 }
 0x397   :  { %v1497_v45 = vpop.xlane.xlu1 %1496  ;;  %5239 = vmatmul.mubr.msk.f32.gmra.mrb[46].mxu0 %vm619_vm5, %v5989_v9  ;;  %v1240_v60 = vsel %vm619_vm5, %v5989_v9, 0.0 }
 0x398   :  { %5994 = vpow2.f32 %v1511_v26  ;;  %v1506_v50 = vsub.f32 %v6802_v42, %v1497_v45  ;;  %1241 = vadd.xlane.f32.xlu0 %v1240_v60  ;;  %5241 = vmatprep.mubr.msk.f32.mxu0 %vm6216_vm0, %v6217_v6 }
 0x39a   :  { %v5991_v11 = vpop.eup %5990  ;;  %v1513_v33 = vmul.f32 1.442695, %v1506_v50 }
 0x39b   :  { %v1500_v51 = vpop.xlane.xlu0 %1499  ;;  %5242 = vmatmul.mubr.msk.f32.gmra.mrb[48].mxu0 %vm619_vm5, %v5991_v11  ;;  %v1243_v61 = vsel %vm632_vm6, %v5991_v11, 0.0 }
 0x39c   :  { %5996 = vpow2.f32 %v1513_v33  ;;  %v1507_v55 = vsub.f32 %v6807_v47, %v1500_v51  ;;  %664 = vadd.xlane.f32.xlu0 %v663_v2  ;;  %5279 = vmatprep.mubr.msk.f32.mxu0 %vm6216_vm0, %v6217_v6 }
 0x39e   :  { %v5993_v42 = vpop.eup %5992  ;;  %v1515_v57 = vmul.f32 1.442695, %v1507_v55 }
 0x39f   :  { %v1503_v35 = vpop.xlane.xlu1 %1502  ;;  %5280 = vmatmul.mubr.msk.f32.vlgmr.msra.gmra.mrb[50].mxu0 %vm619_vm5, %v5993_v42  ;;  %v1519_v63 = vsel %vm619_vm5, %v5993_v42, 0.0 }
 0x3a0   :  { %5998 = vpow2.f32 %v1515_v57  ;;  %v1508_v40 = vsub.f32 %v6812_v54, %v1503_v35  ;;  %1244 = vadd.xlane.f32.xlu0 %v1243_v61  ;;  %1520 = vadd.xlane.f32.xlu1 %v1519_v63 }
 0x3a1   :  { %5282 = vmatprep.mubr.msk.f32.mxu0 %vm6216_vm0, %v6217_v6 }
 0x3a2   :  { %v5995_v47 = vpop.eup %5994  ;;  %v1517_v29 = vmul.f32 1.442695, %v1508_v40 }
 0x3a3   :  { %5283 = vmatmul.mubr.msk.f32.gmra.mrb[52].mxu0 %vm619_vm5, %v5995_v47  ;;  %v1522_v10 = vsel %vm619_vm5, %v5995_v47, 0.0 }
 0x3a4   :  { %6000 = vpow2.f32 %v1517_v29  ;;  %1523 = vadd.xlane.f32.xlu1 %v1522_v10  ;;  %5285 = vmatprep.mubr.msk.f32.mxu0 %vm6216_vm0, %v6217_v6 }
 0x3a6   :  { %v5997_v1 = vpop.eup %5996 }
 0x3a7   :  { %5286 = vmatmul.mubr.msk.f32.gmra.mrb[54].mxu0 %vm619_vm5, %v5997_v1  ;;  %v1525_v54 = vsel %vm619_vm5, %v5997_v1, 0.0 }
 0x3a8   :  { %1526 = vadd.xlane.f32.xlu1 %v1525_v54  ;;  %5288 = vmatprep.mubr.msk.f32.mxu0 %vm6216_vm0, %v6217_v6 }
 0x3aa   :  { %v5999_v5 = vpop.eup %5998 }
 0x3ab   :  { %5289 = vmatmul.mubr.msk.f32.gmra.mrb[56].mxu0 %vm619_vm5, %v5999_v5  ;;  %v1528_v8 = vsel %vm619_vm5, %v5999_v5, 0.0 }
 0x3ac   :  { %1529 = vadd.xlane.f32.xlu1 %v1528_v8  ;;  %5291 = vmatprep.mubr.msk.f32.mxu0 %vm6216_vm0, %v6217_v6 }
 0x3ae   :  { %v6001_v46 = vpop.eup %6000 }
 0x3af   :  { %5292 = vmatmul.mubr.msk.f32.gmra.mrb[58].mxu0 %vm619_vm5, %v6001_v46  ;;  %v1531_v16 = vsel %vm632_vm6, %v6001_v46, 0.0 }
 0x3b0   :  { %956 = vadd.xlane.f32.xlu1 %v955_v12  ;;  %5325 = vmatprep.mubr.msk.f32.mxu0 %vm6216_vm0, %v6217_v6 }
 0x3b4   :  { %1532 = vadd.xlane.f32.xlu1 %v1531_v16 }
 0x3f1   :  { %v653_v58 = vpop.xlane.xlu0 %652 }
 0x3f2   :  { %6002 = vrcp.f32 %v653_v58 }
 0x3f5   :  { %v656_v59 = vpop.xlane.xlu1 %655 }
 0x3f9   :  { %v659_v7 = vpop.xlane.xlu1 %658 }
 0x3fc   :  { %v6003_v2 = vpop.eup %6002 }
 0x3fd   :  { %v662_v25 = vpop.xlane.xlu1 %661 }
 0x405   :  { %v945_v4 = vpop.xlane.xlu1 %944 }
 0x406   :  { %6004 = vrcp.f32 %v945_v4 }
 0x407   :  { %6006 = vrcp.f32 %v656_v59 }
 0x409   :  { %v948_v0 = vpop.xlane.xlu0 %947 }
 0x40a   :  { %6008 = vrcp.f32 %v948_v0 }
 0x40b   :  { %6010 = vrcp.f32 %v659_v7 }
 0x40d   :  { %v951_v14 = vpop.xlane.xlu0 %950 }
 0x40e   :  { %6012 = vrcp.f32 %v951_v14 }
 0x40f   :  { %6014 = vrcp.f32 %v662_v25 }
 0x410   :  { %v6005_v57 = vpop.eup %6004 }
 0x411   :  { %v954_v28 = vpop.xlane.xlu0 %953  ;;  %v6007_v29 = vpop.eup %6006 }
 0x412   :  { %6016 = vrcp.f32 %v954_v28 }
 0x414   :  { %v6009_v8 = vpop.eup %6008 }
 0x415   :  { %v6011_v18 = vpop.eup %6010 }
 0x418   :  { %v6013_v23 = vpop.eup %6012 }
 0x419   :  { %v1233_v30 = vpop.xlane.xlu0 %1232  ;;  %v6015_v14 = vpop.eup %6014 }
 0x41d   :  { %v1236_v38 = vpop.xlane.xlu0 %1235 }
 0x421   :  { %v6963_v56 = vpop.xlane.xlu0 %1238 }
 0x425   :  { %v6967_v50 = vpop.xlane.xlu0 %1241 }
 0x429   :  { %v665_v40 = vpop.xlane.xlu0 %664 }
 0x42a   :  { %6018 = vrcp.f32 %v665_v40 }
 0x42d   :  { %v6959_v13 = vpop.xlane.xlu1 %1520 }
 0x431   :  { %v6961_v62 = vpop.xlane.xlu1 %1523 }
 0x435   :  { %v6965_v9 = vpop.xlane.xlu1 %1526 }
 0x436   :  { %v751_v20 = vpop.f32.mrb[20].mxu0 }
 0x437   :  { %v5131_v31 = vpop.f32.mrb[21].mxu0  ;;  %v775_v11 = vmul.f32 %v6541_v27, %v751_v20  ;;  %v6017_v20 = vpop.eup %6016 }
 0x439   :  { %v6970_v33 = vpop.xlane.xlu1 %1529  ;;  %v785_v35 = vmul.f32 %v6003_v2, %v775_v11 }
 0x43a   :  { %v756_v36 = vpop.f32.mrb[22].mxu0 }
 0x43b   :  { %v5134_v37 = vpop.f32.mrb[23].mxu0  ;;  %v776_v61 = vmul.f32 %v6541_v27, %v756_v36 }
 0x43d   :  { %v957_v10 = vpop.xlane.xlu1 %956  ;;  %v786_v46 = vmul.f32 %v6007_v29, %v776_v61 }
 0x43e   :  { %v761_v21 = vpop.f32.mrb[24].mxu0  ;;  %6020 = vrcp.f32 %v957_v10 }
 0x43f   :  { %v5137_v24 = vpop.f32.mrb[25].mxu0  ;;  %v777_v12 = vmul.f32 %v6541_v27, %v761_v21  ;;  %6022 = vrcp.f32 %v1233_v30 }
 0x440   :  { %6024 = vrcp.f32 %v1236_v38  ;;  %v6019_v24 = vpop.eup %6018 }
 0x441   :  { %v787_v58 = vmul.f32 %v6011_v18, %v777_v12  ;;  %6026 = vrcp.f32 %v6963_v56 }
 0x442   :  { %v766_v43 = vpop.f32.mrb[26].mxu0  ;;  %6028 = vrcp.f32 %v6967_v50 }
 0x443   :  { %v5140_v26 = vpop.f32.mrb[27].mxu0  ;;  %v778_v59 = vmul.f32 %v6541_v27, %v766_v43 }
 0x445   :  { %v788_v31 = vmul.f32 %v6015_v14, %v778_v59 }
 0x446   :  { %v771_v45 = vpop.f32.mrb[28].mxu0 }
 0x447   :  { %v5143_v60 = vpop.f32.mrb[29].mxu0  ;;  %v779_v36 = vmul.f32 %v6541_v27, %v771_v45  ;;  %v1245_v45 = vpop.xlane.xlu0 %1244 }
 0x448   :  { %v6021_v11 = vpop.eup %6020  ;;  %6030 = vrcp.f32 %v1245_v45 }
 0x449   :  { %v789_v30 = vmul.f32 %v6019_v24, %v779_v36  ;;  %6032 = vrcp.f32 %v6959_v13 }
 0x44a   :  { %v1039_v51 = vpop.f32.mrb[30].mxu0  ;;  %6034 = vrcp.f32 %v6961_v62  ;;  %v1533_v62 = vpop.xlane.xlu1 %1532 }
 0x44b   :  { %v1063_v55 = vmul.f32 %v6578_v34, %v1039_v51  ;;  %v5181_v42 = vpop.f32.mrb[31].mxu0  ;;  %6036 = vrcp.f32 %v6965_v9 }
 0x44c   :  { %6038 = vrcp.f32 %v6970_v33 }
 0x44d   :  { %v1073_v63 = vmul.f32 %v6005_v57, %v1063_v55  ;;  %6040 = vrcp.f32 %v1533_v62 }
 0x44e   :  { %v1044_v47 = vpop.f32.mrb[32].mxu0 }
 0x44f   :  { %v1078_v1 = vadd.f32 %v1073_v63, %v785_v35  ;;  %v1064_v54 = vmul.f32 %v6578_v34, %v1044_v47  ;;  %v5184_v5 = vpop.f32.mrb[33].mxu0  ;;  %v6023_v35 = vpop.eup %6022 }
 0x450   :  { %v6025_v40 = vpop.eup %6024 }
 0x451   :  { %v1074_v16 = vmul.f32 %v6009_v8, %v1064_v54  ;;  %v6027_v5 = vpop.eup %6026 }
 0x452   :  { %v1049_v15 = vpop.f32.mrb[34].mxu0 }
 0x453   :  { %v1079_v53 = vadd.f32 %v1074_v16, %v786_v46  ;;  %v1065_v19 = vmul.f32 %v6578_v34, %v1049_v15  ;;  %v5187_v22 = vpop.f32.mrb[35].mxu0  ;;  %v6029_v16 = vpop.eup %6028 }
 0x455   :  { %v1075_v0 = vmul.f32 %v6013_v23, %v1065_v19  ;;  %v6031_v23 = vpop.eup %6030 }
 0x456   :  { %v1054_v7 = vpop.f32.mrb[36].mxu0  ;;  %v6033_v14 = vpop.eup %6032 }
 0x457   :  { %v1080_v25 = vadd.f32 %v1075_v0, %v787_v58  ;;  %v1066_v28 = vmul.f32 %v6578_v34, %v1054_v7  ;;  %v5190_v4 = vpop.f32.mrb[37].mxu0 }
 0x459   :  { %v1076_v37 = vmul.f32 %v6017_v20, %v1066_v28 }
 0x45a   :  { %v1059_v21 = vpop.f32.mrb[38].mxu0 }
 0x45b   :  { %v1081_v26 = vadd.f32 %v1076_v37, %v788_v31  ;;  %v1067_v60 = vmul.f32 %v6578_v34, %v1059_v21  ;;  %v5193_v43 = vpop.f32.mrb[39].mxu0  ;;  %v6035_v31 = vpop.eup %6034 }
 0x45c   :  { %v6037_v33 = vpop.eup %6036 }
 0x45d   :  { %v1077_v51 = vmul.f32 %v6021_v11, %v1067_v60 }
 0x45e   :  { %v1327_v2 = vpop.f32.mrb[40].mxu0 }
 0x45f   :  { %v1082_v55 = vadd.f32 %v1077_v51, %v789_v30  ;;  %v1351_v42 = vmul.f32 %v6618_v41, %v1327_v2  ;;  %v5231_v57 = vpop.f32.mrb[41].mxu0  ;;  %v6039_v51 = vpop.eup %6038 }
 0x461   :  { %v1361_v27 = vmul.f32 %v6023_v35, %v1351_v42 }
 0x462   :  { %v1332_v38 = vpop.f32.mrb[42].mxu0 }
 0x463   :  { %v1366_v61 = vadd.f32 %v1361_v27, %v1078_v1  ;;  %v1352_v34 = vmul.f32 %v6618_v41, %v1332_v38  ;;  %v5234_v63 = vpop.f32.mrb[43].mxu0  ;;  %v6041_v27 = vpop.eup %6040 }
 0x465   :  { %v1362_v47 = vmul.f32 %v6025_v40, %v1352_v34 }
 0x466   :  { %v1337_v29 = vpop.f32.mrb[44].mxu0 }
 0x467   :  { %v1367_v56 = vadd.f32 %v1362_v47, %v1079_v53  ;;  %v1353_v10 = vmul.f32 %v6618_v41, %v1337_v29  ;;  %v5237_v54 = vpop.f32.mrb[45].mxu0 }
 0x469   :  { %v1363_v8 = vmul.f32 %v6027_v5, %v1353_v10 }
 0x46a   :  { %v1342_v46 = vpop.f32.mrb[46].mxu0 }
 0x46b   :  { %v1368_v50 = vadd.f32 %v1363_v8, %v1080_v25  ;;  %v1354_v12 = vmul.f32 %v6618_v41, %v1342_v46  ;;  %v5240_v1 = vpop.f32.mrb[47].mxu0 }
 0x46d   :  { %v1364_v15 = vmul.f32 %v6029_v16, %v1354_v12 }
 0x46e   :  { %v1347_v18 = vpop.f32.mrb[48].mxu0 }
 0x46f   :  { %v1369_v19 = vadd.f32 %v1364_v15, %v1081_v26  ;;  %v1355_v53 = vmul.f32 %v6618_v41, %v1347_v18  ;;  %v5243_v22 = vpop.f32.mrb[49].mxu0 }
 0x471   :  { %v1365_v58 = vmul.f32 %v6031_v23, %v1355_v53 }
 0x472   :  { %v1615_v59 = vpop.f32.mrb[50].mxu0 }
 0x473   :  { %v1370_v13 = vadd.f32 %v1365_v58, %v1082_v55  ;;  %v1639_v0 = vmul.f32 %v6658_v49, %v1615_v59  ;;  %v5281_v7 = vpop.f32.mrb[51].mxu0 }
 0x475   :  { %v1649_v25 = vmul.f32 %v6033_v14, %v1639_v0 }
 0x476   :  { %v1620_v28 = vpop.f32.mrb[52].mxu0 }
 0x477   :  { %v1654_v4 = vadd.f32 %v1649_v25, %v1366_v61  ;;  %v1640_v20 = vmul.f32 %v6658_v49, %v1620_v28  ;;  %v5284_v41 = vpop.f32.mrb[53].mxu0 }
 0x479   :  { %v1650_v36 = vmul.f32 %v6035_v31, %v1640_v20  ;;  %5303 = vmatmul.mubr.msk.f32.vlgmr.msra.gmra.mrb[60].mxu1 %vm191_vm2, %v1654_v4 }
 0x47a   :  { %v1625_v9 = vpop.f32.mrb[54].mxu0  ;;  %5305 = vmatprep.mubr.msk.f32.mxu1 %vm6216_vm0, %v6217_v6 }
 0x47b   :  { %v1655_v37 = vadd.f32 %v1650_v36, %v1367_v56  ;;  %v1641_v21 = vmul.f32 %v6658_v49, %v1625_v9  ;;  %v5287_v24 = vpop.f32.mrb[55].mxu0 }
 0x47c   :  { %v1864_v24 = vld [vmem:[%s7978_s9] sm:$0xff] }
 0x47d   :  { %v1651_v26 = vmul.f32 %v6037_v33, %v1641_v21  ;;  %5306 = vmatmul.mubr.msk.f32.gmra.mrb[62].mxu1 %vm191_vm2, %v1655_v37  ;;  %v1865_v33 = vld [vmem:[%s7978_s9 + $0x8] sm:$0xff] }
 0x47e   :  { %v1630_v60 = vpop.f32.mrb[56].mxu0  ;;  %5308 = vmatprep.mubr.msk.f32.mxu1 %vm6216_vm0, %v6217_v6 }
 0x47f   :  { %v1656_v43 = vadd.f32 %v1651_v26, %v1368_v50  ;;  %v1642_v11 = vmul.f32 %v6658_v49, %v1630_v60  ;;  %v5290_v30 = vpop.f32.mrb[57].mxu0  ;;  %v5831_v26 = vpack.c.bf16 %v1865_v33, %v1864_v24  ;;  %v1866_v60 = vld [vmem:[%s7978_s9 + $0x10] sm:$0xff] }
 0x481   :  { %v1652_v2 = vmul.f32 %v6039_v51, %v1642_v11  ;;  %5309 = vmatmul.mubr.msk.f32.gmra.mrb[64].mxu1 %vm191_vm2, %v1656_v43  ;;  %5832 = vmatpush3.bf16.msra.mxu0 %v5831_v26  ;;  %v1867_v43 = vld [vmem:[%s7978_s9 + $0x18] sm:$0xff] }
 0x482   :  { %v1635_v55 = vpop.f32.mrb[58].mxu0  ;;  %5311 = vmatprep.mubr.msk.f32.mxu1 %vm6216_vm0, %v6217_v6  ;;  %5833 = vmatprep.subr.bf16.mxu0 %v6215_v3  ;;  %v5834_v11 = vpack.c.bf16 %v1867_v43, %v1866_v60 }
 0x483   :  { %v1657_v42 = vadd.f32 %v1652_v2, %v1369_v19  ;;  %v1643_v57 = vmul.f32 %v6658_v49, %v1635_v55  ;;  %v5293_v35 = vpop.f32.mrb[59].mxu0 }
 0x485   :  { %v1653_v38 = vmul.f32 %v6041_v27, %v1643_v57  ;;  %5312 = vmatmul.mubr.msk.f32.gmra.mrb[66].mxu1 %vm191_vm2, %v1657_v42  ;;  %5835 = vmatpush3.bf16.msra.mxu0 %v5834_v11 }
 0x486   :  { %5314 = vmatprep.mubr.msk.f32.mxu1 %vm6216_vm0, %v6217_v6  ;;  %5848 = vmatprep.subr.bf16.mxu0 %v6215_v3 }
 0x487   :  { %v1658_v45 = vadd.f32 %v1653_v38, %v1370_v13 }
 0x489   :  { %5315 = vmatmul.mubr.msk.f32.gmra.mrb[68].mxu1 %vm191_vm2, %v1658_v45 }
 0x48a   :  { %5356 = vmatprep.mubr.msk.f32.mxu1 %vm6216_vm0, %v6217_v6 }
 0x54c   :  { %v1744_v61 = vpop.f32.mrb[60].mxu1 }
 0x54d   :  { %v1768_v34 = vadd.f32 %v1744_v61, %v6408_v32  ;;  %v5304_v63 = vpop.f32.mrb[61].mxu1 }
 0x54e   :  { %v4546_v63 = vld [vmem:[%s7976_s7] ss:$0 sm:$0xff] }
 0x54f   :  { %v1775_v49 = vsel %vm191_vm2, %v1768_v34, 0.0 }
 0x550   :  { %1776 = vadd.xlane.f32.xlu0 %v1775_v49  ;;  %v1749_v40 = vpop.f32.mrb[62].mxu1 }
 0x551   :  { %v1769_v47 = vadd.f32 %v1749_v40, %v6427_v39  ;;  %v5307_v29 = vpop.f32.mrb[63].mxu1 }
 0x552   :  { %v4547_v29 = vld [vmem:[%s7977_s8] ss:$0 sm:$0xff] }
 0x553   :  { %v1778_v56 = vsel %vm191_vm2, %v1769_v47, 0.0 }
 0x554   :  { %1779 = vadd.xlane.f32.xlu1 %v1778_v56  ;;  %v1754_v10 = vpop.f32.mrb[64].mxu1 }
 0x555   :  { %v1770_v54 = vadd.f32 %v1754_v10, %v6441_v44  ;;  %v5310_v5 = vpop.f32.mrb[65].mxu1 }
 0x557   :  { %v1781_v8 = vsel %vm191_vm2, %v1770_v54, 0.0 }
 0x558   :  { %1782 = vadd.xlane.f32.xlu0 %v1781_v8  ;;  %v1759_v46 = vpop.f32.mrb[66].mxu1 }
 0x559   :  { %v1771_v32 = vadd.f32 %v1759_v46, %v6455_v48  ;;  %v5313_v50 = vpop.f32.mrb[67].mxu1 }
 0x55b   :  { %v1784_v12 = vsel %vm191_vm2, %v1771_v32, 0.0 }
 0x55c   :  { %1785 = vadd.xlane.f32.xlu1 %v1784_v12  ;;  %v1764_v1 = vpop.f32.mrb[68].mxu1 }
 0x55d   :  { %v1772_v39 = vadd.f32 %v1764_v1, %v6468_v52  ;;  %v5316_v16 = vpop.f32.mrb[69].mxu1 }
 0x55f   :  { %v1788_v15 = vsel %vm1787_vm7, %v1772_v39, 0.0 }
 0x560   :  { %1789 = vadd.xlane.f32.xlu0 %v1788_v15 }
 0x5dd   :  { %v1777_v44 = vpop.xlane.xlu0 %1776 }
 0x5de   :  { %v1792_v18 = vmul.f32 0.03125, %v1777_v44 }
 0x5e0   :  { %v1797_v19 = vsub.f32 %v1768_v34, %v1792_v18 }
 0x5e1   :  { %v1780_v53 = vpop.xlane.xlu1 %1779 }
 0x5e2   :  { %v1793_v22 = vmul.f32 0.03125, %v1780_v53  ;;  %v1802_v23 = vmul.f32 %v1797_v19, %v1797_v19 }
 0x5e4   :  { %v1798_v58 = vsub.f32 %v1769_v47, %v1793_v22  ;;  %v1807_v48 = vsel %vm191_vm2, %v1802_v23, 0.0 }
 0x5e5   :  { %v1783_v59 = vpop.xlane.xlu0 %1782  ;;  %1808 = vadd.xlane.f32.xlu1 %v1807_v48  ;;  %v2025_v48 = vld [vmem:[%s7980_s11] sm:$0xff] }
 0x5e6   :  { %v1794_v13 = vmul.f32 0.03125, %v1783_v59  ;;  %v1803_v0 = vmul.f32 %v1798_v58, %v1798_v58  ;;  %v2026_v59 = vld [vmem:[%s7980_s11 + $0x8] sm:$0xff] }
 0x5e8   :  { %v1799_v7 = vsub.f32 %v1770_v54, %v1794_v13  ;;  %v1810_v52 = vsel %vm191_vm2, %v1803_v0, 0.0  ;;  %v5837_v13 = vpack.c.bf16 %v2026_v59, %v2025_v48  ;;  %v2027_v0 = vld [vmem:[%s7980_s11 + $0x10] sm:$0xff] }
 0x5e9   :  { %v1786_v14 = vpop.xlane.xlu1 %1785  ;;  %1811 = vadd.xlane.f32.xlu0 %v1810_v52 }
 0x5ea   :  { %v1795_v25 = vmul.f32 0.03125, %v1786_v14  ;;  %v1804_v28 = vmul.f32 %v1799_v7, %v1799_v7  ;;  %5838 = vmatpush3.bf16.msra.mxu1 %v5837_v13  ;;  %v2029_v14 = vld [vmem:[%s7980_s11 + $0x20] sm:$0xff] }
 0x5eb   :  { %5839 = vmatprep.subr.bf16.mxu1 %v6215_v3 }
 0x5ec   :  { %v1800_v62 = vsub.f32 %v1771_v32, %v1795_v25  ;;  %v1813_v4 = vsel %vm191_vm2, %v1804_v28, 0.0  ;;  %v2030_v25 = vld [vmem:[%s7980_s11 + $0x28] sm:$0xff] }
 0x5ed   :  { %1814 = vadd.xlane.f32.xlu1 %v1813_v4  ;;  %v1790_v20 = vpop.xlane.xlu0 %1789  ;;  %v5843_v28 = vpack.c.bf16 %v2030_v25, %v2029_v14  ;;  %v2032_v4 = vld [vmem:[%s7980_s11 + $0x38] sm:$0xff] }
 0x5ee   :  { %v1796_v41 = vmul.f32 0.03125, %v1790_v20  ;;  %v1805_v31 = vmul.f32 %v1800_v62, %v1800_v62 }
 0x5f0   :  { %v1801_v36 = vsub.f32 %v1772_v39, %v1796_v41  ;;  %v1816_v9 = vsel %vm191_vm2, %v1805_v31, 0.0  ;;  %v4548_v41 = vld [vmem:[%s7979_s10] ss:$0 sm:$0xff] }
 0x5f1   :  { %1817 = vadd.xlane.f32.xlu0 %v1816_v9 }
 0x5f2   :  { %v1806_v37 = vmul.f32 %v1801_v36, %v1801_v36 }
 0x5f4   :  { %v1819_v21 = vsel %vm1787_vm7, %v1806_v37, 0.0 }
 0x5f5   :  { %1820 = vadd.xlane.f32.xlu1 %v1819_v21 }
 0x672   :  { %v1809_v30 = vpop.xlane.xlu1 %1808 }
 0x673   :  { %v1822_v51 = vmul.f32 0.03125, %v1809_v30 }
 0x675   :  { %v1827_v2 = vadd.f32 1e-05, %v1822_v51 }
 0x676   :  { %v1812_v55 = vpop.xlane.xlu0 %1811 }
 0x677   :  { %6042 = vrsqrt.f32 %v1827_v2  ;;  %v1823_v42 = vmul.f32 0.03125, %v1812_v55 }
 0x679   :  { %v1828_v57 = vadd.f32 1e-05, %v1823_v42 }
 0x67a   :  { %v1815_v35 = vpop.xlane.xlu1 %1814 }
 0x67b   :  { %6044 = vrsqrt.f32 %v1828_v57  ;;  %v1824_v27 = vmul.f32 0.03125, %v1815_v35 }
 0x67d   :  { %v1829_v38 = vadd.f32 1e-05, %v1824_v27 }
 0x67e   :  { %v1818_v45 = vpop.xlane.xlu0 %1817 }
 0x67f   :  { %6046 = vrsqrt.f32 %v1829_v38  ;;  %v1825_v61 = vmul.f32 0.03125, %v1818_v45 }
 0x681   :  { %v6043_v34 = vpop.eup %6042  ;;  %v1830_v49 = vadd.f32 1e-05, %v1825_v61 }
 0x682   :  { %v1837_v40 = vmul.f32 %v6043_v34, %v1797_v19  ;;  %v1821_v47 = vpop.xlane.xlu1 %1820 }
 0x683   :  { %6048 = vrsqrt.f32 %v1830_v49  ;;  %v1826_v56 = vmul.f32 0.03125, %v1821_v47 }
 0x684   :  { %v1848_v10 = vmul.f32 %v4546_v63, %v1837_v40 }
 0x685   :  { %v6045_v54 = vpop.eup %6044  ;;  %v1831_v5 = vadd.f32 1e-05, %v1826_v56 }
 0x686   :  { %v7047_v8 = vadd.f32 %v4547_v29, %v1848_v10  ;;  %v1838_v46 = vmul.f32 %v6045_v54, %v1798_v58 }
 0x687   :  { %6050 = vrsqrt.f32 %v1831_v5 }
 0x688   :  { %5326 = vmatmul.mubr.msk.f32.vlgmr.msra.gmra.mrb[60].mxu0 %vm191_vm2, %v7047_v8  ;;  %v1849_v32 = vmul.f32 %v4546_v63, %v1838_v46 }
 0x689   :  { %v6047_v50 = vpop.eup %6046  ;;  %5328 = vmatprep.mubr.msk.f32.mxu0 %vm6216_vm0, %v6217_v6 }
 0x68a   :  { %v7053_v12 = vadd.f32 %v4547_v29, %v1849_v32  ;;  %v1839_v1 = vmul.f32 %v6047_v50, %v1799_v7  ;;  %v2028_v7 = vld [vmem:[%s7980_s11 + $0x18] sm:$0xff] }
 0x68b   :  { %v5840_v52 = vpack.c.bf16 %v2028_v7, %v2027_v0 }
 0x68c   :  { %5329 = vmatmul.mubr.msk.f32.gmra.mrb[62].mxu0 %vm191_vm2, %v7053_v12  ;;  %v1850_v39 = vmul.f32 %v4546_v63, %v1839_v1 }
 0x68d   :  { %v6049_v16 = vpop.eup %6048  ;;  %5331 = vmatprep.mubr.msk.f32.mxu0 %vm6216_vm0, %v6217_v6  ;;  %5841 = vmatpush3.bf16.msra.mxu1 %v5840_v52 }
 0x68e   :  { %v7059_v15 = vadd.f32 %v4547_v29, %v1850_v39  ;;  %v1840_v44 = vmul.f32 %v6049_v16, %v1800_v62  ;;  %5842 = vmatprep.subr.bf16.mxu1 %v6215_v3  ;;  %v2031_v62 = vld [vmem:[%s7980_s11 + $0x30] sm:$0xff] }
 0x68f   :  { %v5846_v20 = vpack.c.bf16 %v2032_v4, %v2031_v62 }
 0x690   :  { %5332 = vmatmul.mubr.msk.f32.gmra.mrb[64].mxu0 %vm191_vm2, %v7059_v15  ;;  %v1851_v18 = vmul.f32 %v4546_v63, %v1840_v44 }
 0x691   :  { %v6051_v19 = vpop.eup %6050  ;;  %5334 = vmatprep.mubr.msk.f32.mxu0 %vm6216_vm0, %v6217_v6  ;;  %5844 = vmatpush3.bf16.msra.mxu1 %v5843_v28 }
 0x692   :  { %v7065_v53 = vadd.f32 %v4547_v29, %v1851_v18  ;;  %v1841_v22 = vmul.f32 %v6051_v19, %v1801_v36  ;;  %5845 = vmatprep.subr.bf16.mxu1 %v6215_v3 }
 0x694   :  { %5335 = vmatmul.mubr.msk.f32.gmra.mrb[66].mxu0 %vm191_vm2, %v7065_v53  ;;  %v1852_v23 = vmul.f32 %v4546_v63, %v1841_v22 }
 0x695   :  { %5337 = vmatprep.mubr.msk.f32.mxu0 %vm6216_vm0, %v6217_v6  ;;  %5847 = vmatpush3.bf16.msra.mxu1 %v5846_v20 }
 0x696   :  { %v7071_v58 = vadd.f32 %v4547_v29, %v1852_v23  ;;  %5854 = vmatprep.subr.bf16.mxu1 %v6215_v3 }
 0x698   :  { %5338 = vmatmul.mubr.msk.f32.gmra.mrb[68].mxu0 %vm191_vm2, %v7071_v58 }
 0x699   :  { %5379 = vmatprep.mubr.msk.f32.mxu0 %vm6216_vm0, %v6217_v6 }
 0x75b   :  { %v1956_v31 = vpop.f32.mrb[60].mxu0 }
 0x75c   :  { %v1957_v36 = vadd.f32 %v4548_v41, %v1956_v31  ;;  %v5327_v9 = vpop.f32.mrb[61].mxu0 }
 0x75e   :  { %v1985_v37 = vmul.f32 %v1957_v36, %v1957_v36  ;;  %v1980_v18 = vmul.f32 0.5, %v1957_v36 }
 0x75f   :  { %v1961_v21 = vpop.f32.mrb[62].mxu0 }
 0x760   :  { %v1990_v24 = vmul.f32 %v1985_v37, %v1957_v36  ;;  %v1962_v33 = vadd.f32 %v4548_v41, %v1961_v21  ;;  %v5330_v26 = vpop.f32.mrb[63].mxu0  ;;  %v4554_v21 = vld [vmem:[%s7981_s12] ss:$0 sm:$0xff] }
 0x762   :  { %v1995_v60 = vmul.f32 0.044715, %v1990_v24  ;;  %v1986_v43 = vmul.f32 %v1962_v33, %v1962_v33  ;;  %v1981_v13 = vmul.f32 0.5, %v1962_v33 }
 0x763   :  { %v1966_v11 = vpop.f32.mrb[64].mxu0 }
 0x764   :  { %v2000_v30 = vadd.f32 %v1995_v60, %v1957_v36  ;;  %v1991_v51 = vmul.f32 %v1986_v43, %v1962_v33  ;;  %v1967_v2 = vadd.f32 %v4548_v41, %v1966_v11  ;;  %v5333_v55 = vpop.f32.mrb[65].mxu0 }
 0x766   :  { %v2005_v42 = vmul.f32 0.7978846, %v2000_v30  ;;  %v1996_v57 = vmul.f32 0.044715, %v1991_v51  ;;  %v1987_v35 = vmul.f32 %v1967_v2, %v1967_v2  ;;  %v1982_v14 = vmul.f32 0.5, %v1967_v2 }
 0x767   :  { %v1971_v27 = vpop.f32.mrb[66].mxu0 }
 0x768   :  { %6052 = vtanh.f32 %v2005_v42  ;;  %v2001_v38 = vadd.f32 %v1996_v57, %v1962_v33  ;;  %v1992_v45 = vmul.f32 %v1987_v35, %v1967_v2  ;;  %v1972_v61 = vadd.f32 %v4548_v41, %v1971_v27  ;;  %v5336_v34 = vpop.f32.mrb[67].mxu0 }
 0x76a   :  { %v2006_v63 = vmul.f32 0.7978846, %v2001_v38  ;;  %v1997_v49 = vmul.f32 0.044715, %v1992_v45  ;;  %v1988_v40 = vmul.f32 %v1972_v61, %v1972_v61  ;;  %v1983_v4 = vmul.f32 0.5, %v1972_v61 }
 0x76b   :  { %v1976_v47 = vpop.f32.mrb[68].mxu0 }
 0x76c   :  { %6054 = vtanh.f32 %v2006_v63  ;;  %v2002_v29 = vadd.f32 %v1997_v49, %v1967_v2  ;;  %v1993_v56 = vmul.f32 %v1988_v40, %v1972_v61  ;;  %v1977_v10 = vadd.f32 %v4548_v41, %v1976_v47  ;;  %v5339_v54 = vpop.f32.mrb[69].mxu0 }
 0x76e   :  { %v2007_v5 = vmul.f32 0.7978846, %v2002_v29  ;;  %v1998_v46 = vmul.f32 0.044715, %v1993_v56  ;;  %v1989_v32 = vmul.f32 %v1977_v10, %v1977_v10  ;;  %v1984_v36 = vmul.f32 0.5, %v1977_v10 }
 0x770   :  { %6056 = vtanh.f32 %v2007_v5  ;;  %v2003_v50 = vadd.f32 %v1998_v46, %v1972_v61  ;;  %v1994_v1 = vmul.f32 %v1989_v32, %v1977_v10 }
 0x772   :  { %v6053_v39 = vpop.eup %6052  ;;  %v2008_v16 = vmul.f32 0.7978846, %v2003_v50  ;;  %v1999_v44 = vmul.f32 0.044715, %v1994_v1 }
 0x773   :  { %v2015_v19 = vadd.f32 1.0, %v6053_v39 }
 0x774   :  { %6058 = vtanh.f32 %v2008_v16  ;;  %v2004_v22 = vadd.f32 %v1999_v44, %v1977_v10 }
 0x775   :  { %v2020_v23 = vmul.f32 %v2015_v19, %v1980_v18 }
 0x776   :  { %v6055_v48 = vpop.eup %6054  ;;  %v2009_v59 = vmul.f32 0.7978846, %v2004_v22 }
 0x777   :  { %5357 = vmatmul.mubr.msk.f32.vlgmr.msra.gmra.mrb[70].mxu1 %vm2040_vm8, %v2020_v23  ;;  %v2016_v0 = vadd.f32 1.0, %v6055_v48 }
 0x778   :  { %6060 = vtanh.f32 %v2009_v59  ;;  %5359 = vmatprep.mubr.msk.f32.mxu1 %vm6216_vm0, %v6217_v6 }
 0x779   :  { %v2021_v7 = vmul.f32 %v2016_v0, %v1981_v13 }
 0x77a   :  { %v6057_v52 = vpop.eup %6056 }
 0x77b   :  { %5360 = vmatmul.mubr.msk.f32.gmra.mrb[72].mxu1 %vm2040_vm8, %v2021_v7  ;;  %v2017_v25 = vadd.f32 1.0, %v6057_v52 }
 0x77c   :  { %5362 = vmatprep.mubr.msk.f32.mxu1 %vm6216_vm0, %v6217_v6 }
 0x77d   :  { %v2022_v28 = vmul.f32 %v2017_v25, %v1982_v14  ;;  %v4571_v25 = vld [vmem:[%s7974_s5 + $0x80] sm:$0xff] }
 0x77e   :  { %v6059_v62 = vpop.eup %6058 }
 0x77f   :  { %5363 = vmatmul.mubr.msk.f32.gmra.mrb[74].mxu1 %vm2040_vm8, %v2022_v28  ;;  %v2018_v20 = vadd.f32 1.0, %v6059_v62  ;;  %v4572_v28 = vld [vmem:[%s7974_s5 + $0x88] sm:$0xff]  ;;  %v4562_v62 = vld [vmem:[%s7974_s5 + $0x60] sm:$0xff] }
 0x780   :  { %5365 = vmatprep.mubr.msk.f32.mxu1 %vm6216_vm0, %v6217_v6 }
 0x781   :  { %v2023_v41 = vmul.f32 %v2018_v20, %v1983_v4  ;;  %v5855_v4 = vpack.c.bf16 %v4572_v28, %v4571_v25  ;;  %v4563_v20 = vld [vmem:[%s7974_s5 + $0x68] sm:$0xff] }
 0x782   :  { %v6061_v31 = vpop.eup %6060 }
 0x783   :  { %5366 = vmatmul.mubr.msk.f32.gmra.mrb[76].mxu1 %vm2040_vm8, %v2023_v41  ;;  %v2019_v9 = vadd.f32 1.0, %v6061_v31  ;;  %v5849_v41 = vpack.c.bf16 %v4563_v20, %v4562_v62  ;;  %v4564_v31 = vld [vmem:[%s7974_s5 + $0x70] sm:$0xff] }
 0x784   :  { %5368 = vmatprep.mubr.msk.f32.mxu1 %vm6216_vm0, %v6217_v6  ;;  %5856 = vmatpush3.bf16.msra.mxu1 %v5855_v4 }
 0x785   :  { %v2024_v37 = vmul.f32 %v2019_v9, %v1984_v36  ;;  %5850 = vmatpush3.bf16.msra.mxu0 %v5849_v41  ;;  %5857 = vmatprep.subr.bf16.mxu1 %v6215_v3  ;;  %v4565_v36 = vld [vmem:[%s7974_s5 + $0x78] sm:$0xff]  ;;  %v4573_v9 = vld [vmem:[%s7974_s5 + $0x90] sm:$0xff] }
 0x786   :  { %5851 = vmatprep.subr.bf16.mxu0 %v6215_v3 }
 0x787   :  { %5369 = vmatmul.mubr.msk.f32.gmra.mrb[78].mxu1 %vm2040_vm8, %v2024_v37  ;;  %v5852_v37 = vpack.c.bf16 %v4565_v36, %v4564_v31 }
 0x788   :  { %5402 = vmatprep.mubr.msk.f32.mxu1 %vm6216_vm0, %v6217_v6 }
 0x789   :  { %5853 = vmatpush3.bf16.msra.mxu0 %v5852_v37 }
 0x78a   :  { %5860 = vmatprep.subr.bf16.mxu0 %v6215_v3 }
 0x84a   :  { %v2122_v24 = vpop.f32.mrb[70].mxu1 }
 0x84b   :  { %v2123_v33 = vadd.f32 %v4554_v21, %v2122_v24  ;;  %v5358_v26 = vpop.f32.mrb[71].mxu1 }
 0x84d   :  { %v2146_v60 = vadd.f32 %v2123_v33, %v7047_v8 }
 0x84e   :  { %v2127_v43 = vpop.f32.mrb[72].mxu1 }
 0x84f   :  { %v2128_v11 = vadd.f32 %v4554_v21, %v2127_v43  ;;  %v5361_v30 = vpop.f32.mrb[73].mxu1  ;;  %v2153_v51 = vsel %vm191_vm2, %v2146_v60, 0.0 }
 0x850   :  { %2154 = vadd.xlane.f32.xlu0 %v2153_v51 }
 0x851   :  { %v2147_v2 = vadd.f32 %v2128_v11, %v7053_v12 }
 0x852   :  { %v2132_v55 = vpop.f32.mrb[74].mxu1 }
 0x853   :  { %v2133_v42 = vadd.f32 %v4554_v21, %v2132_v55  ;;  %v5364_v57 = vpop.f32.mrb[75].mxu1  ;;  %v2156_v35 = vsel %vm191_vm2, %v2147_v2, 0.0 }
 0x854   :  { %2157 = vadd.xlane.f32.xlu1 %v2156_v35 }
 0x855   :  { %v2148_v27 = vadd.f32 %v2133_v42, %v7059_v15 }
 0x856   :  { %v2137_v38 = vpop.f32.mrb[76].mxu1 }
 0x857   :  { %v2138_v45 = vadd.f32 %v4554_v21, %v2137_v38  ;;  %v5367_v61 = vpop.f32.mrb[77].mxu1  ;;  %v2159_v8 = vsel %vm191_vm2, %v2148_v27, 0.0 }
 0x858   :  { %2160 = vadd.xlane.f32.xlu0 %v2159_v8  ;;  %v4561_v8 = vld [vmem:[%s7983_s14] ss:$0 sm:$0xff] }
 0x859   :  { %v2149_v34 = vadd.f32 %v2138_v45, %v7065_v53 }
 0x85a   :  { %v2142_v63 = vpop.f32.mrb[78].mxu1 }
 0x85b   :  { %v2143_v49 = vadd.f32 %v4554_v21, %v2142_v63  ;;  %v5370_v40 = vpop.f32.mrb[79].mxu1  ;;  %v2162_v12 = vsel %vm191_vm2, %v2149_v34, 0.0  ;;  %v4574_v21 = vld [vmem:[%s7974_s5 + $0x98] sm:$0xff]  ;;  %v4580_v63 = vld [vmem:[%s7974_s5 + $0xa0] sm:$0xff] }
 0x85c   :  { %2163 = vadd.xlane.f32.xlu1 %v2162_v12  ;;  %v5858_v24 = vpack.c.bf16 %v4574_v21, %v4573_v9 }
 0x85d   :  { %v2150_v47 = vadd.f32 %v2143_v49, %v7071_v58  ;;  %v4581_v49 = vld [vmem:[%s7974_s5 + $0xa8] sm:$0xff] }
 0x85e   :  { %5859 = vmatpush3.bf16.msra.mxu1 %v5858_v24 }
 0x85f   :  { %v2165_v29 = vsel %vm1787_vm7, %v2150_v47, 0.0  ;;  %5866 = vmatprep.subr.bf16.mxu1 %v6215_v3 }
 0x860   :  { %2166 = vadd.xlane.f32.xlu0 %v2165_v29 }
 0x8dd   :  { %v2155_v15 = vpop.xlane.xlu0 %2154 }
 0x8de   :  { %v2168_v56 = vmul.f32 0.03125, %v2155_v15 }
 0x8e0   :  { %v7136_v10 = vsub.f32 %v2146_v60, %v2168_v56  ;;  %v5861_v56 = vpack.c.bf16 %v4581_v49, %v4580_v63 }
 0x8e1   :  { %v2158_v54 = vpop.xlane.xlu1 %2157 }
 0x8e2   :  { %v2169_v5 = vmul.f32 0.03125, %v2158_v54  ;;  %v2178_v53 = vmul.f32 %v7136_v10, %v7136_v10  ;;  %v4583_v54 = vld [vmem:[%s7974_s5 + $0xb8] sm:$0xff] }
 0x8e4   :  { %v7140_v46 = vsub.f32 %v2147_v2, %v2169_v5  ;;  %v2183_v32 = vsel %vm191_vm2, %v2178_v53, 0.0 }
 0x8e5   :  { %v2161_v50 = vpop.xlane.xlu0 %2160  ;;  %2184 = vadd.xlane.f32.xlu1 %v2183_v32 }
 0x8e6   :  { %v2170_v1 = vmul.f32 0.03125, %v2161_v50  ;;  %v2179_v58 = vmul.f32 %v7140_v46, %v7140_v46 }
 0x8e8   :  { %v7145_v39 = vsub.f32 %v2148_v27, %v2170_v1  ;;  %v2186_v16 = vsel %vm191_vm2, %v2179_v58, 0.0  ;;  %v4560_v27 = vld [vmem:[%s7982_s13] ss:$0 sm:$0xff] }
 0x8e9   :  { %v2164_v44 = vpop.xlane.xlu1 %2163  ;;  %2187 = vadd.xlane.f32.xlu0 %v2186_v16 }
 0x8ea   :  { %v2171_v18 = vmul.f32 0.03125, %v2164_v44  ;;  %v2180_v19 = vmul.f32 %v7145_v39, %v7145_v39 }
 0x8ec   :  { %v7150_v22 = vsub.f32 %v2149_v34, %v2171_v18  ;;  %v2189_v23 = vsel %vm191_vm2, %v2180_v19, 0.0 }
 0x8ed   :  { %2190 = vadd.xlane.f32.xlu1 %v2189_v23  ;;  %v2167_v48 = vpop.xlane.xlu0 %2166 }
 0x8ee   :  { %v2172_v59 = vmul.f32 0.03125, %v2167_v48  ;;  %v2181_v13 = vmul.f32 %v7150_v22, %v7150_v22 }
 0x8f0   :  { %v7155_v0 = vsub.f32 %v2150_v47, %v2172_v59  ;;  %v2192_v7 = vsel %vm191_vm2, %v2181_v13, 0.0 }
 0x8f1   :  { %2193 = vadd.xlane.f32.xlu0 %v2192_v7 }
 0x8f2   :  { %v2182_v52 = vmul.f32 %v7155_v0, %v7155_v0 }
 0x8f4   :  { %v2195_v14 = vsel %vm1787_vm7, %v2182_v52, 0.0 }
 0x8f5   :  { %2196 = vadd.xlane.f32.xlu1 %v2195_v14 }
 0x972   :  { %v2185_v33 = vpop.xlane.xlu1 %2184 }
 0x973   :  { %v2198_v26 = vmul.f32 0.03125, %v2185_v33 }
 0x975   :  { %v2203_v60 = vadd.f32 1e-05, %v2198_v26 }
 0x976   :  { %v2188_v43 = vpop.xlane.xlu0 %2187 }
 0x977   :  { %6062 = vrsqrt.f32 %v2203_v60  ;;  %v2199_v11 = vmul.f32 0.03125, %v2188_v43 }
 0x979   :  { %v2204_v30 = vadd.f32 1e-05, %v2199_v11 }
 0x97a   :  { %v2191_v51 = vpop.xlane.xlu1 %2190 }
 0x97b   :  { %6064 = vrsqrt.f32 %v2204_v30  ;;  %v2200_v2 = vmul.f32 0.03125, %v2191_v51 }
 0x97d   :  { %v2205_v55 = vadd.f32 1e-05, %v2200_v2  ;;  %v7313_v2 = vld [vmem:[%s7973_s4] ss:$0 sm:$0xff] }
 0x97e   :  { %v2194_v42 = vpop.xlane.xlu0 %2193 }
 0x97f   :  { %6066 = vrsqrt.f32 %v2205_v55  ;;  %v2201_v57 = vmul.f32 0.03125, %v2194_v42 }
 0x981   :  { %v6063_v35 = vpop.eup %6062  ;;  %v2206_v38 = vadd.f32 1e-05, %v2201_v57 }
 0x982   :  { %v2213_v45 = vmul.f32 %v6063_v35, %v7136_v10  ;;  %v2197_v61 = vpop.xlane.xlu1 %2196  ;;  %v4582_v10 = vld [vmem:[%s7974_s5 + $0xb0] sm:$0xff] }
 0x983   :  { %6068 = vrsqrt.f32 %v2206_v38  ;;  %v2202_v34 = vmul.f32 0.03125, %v2197_v61  ;;  %v5864_v50 = vpack.c.bf16 %v4583_v54, %v4582_v10 }
 0x984   :  { %v2224_v40 = vmul.f32 %v4560_v27, %v2213_v45 }
 0x985   :  { %v6065_v12 = vpop.eup %6064  ;;  %v2207_v47 = vadd.f32 1e-05, %v2202_v34 }
 0x986   :  { %v7202_v29 = vadd.f32 %v4561_v8, %v2224_v40  ;;  %v2214_v15 = vmul.f32 %v6065_v12, %v7140_v46 }
 0x987   :  { %6070 = vrsqrt.f32 %v2207_v47  ;;  %v7367_v47 = vld [vmem:[%s7973_s4 + $0x1] ss:$0 sm:$0xff] }
 0x988   :  { %5380 = vmatmul.mubr.msk.f32.vlgmr.msra.gmra.mrb[70].mxu0 %vm191_vm2, %v7202_v29  ;;  %5403 = vmatmul.mubr.msk.f32.vlgmr.msra.gmra.mrb[80].mxu1 %vm191_vm2, %v7202_v29  ;;  %v2225_v5 = vmul.f32 %v4560_v27, %v2214_v15 }
 0x989   :  { %v6067_v53 = vpop.eup %6066  ;;  %5382 = vmatprep.mubr.msk.f32.mxu0 %vm6216_vm0, %v6217_v6  ;;  %5405 = vmatprep.mubr.msk.f32.mxu1 %vm6216_vm0, %v6217_v6 }
 0x98a   :  { %v7219_v46 = vadd.f32 %v4561_v8, %v2225_v5  ;;  %v2215_v32 = vmul.f32 %v6067_v53, %v7145_v39  ;;  %5862 = vmatpush3.bf16.msra.mxu0 %v5861_v56  ;;  %v7408_v53 = vld [vmem:[%s7973_s4 + $0x2] ss:$0 sm:$0xff] }
 0x98b   :  { %5863 = vmatprep.subr.bf16.mxu0 %v6215_v3 }
 0x98c   :  { %5383 = vmatmul.mubr.msk.f32.gmra.mrb[72].mxu0 %vm191_vm2, %v7219_v46  ;;  %5406 = vmatmul.mubr.msk.f32.gmra.mrb[82].mxu1 %vm191_vm2, %v7219_v46  ;;  %v2226_v1 = vmul.f32 %v4560_v27, %v2215_v32 }
 0x98d   :  { %v6069_v58 = vpop.eup %6068  ;;  %5385 = vmatprep.mubr.msk.f32.mxu0 %vm6216_vm0, %v6217_v6  ;;  %5408 = vmatprep.mubr.msk.f32.mxu1 %vm6216_vm0, %v6217_v6 }
 0x98e   :  { %v7231_v16 = vadd.f32 %v4561_v8, %v2226_v1  ;;  %v2216_v39 = vmul.f32 %v6069_v58, %v7150_v22  ;;  %5865 = vmatpush3.bf16.msra.mxu0 %v5864_v50 }
 0x98f   :  { %5874 = vmatprep.subr.bf16.mxu0 %v6215_v3 }
 0x990   :  { %5386 = vmatmul.mubr.msk.f32.gmra.mrb[74].mxu0 %vm191_vm2, %v7231_v16  ;;  %5409 = vmatmul.mubr.msk.f32.gmra.mrb[84].mxu1 %vm191_vm2, %v7231_v16  ;;  %v2227_v44 = vmul.f32 %v4560_v27, %v2216_v39 }
 0x991   :  { %v6071_v18 = vpop.eup %6070  ;;  %5388 = vmatprep.mubr.msk.f32.mxu0 %vm6216_vm0, %v6217_v6  ;;  %5411 = vmatprep.mubr.msk.f32.mxu1 %vm6216_vm0, %v6217_v6 }
 0x992   :  { %v7243_v19 = vadd.f32 %v4561_v8, %v2227_v44  ;;  %v2217_v22 = vmul.f32 %v6071_v18, %v7155_v0 }
 0x994   :  { %5389 = vmatmul.mubr.msk.f32.gmra.mrb[76].mxu0 %vm191_vm2, %v7243_v19  ;;  %5412 = vmatmul.mubr.msk.f32.gmra.mrb[86].mxu1 %vm191_vm2, %v7243_v19  ;;  %v2228_v23 = vmul.f32 %v4560_v27, %v2217_v22 }
 0x995   :  { %5391 = vmatprep.mubr.msk.f32.mxu0 %vm6216_vm0, %v6217_v6  ;;  %5414 = vmatprep.mubr.msk.f32.mxu1 %vm6216_vm0, %v6217_v6 }
 0x996   :  { %v7254_v48 = vadd.f32 %v4561_v8, %v2228_v23 }
 0x998   :  { %5392 = vmatmul.mubr.msk.f32.gmra.mrb[78].mxu0 %vm191_vm2, %v7254_v48  ;;  %5415 = vmatmul.mubr.msk.f32.gmra.mrb[88].mxu1 %vm191_vm2, %v7254_v48 }
 0x999   :  { %5425 = vmatprep.mubr.msk.f32.mxu0 %vm6216_vm0, %v6217_v6  ;;  %5450 = vmatprep.mubr.msk.f32.mxu1 %vm6216_vm0, %v6217_v6 }
 0x99c   :  { %5426 = vmatmul.mubr.msk.f32.vlgmr.msra.gmra.mrb[80].mxu0 %vm191_vm2, %v7202_v29 }
 0x99d   :  { %5428 = vmatprep.mubr.msk.f32.mxu0 %vm6216_vm0, %v6217_v6 }
 0x9a0   :  { %5429 = vmatmul.mubr.msk.f32.gmra.mrb[82].mxu0 %vm191_vm2, %v7219_v46 }
 0x9a1   :  { %5431 = vmatprep.mubr.msk.f32.mxu0 %vm6216_vm0, %v6217_v6 }
 0x9a4   :  { %5432 = vmatmul.mubr.msk.f32.gmra.mrb[84].mxu0 %vm191_vm2, %v7231_v16 }
 0x9a5   :  { %5434 = vmatprep.mubr.msk.f32.mxu0 %vm6216_vm0, %v6217_v6 }
 0x9a8   :  { %5435 = vmatmul.mubr.msk.f32.gmra.mrb[86].mxu0 %vm191_vm2, %v7243_v19 }
 0x9a9   :  { %5437 = vmatprep.mubr.msk.f32.mxu0 %vm6216_vm0, %v6217_v6 }
 0x9ac   :  { %5438 = vmatmul.mubr.msk.f32.gmra.mrb[88].mxu0 %vm191_vm2, %v7254_v48 }
 0x9ad   :  { %5475 = vmatprep.mubr.msk.f32.mxu0 %vm6216_vm0, %v6217_v6 }
 0xa5b   :  { %v7284_v59 = vpop.f32.mrb[70].mxu0  ;;  %v2421_v13 = vpop.f32.mrb[80].mxu1 }
 0xa5c   :  { %v5381_v0 = vpop.f32.mrb[71].mxu0  ;;  %v5404_v7 = vpop.f32.mrb[81].mxu1  ;;  %v2540_v55 = vmul.f32 %v7313_v2, %v7284_v59  ;;  %v2838_v15 = vmul.f32 %v7367_v47, %v7284_v59  ;;  %v3118_v32 = vmul.f32 %v7408_v53, %v7284_v59  ;;  %v3398_v44 = vmul.f32 %v7449_v17, %v7284_v59 }
 0xa5d   :  { %v7480_v0 = vld [vmem:[%s7972_s3] sm:$0xff] }
 0xa5f   :  { %v7286_v52 = vpop.f32.mrb[72].mxu0  ;;  %v2426_v14 = vpop.f32.mrb[82].mxu1 }
 0xa60   :  { %v5384_v25 = vpop.f32.mrb[73].mxu0  ;;  %v5407_v28 = vpop.f32.mrb[83].mxu1  ;;  %v7288_v62 = vpack.c.bf16 %v2426_v14, %v2421_v13  ;;  %v2541_v27 = vmul.f32 %v7313_v2, %v7286_v52  ;;  %v2839_v56 = vmul.f32 %v7367_v47, %v7286_v52  ;;  %v3119_v50 = vmul.f32 %v7408_v53, %v7286_v52 }
 0xa61   :  { %v3399_v18 = vmul.f32 %v7449_v17, %v7286_v52  ;;  %v7490_v28 = vld [vmem:[%s7972_s3 + $0x8] sm:$0xff] }
 0xa62   :  { %5869 = vmatpush3.bf16.xpose.msk.msra.mxu1 %vm6523_vm4, %v7288_v62 }
 0xa63   :  { %v7293_v4 = vpop.f32.mrb[74].mxu0  ;;  %v2431_v20 = vpop.f32.mrb[84].mxu1  ;;  %5870 = vmatprep.subr.bf16.mxu1 %v6215_v3 }
 0xa64   :  { %v5387_v41 = vpop.f32.mrb[75].mxu0  ;;  %v5410_v31 = vpop.f32.mrb[85].mxu1  ;;  %v2542_v61 = vmul.f32 %v7313_v2, %v7293_v4  ;;  %v2840_v10 = vmul.f32 %v7367_v47, %v7293_v4  ;;  %v3120_v1 = vmul.f32 %v7408_v53, %v7293_v4  ;;  %v3400_v22 = vmul.f32 %v7449_v17, %v7293_v4 }
 0xa65   :  { %v7500_v31 = vld [vmem:[%s7972_s3 + $0x10] sm:$0xff] }
 0xa67   :  { %v7296_v36 = vpop.f32.mrb[76].mxu0  ;;  %v2436_v9 = vpop.f32.mrb[86].mxu1 }
 0xa68   :  { %v5390_v37 = vpop.f32.mrb[77].mxu0  ;;  %v5413_v21 = vpop.f32.mrb[87].mxu1  ;;  %v7298_v24 = vpack.c.bf16 %v2436_v9, %v2431_v20  ;;  %v2543_v49 = vmul.f32 %v7313_v2, %v7296_v36  ;;  %v2841_v54 = vmul.f32 %v7367_v47, %v7296_v36  ;;  %v3121_v58 = vmul.f32 %v7408_v53, %v7296_v36 }
 0xa69   :  { %v3401_v23 = vmul.f32 %v7449_v17, %v7296_v36 }
 0xa6a   :  { %5873 = vmatpush3.bf16.xpose.msk.msra.mxu1 %vm6523_vm4, %v7298_v24 }
 0xa6b   :  { %v7303_v33 = vpop.f32.mrb[78].mxu0  ;;  %v7305_v26 = vpop.f32.mrb[88].mxu1  ;;  %5448 = vmatprep.subr.mxu1 %v6217_v6 }
 0xa6c   :  { %v5393_v60 = vpop.f32.mrb[79].mxu0  ;;  %v5416_v43 = vpop.f32.mrb[89].mxu1  ;;  %v2544_v12 = vmul.f32 %v7313_v2, %v7303_v33  ;;  %v2842_v5 = vmul.f32 %v7367_v47, %v7303_v33  ;;  %v3122_v39 = vmul.f32 %v7408_v53, %v7303_v33  ;;  %v3402_v59 = vmul.f32 %v7449_v17, %v7303_v33 }
 0xa6f   :  { %v2516_v11 = vpop.f32.mrb[80].mxu0 }
 0xa70   :  { %v5427_v30 = vpop.f32.mrb[81].mxu0 }
 0xa72   :  { %5449 = vmatpush3.xpose.msk.msra.mxu1 %vm191_vm2, %v7305_v26 }
 0xa73   :  { %v2521_v51 = vpop.f32.mrb[82].mxu0  ;;  %5880 = vmatprep.subr.bf16.mxu1 %v6215_v3 }
 0xa74   :  { %v7317_v42 = vpack.c.bf16 %v2521_v51, %v2516_v11  ;;  %v5430_v57 = vpop.f32.mrb[83].mxu0  ;;  %v7520_v11 = vld [vmem:[%s7972_s3 + $0x20] sm:$0x3] }
 0xa75   :  { %5451 = vmatmul.mubr.msk.f32.vlgmr.msra.gmra.mrb[90].mxu1 %vm191_vm2, %v2540_v55 }
 0xa76   :  { %5876 = vmatpush3.bf16.msra.mxu0 %v7317_v42  ;;  %5883 = vmatpush3.bf16.xpose.msk.msra.mxu1 %vm6523_vm4, %v7288_v62 }
 0xa77   :  { %v2526_v35 = vpop.f32.mrb[84].mxu0  ;;  %5453 = vmatprep.mubr.msk.f32.mxu1 %vm6216_vm0, %v6217_v6  ;;  %5877 = vmatprep.subr.bf16.mxu0 %v6215_v3 }
 0xa78   :  { %v5433_v38 = vpop.f32.mrb[85].mxu0  ;;  %5884 = vmatprep.subr.bf16.mxu1 %v6215_v3 }
 0xa79   :  { %5454 = vmatmul.mubr.msk.f32.gmra.mrb[92].mxu1 %vm191_vm2, %v2541_v27 }
 0xa7a   :  { %5456 = vmatprep.mubr.msk.f32.mxu1 %vm6216_vm0, %v6217_v6 }
 0xa7b   :  { %v2531_v45 = vpop.f32.mrb[86].mxu0 }
 0xa7c   :  { %v7336_v8 = vpack.c.bf16 %v2531_v45, %v2526_v35  ;;  %v5436_v34 = vpop.f32.mrb[87].mxu0 }
 0xa7d   :  { %5457 = vmatmul.mubr.msk.f32.gmra.mrb[94].mxu1 %vm191_vm2, %v2542_v61 }
 0xa7e   :  { %5879 = vmatpush3.bf16.msra.mxu0 %v7336_v8  ;;  %5887 = vmatpush3.bf16.xpose.msk.msra.mxu1 %vm6523_vm4, %v7298_v24 }
 0xa7f   :  { %v7343_v63 = vpop.f32.mrb[88].mxu0  ;;  %5459 = vmatprep.mubr.msk.f32.mxu1 %vm6216_vm0, %v6217_v6  ;;  %5473 = vmatprep.subr.mxu0 %v6217_v6 }
 0xa80   :  { %v5439_v40 = vpop.f32.mrb[89].mxu0  ;;  %5498 = vmatprep.subr.mxu1 %v6217_v6 }
 0xa81   :  { %5460 = vmatmul.mubr.msk.f32.gmra.mrb[96].mxu1 %vm191_vm2, %v2543_v49 }
 0xa82   :  { %5474 = vmatpush3.msk.msra.mxu0 %vm681_vm3, %v7343_v63  ;;  %5462 = vmatprep.mubr.msk.f32.mxu1 %vm6216_vm0, %v6217_v6 }
 0xa83   :  { %5888 = vmatprep.subr.bf16.mxu0 %v6215_v3 }
 0xa85   :  { %5463 = vmatmul.mubr.msk.f32.gmra.mrb[98].mxu1 %vm191_vm2, %v2544_v12 }
 0xa86   :  { %5499 = vmatpush3.xpose.msk.msra.mxu1 %vm191_vm2, %v7305_v26  ;;  %5500 = vmatprep.mubr.msk.f32.mxu1 %vm6216_vm0, %v6217_v6 }
 0xa87   :  { %5894 = vmatprep.subr.bf16.mxu1 %v6215_v3 }
 0xa89   :  { %5501 = vmatmul.mubr.msk.f32.vlgmr.msra.gmra.mrb[100].mxu1 %vm191_vm2, %v2838_v15 }
 0xa8a   :  { %5897 = vmatpush3.bf16.xpose.msk.msra.mxu1 %vm6523_vm4, %v7288_v62  ;;  %5503 = vmatprep.mubr.msk.f32.mxu1 %vm6216_vm0, %v6217_v6 }
 0xa8b   :  { %5898 = vmatprep.subr.bf16.mxu1 %v6215_v3 }
 0xa8d   :  { %5504 = vmatmul.mubr.msk.f32.gmra.mrb[102].mxu1 %vm191_vm2, %v2839_v56 }
 0xa8e   :  { %5506 = vmatprep.mubr.msk.f32.mxu1 %vm6216_vm0, %v6217_v6 }
 0xa91   :  { %5507 = vmatmul.mubr.msk.f32.gmra.mrb[104].mxu1 %vm191_vm2, %v2840_v10 }
 0xa92   :  { %5901 = vmatpush3.bf16.xpose.msk.msra.mxu1 %vm6523_vm4, %v7298_v24  ;;  %5509 = vmatprep.mubr.msk.f32.mxu1 %vm6216_vm0, %v6217_v6 }
 0xa93   :  { %5548 = vmatprep.subr.mxu1 %v6217_v6 }
 0xa95   :  { %5510 = vmatmul.mubr.msk.f32.gmra.mrb[106].mxu1 %vm191_vm2, %v2841_v54 }
 0xa96   :  { %5512 = vmatprep.mubr.msk.f32.mxu1 %vm6216_vm0, %v6217_v6 }
 0xa99   :  { %5513 = vmatmul.mubr.msk.f32.gmra.mrb[108].mxu1 %vm191_vm2, %v2842_v5 }
 0xa9a   :  { %5549 = vmatpush3.xpose.msk.msra.mxu1 %vm191_vm2, %v7305_v26  ;;  %5550 = vmatprep.mubr.msk.f32.mxu1 %vm6216_vm0, %v6217_v6 }
 0xa9b   :  { %5908 = vmatprep.subr.bf16.mxu1 %v6215_v3 }
 0xa9d   :  { %5551 = vmatmul.mubr.msk.f32.vlgmr.msra.gmra.mrb[110].mxu1 %vm191_vm2, %v3118_v32 }
 0xa9e   :  { %5911 = vmatpush3.bf16.xpose.msk.msra.mxu1 %vm6523_vm4, %v7288_v62  ;;  %5553 = vmatprep.mubr.msk.f32.mxu1 %vm6216_vm0, %v6217_v6 }
 0xa9f   :  { %5912 = vmatprep.subr.bf16.mxu1 %v6215_v3 }
 0xaa1   :  { %5554 = vmatmul.mubr.msk.f32.gmra.mrb[112].mxu1 %vm191_vm2, %v3119_v50 }
 0xaa2   :  { %5556 = vmatprep.mubr.msk.f32.mxu1 %vm6216_vm0, %v6217_v6 }
 0xaa5   :  { %5557 = vmatmul.mubr.msk.f32.gmra.mrb[114].mxu1 %vm191_vm2, %v3120_v1 }
 0xaa6   :  { %5915 = vmatpush3.bf16.xpose.msk.msra.mxu1 %vm6523_vm4, %v7298_v24  ;;  %5559 = vmatprep.mubr.msk.f32.mxu1 %vm6216_vm0, %v6217_v6  ;;  %v7510_v24 = vld [vmem:[%s7972_s3 + $0x18] sm:$0xff] }
 0xaa7   :  { %5598 = vmatprep.subr.mxu1 %v6217_v6 }
 0xaa9   :  { %5560 = vmatmul.mubr.msk.f32.gmra.mrb[116].mxu1 %vm191_vm2, %v3121_v58 }
 0xaaa   :  { %5562 = vmatprep.mubr.msk.f32.mxu1 %vm6216_vm0, %v6217_v6 }
 0xaad   :  { %5563 = vmatmul.mubr.msk.f32.gmra.mrb[118].mxu1 %vm191_vm2, %v3122_v39 }
 0xaae   :  { %5599 = vmatpush3.xpose.msk.msra.mxu1 %vm191_vm2, %v7305_v26  ;;  %5600 = vmatprep.mubr.msk.f32.mxu1 %vm6216_vm0, %v6217_v6 }
 0xaaf   :  { %5922 = vmatprep.subr.bf16.mxu1 %v6215_v3 }
 0xab1   :  { %5601 = vmatmul.mubr.msk.f32.vlgmr.msra.gmra.mrb[120].mxu1 %vm191_vm2, %v3398_v44 }
 0xab2   :  { %5603 = vmatprep.mubr.msk.f32.mxu1 %vm6216_vm0, %v6217_v6 }
 0xab5   :  { %5604 = vmatmul.mubr.msk.f32.gmra.mrb[122].mxu1 %vm191_vm2, %v3399_v18 }
 0xab6   :  { %5606 = vmatprep.mubr.msk.f32.mxu1 %vm6216_vm0, %v6217_v6 }
 0xab9   :  { %5607 = vmatmul.mubr.msk.f32.gmra.mrb[124].mxu1 %vm191_vm2, %v3400_v22 }
 0xaba   :  { %5609 = vmatprep.mubr.msk.f32.mxu1 %vm6216_vm0, %v6217_v6 }
 0xabd   :  { %5610 = vmatmul.mubr.msk.f32.gmra.mrb[126].mxu1 %vm191_vm2, %v3401_v23 }
 0xabe   :  { %5612 = vmatprep.mubr.msk.f32.mxu1 %vm6216_vm0, %v6217_v6 }
 0xac1   :  { %5613 = vmatmul.mubr.msk.f32.gmra.mrb[128].mxu1 %vm191_vm2, %v3402_v59 }
 0xac2   :  { %5648 = vmatprep.mubr.msk.f32.mxu1 %vm6216_vm0, %v6217_v6 }
 0xb48   :  { %v2641_v13 = vpop.f32.mrb[90].mxu1 }
 0xb49   :  { %v7483_v7 = vadd.f32 %v7480_v0, %v2641_v13  ;;  %v5452_v52 = vpop.f32.mrb[91].mxu1 }
 0xb4b   :  { %v2665_v14 = vsel %vm619_vm5, %v7483_v7, -inf }
 0xb4c   :  { %2666 = vmax.xlane.f32.xlu0 %v2665_v14  ;;  %v2646_v25 = vpop.f32.mrb[92].mxu1 }
 0xb4d   :  { %v7493_v62 = vadd.f32 %v7490_v28, %v2646_v25  ;;  %v5455_v4 = vpop.f32.mrb[93].mxu1 }
 0xb4f   :  { %v2668_v20 = vsel %vm619_vm5, %v7493_v62, -inf }
 0xb50   :  { %2669 = vmax.xlane.f32.xlu1 %v2668_v20  ;;  %v2651_v41 = vpop.f32.mrb[94].mxu1 }
 0xb51   :  { %v7503_v36 = vadd.f32 %v7500_v31, %v2651_v41  ;;  %v5458_v9 = vpop.f32.mrb[95].mxu1 }
 0xb53   :  { %v2671_v37 = vsel %vm619_vm5, %v7503_v36, -inf }
 0xb54   :  { %2672 = vmax.xlane.f32.xlu0 %v2671_v37  ;;  %v2656_v21 = vpop.f32.mrb[96].mxu1 }
 0xb55   :  { %v7513_v33 = vadd.f32 %v7510_v24, %v2656_v21  ;;  %v5461_v26 = vpop.f32.mrb[97].mxu1 }
 0xb57   :  { %v2674_v60 = vsel %vm619_vm5, %v7513_v33, -inf }
 0xb58   :  { %2675 = vmax.xlane.f32.xlu1 %v2674_v60  ;;  %v2661_v43 = vpop.f32.mrb[98].mxu1 }
 0xb59   :  { %v7523_v30 = vadd.f32 %v7520_v11, %v2661_v43  ;;  %v5464_v51 = vpop.f32.mrb[99].mxu1 }
 0xb5b   :  { %v2677_v55 = vsel %vm632_vm6, %v7523_v30, -inf }
 0xb5c   :  { %2678 = vmax.xlane.f32.xlu0 %v2677_v55  ;;  %v2924_v57 = vpop.f32.mrb[100].mxu1 }
 0xb5d   :  { %v7528_v35 = vadd.f32 %v7480_v0, %v2924_v57  ;;  %v5502_v27 = vpop.f32.mrb[101].mxu1 }
 0xb5f   :  { %v2948_v38 = vsel %vm619_vm5, %v7528_v35, -inf }
 0xb60   :  { %2949 = vmax.xlane.f32.xlu1 %v2948_v38  ;;  %v2929_v45 = vpop.f32.mrb[102].mxu1 }
 0xb61   :  { %v7533_v61 = vadd.f32 %v7490_v28, %v2929_v45  ;;  %v5505_v34 = vpop.f32.mrb[103].mxu1 }
 0xb63   :  { %v2951_v49 = vsel %vm619_vm5, %v7533_v61, -inf }
 0xb64   :  { %2952 = vmax.xlane.f32.xlu0 %v2951_v49  ;;  %v2934_v40 = vpop.f32.mrb[104].mxu1 }
 0xb65   :  { %v7538_v12 = vadd.f32 %v7500_v31, %v2934_v40  ;;  %v5508_v15 = vpop.f32.mrb[105].mxu1 }
 0xb67   :  { %v2954_v56 = vsel %vm619_vm5, %v7538_v12, -inf }
 0xb68   :  { %2955 = vmax.xlane.f32.xlu1 %v2954_v56  ;;  %v2939_v10 = vpop.f32.mrb[106].mxu1 }
 0xb69   :  { %v7543_v54 = vadd.f32 %v7510_v24, %v2939_v10  ;;  %v5511_v5 = vpop.f32.mrb[107].mxu1 }
 0xb6b   :  { %v2957_v32 = vsel %vm619_vm5, %v7543_v54, -inf }
 0xb6c   :  { %2958 = vmax.xlane.f32.xlu0 %v2957_v32  ;;  %v2944_v50 = vpop.f32.mrb[108].mxu1 }
 0xb6d   :  { %v7548_v1 = vadd.f32 %v7520_v11, %v2944_v50  ;;  %v5514_v58 = vpop.f32.mrb[109].mxu1 }
 0xb6f   :  { %v2960_v39 = vsel %vm632_vm6, %v7548_v1, -inf }
 0xb70   :  { %2961 = vmax.xlane.f32.xlu1 %v2960_v39  ;;  %v3204_v44 = vpop.f32.mrb[110].mxu1 }
 0xb71   :  { %v7553_v18 = vadd.f32 %v7480_v0, %v3204_v44  ;;  %v5552_v22 = vpop.f32.mrb[111].mxu1 }
 0xb73   :  { %v3228_v23 = vsel %vm619_vm5, %v7553_v18, -inf }
 0xb74   :  { %3229 = vmax.xlane.f32.xlu0 %v3228_v23  ;;  %v3209_v59 = vpop.f32.mrb[112].mxu1 }
 0xb75   :  { %v7558_v13 = vadd.f32 %v7490_v28, %v3209_v59  ;;  %v5555_v52 = vpop.f32.mrb[113].mxu1 }
 0xb77   :  { %v3231_v14 = vsel %vm619_vm5, %v7558_v13, -inf }
 0xb78   :  { %3232 = vmax.xlane.f32.xlu1 %v3231_v14  ;;  %v3214_v25 = vpop.f32.mrb[114].mxu1 }
 0xb79   :  { %v7563_v4 = vadd.f32 %v7500_v31, %v3214_v25  ;;  %v5558_v20 = vpop.f32.mrb[115].mxu1 }
 0xb7b   :  { %v3234_v41 = vsel %vm619_vm5, %v7563_v4, -inf }
 0xb7c   :  { %3235 = vmax.xlane.f32.xlu0 %v3234_v41  ;;  %v3219_v9 = vpop.f32.mrb[116].mxu1 }
 0xb7d   :  { %v7568_v37 = vadd.f32 %v7510_v24, %v3219_v9  ;;  %v5561_v21 = vpop.f32.mrb[117].mxu1 }
 0xb7f   :  { %v3237_v26 = vsel %vm619_vm5, %v7568_v37, -inf }
 0xb80   :  { %3238 = vmax.xlane.f32.xlu1 %v3237_v26  ;;  %v3224_v60 = vpop.f32.mrb[118].mxu1 }
 0xb81   :  { %v7573_v43 = vadd.f32 %v7520_v11, %v3224_v60  ;;  %v5564_v51 = vpop.f32.mrb[119].mxu1 }
 0xb83   :  { %v3240_v55 = vsel %vm632_vm6, %v7573_v43, -inf }
 0xb84   :  { %3241 = vmax.xlane.f32.xlu0 %v3240_v55  ;;  %v3484_v57 = vpop.f32.mrb[120].mxu1 }
 0xb85   :  { %v7578_v27 = vadd.f32 %v7480_v0, %v3484_v57  ;;  %v5602_v38 = vpop.f32.mrb[121].mxu1 }
 0xb87   :  { %v3508_v45 = vsel %vm619_vm5, %v7578_v27, -inf }
 0xb88   :  { %3509 = vmax.xlane.f32.xlu1 %v3508_v45  ;;  %v3489_v34 = vpop.f32.mrb[122].mxu1 }
 0xb89   :  { %v7583_v49 = vadd.f32 %v7490_v28, %v3489_v34  ;;  %v5605_v40 = vpop.f32.mrb[123].mxu1 }
 0xb8b   :  { %v3511_v15 = vsel %vm619_vm5, %v7583_v49, -inf }
 0xb8c   :  { %3512 = vmax.xlane.f32.xlu0 %v3511_v15  ;;  %v3494_v56 = vpop.f32.mrb[124].mxu1 }
 0xb8d   :  { %v7588_v10 = vadd.f32 %v7500_v31, %v3494_v56  ;;  %v5608_v0 = vpop.f32.mrb[125].mxu1 }
 0xb8f   :  { %v3514_v5 = vsel %vm619_vm5, %v7588_v10, -inf }
 0xb90   :  { %3515 = vmax.xlane.f32.xlu1 %v3514_v5  ;;  %v3499_v32 = vpop.f32.mrb[126].mxu1 }
 0xb91   :  { %v7593_v50 = vadd.f32 %v7510_v24, %v3499_v32  ;;  %v5611_v28 = vpop.f32.mrb[127].mxu1 }
 0xb93   :  { %v3517_v58 = vsel %vm619_vm5, %v7593_v50, -inf }
 0xb94   :  { %3518 = vmax.xlane.f32.xlu0 %v3517_v58  ;;  %v3504_v39 = vpop.f32.mrb[128].mxu1 }
 0xb95   :  { %v7598_v44 = vadd.f32 %v7520_v11, %v3504_v39  ;;  %v5614_v31 = vpop.f32.mrb[129].mxu1 }
 0xb97   :  { %v3520_v22 = vsel %vm632_vm6, %v7598_v44, -inf }
 0xb98   :  { %3521 = vmax.xlane.f32.xlu1 %v3520_v22 }
 0xbd9   :  { %v2667_v23 = vpop.xlane.xlu0 %2666 }
 0xbda   :  { %v2680_v59 = vsub.f32 %v7483_v7, %v2667_v23 }
 0xbdc   :  { %v2685_v52 = vmul.f32 1.442695, %v2680_v59 }
 0xbdd   :  { %v2670_v24 = vpop.xlane.xlu1 %2669 }
 0xbde   :  { %6072 = vpow2.f32 %v2685_v52  ;;  %v2681_v14 = vsub.f32 %v7493_v62, %v2670_v24 }
 0xbe0   :  { %v2687_v25 = vmul.f32 1.442695, %v2681_v14 }
 0xbe1   :  { %v2673_v20 = vpop.xlane.xlu0 %2672 }
 0xbe2   :  { %6074 = vpow2.f32 %v2687_v25  ;;  %v2682_v41 = vsub.f32 %v7503_v36, %v2673_v20 }
 0xbe4   :  { %v2689_v11 = vmul.f32 1.442695, %v2682_v41 }
 0xbe5   :  { %v2676_v9 = vpop.xlane.xlu1 %2675 }
 0xbe6   :  { %6076 = vpow2.f32 %v2689_v11  ;;  %v2683_v21 = vsub.f32 %v7513_v33, %v2676_v9 }
 0xbe8   :  { %v6073_v26 = vpop.eup %6072  ;;  %v2691_v60 = vmul.f32 1.442695, %v2683_v21 }
 0xbe9   :  { %v2679_v51 = vpop.xlane.xlu0 %2678  ;;  %5476 = vmatmul.mubr.msk.f32.vlgmr.msra.gmra.mrb[90].mxu0 %vm619_vm5, %v6073_v26  ;;  %v2695_v7 = vsel %vm619_vm5, %v6073_v26, 0.0 }
 0xbea   :  { %6078 = vpow2.f32 %v2691_v60  ;;  %v2684_v62 = vsub.f32 %v7523_v30, %v2679_v51  ;;  %5890 = vmatpush3.bf16.msra.mxu0 %v7317_v42  ;;  %2696 = vadd.xlane.f32.xlu0 %v2695_v7 }
 0xbeb   :  { %5478 = vmatprep.mubr.msk.f32.mxu0 %vm6216_vm0, %v6217_v6  ;;  %5891 = vmatprep.subr.bf16.mxu0 %v6215_v3 }
 0xbec   :  { %v6075_v36 = vpop.eup %6074  ;;  %v2693_v33 = vmul.f32 1.442695, %v2684_v62 }
 0xbed   :  { %v2950_v55 = vpop.xlane.xlu1 %2949  ;;  %5479 = vmatmul.mubr.msk.f32.gmra.mrb[92].mxu0 %vm619_vm5, %v6075_v36  ;;  %v2698_v57 = vsel %vm619_vm5, %v6075_v36, 0.0 }
 0xbee   :  { %6080 = vpow2.f32 %v2693_v33  ;;  %v2963_v38 = vsub.f32 %v7528_v35, %v2950_v55  ;;  %5893 = vmatpush3.bf16.msra.mxu0 %v7336_v8  ;;  %2699 = vadd.xlane.f32.xlu1 %v2698_v57 }
 0xbef   :  { %5481 = vmatprep.mubr.msk.f32.mxu0 %vm6216_vm0, %v6217_v6  ;;  %5523 = vmatprep.subr.mxu0 %v6217_v6 }
 0xbf0   :  { %v6077_v30 = vpop.eup %6076  ;;  %v2968_v45 = vmul.f32 1.442695, %v2963_v38 }
 0xbf1   :  { %v2953_v34 = vpop.xlane.xlu0 %2952  ;;  %5482 = vmatmul.mubr.msk.f32.gmra.mrb[94].mxu0 %vm619_vm5, %v6077_v30  ;;  %v2701_v40 = vsel %vm619_vm5, %v6077_v30, 0.0 }
 0xbf2   :  { %6082 = vpow2.f32 %v2968_v45  ;;  %v2964_v15 = vsub.f32 %v7533_v61, %v2953_v34  ;;  %5524 = vmatpush3.msk.msra.mxu0 %vm681_vm3, %v7343_v63  ;;  %2702 = vadd.xlane.f32.xlu1 %v2701_v40 }
 0xbf3   :  { %5484 = vmatprep.mubr.msk.f32.mxu0 %vm6216_vm0, %v6217_v6  ;;  %5902 = vmatprep.subr.bf16.mxu0 %v6215_v3 }
 0xbf4   :  { %v6079_v35 = vpop.eup %6078  ;;  %v2970_v56 = vmul.f32 1.442695, %v2964_v15 }
 0xbf5   :  { %v2956_v0 = vpop.xlane.xlu1 %2955  ;;  %5485 = vmatmul.mubr.msk.f32.gmra.mrb[96].mxu0 %vm619_vm5, %v6079_v35  ;;  %v2704_v5 = vsel %vm619_vm5, %v6079_v35, 0.0 }
 0xbf6   :  { %6084 = vpow2.f32 %v2970_v56  ;;  %v2965_v32 = vsub.f32 %v7538_v12, %v2956_v0  ;;  %2705 = vadd.xlane.f32.xlu1 %v2704_v5  ;;  %5487 = vmatprep.mubr.msk.f32.mxu0 %vm6216_vm0, %v6217_v6 }
 0xbf8   :  { %v7633_v61 = vpop.eup %6080  ;;  %v2972_v28 = vmul.f32 1.442695, %v2965_v32 }
 0xbf9   :  { %v2959_v58 = vpop.xlane.xlu0 %2958  ;;  %5488 = vmatmul.mubr.msk.f32.gmra.mrb[98].mxu0 %vm619_vm5, %v7633_v61 }
 0xbfa   :  { %6086 = vpow2.f32 %v2972_v28  ;;  %v2966_v39 = vsub.f32 %v7543_v54, %v2959_v58  ;;  %5525 = vmatprep.mubr.msk.f32.mxu0 %vm6216_vm0, %v6217_v6  ;;  %v2707_v58 = vsel %vm632_vm6, %v7633_v61, 0.0 }
 0xbfc   :  { %v6083_v31 = vpop.eup %6082  ;;  %v2974_v22 = vmul.f32 1.442695, %v2966_v39 }
 0xbfd   :  { %v2962_v12 = vpop.xlane.xlu1 %2961  ;;  %5526 = vmatmul.mubr.msk.f32.vlgmr.msra.gmra.mrb[100].mxu0 %vm619_vm5, %v6083_v31  ;;  %v2978_v23 = vsel %vm619_vm5, %v6083_v31, 0.0 }
 0xbfe   :  { %6088 = vpow2.f32 %v2974_v22  ;;  %v2967_v59 = vsub.f32 %v7548_v1, %v2962_v12  ;;  %5904 = vmatpush3.bf16.msra.mxu0 %v7317_v42  ;;  %2979 = vadd.xlane.f32.xlu1 %v2978_v23 }
 0xbff   :  { %5528 = vmatprep.mubr.msk.f32.mxu0 %vm6216_vm0, %v6217_v6  ;;  %5905 = vmatprep.subr.bf16.mxu0 %v6215_v3 }
 0xc00   :  { %v6085_v54 = vpop.eup %6084  ;;  %v2976_v52 = vmul.f32 1.442695, %v2967_v59 }
 0xc01   :  { %v3230_v24 = vpop.xlane.xlu0 %3229  ;;  %5529 = vmatmul.mubr.msk.f32.gmra.mrb[102].mxu0 %vm619_vm5, %v6085_v54  ;;  %v2981_v14 = vsel %vm619_vm5, %v6085_v54, 0.0 }
 0xc02   :  { %6090 = vpow2.f32 %v2976_v52  ;;  %v3243_v25 = vsub.f32 %v7553_v18, %v3230_v24  ;;  %5907 = vmatpush3.bf16.msra.mxu0 %v7336_v8  ;;  %2982 = vadd.xlane.f32.xlu0 %v2981_v14 }
 0xc03   :  { %5531 = vmatprep.mubr.msk.f32.mxu0 %vm6216_vm0, %v6217_v6  ;;  %5573 = vmatprep.subr.mxu0 %v6217_v6 }
 0xc04   :  { %v6087_v1 = vpop.eup %6086  ;;  %v3248_v20 = vmul.f32 1.442695, %v3243_v25 }
 0xc05   :  { %v3233_v41 = vpop.xlane.xlu1 %3232  ;;  %5532 = vmatmul.mubr.msk.f32.gmra.mrb[104].mxu0 %vm619_vm5, %v6087_v1  ;;  %v2984_v11 = vsel %vm619_vm5, %v6087_v1, 0.0 }
 0xc06   :  { %6092 = vpow2.f32 %v3248_v20  ;;  %v3244_v9 = vsub.f32 %v7558_v13, %v3233_v41  ;;  %5574 = vmatpush3.msk.msra.mxu0 %vm681_vm3, %v7343_v63  ;;  %2985 = vadd.xlane.f32.xlu0 %v2984_v11  ;;  %v4653_v41 = vld [vmem:[%s7975_s6 + $0x20] sm:$0xff]  ;;  %v4654_v11 = vld [vmem:[%s7975_s6 + $0x28] sm:$0xff] }
 0xc07   :  { %5534 = vmatprep.mubr.msk.f32.mxu0 %vm6216_vm0, %v6217_v6  ;;  %5916 = vmatprep.subr.bf16.mxu0 %v6215_v3 }
 0xc08   :  { %v6089_v18 = vpop.eup %6088  ;;  %v3250_v21 = vmul.f32 1.442695, %v3244_v9  ;;  %v5923_v9 = vpack.c.bf16 %v4654_v11, %v4653_v41 }
 0xc09   :  { %v3236_v26 = vpop.xlane.xlu0 %3235  ;;  %5535 = vmatmul.mubr.msk.f32.gmra.mrb[106].mxu0 %vm619_vm5, %v6089_v18  ;;  %v2987_v60 = vsel %vm619_vm5, %v6089_v18, 0.0  ;;  %v4655_v18 = vld [vmem:[%s7975_s6 + $0x30] sm:$0xff] }
 0xc0a   :  { %6094 = vpow2.f32 %v3250_v21  ;;  %v3245_v51 = vsub.f32 %v7563_v4, %v3236_v26  ;;  %2988 = vadd.xlane.f32.xlu0 %v2987_v60  ;;  %5537 = vmatprep.mubr.msk.f32.mxu0 %vm6216_vm0, %v6217_v6  ;;  %v4656_v21 = vld [vmem:[%s7975_s6 + $0x38] sm:$0xff] }
 0xc0b   :  { %5924 = vmatpush3.bf16.msra.mxu1 %v5923_v9  ;;  %v5926_v26 = vpack.c.bf16 %v4656_v21, %v4655_v18 }
 0xc0c   :  { %v7667_v13 = vpop.eup %6090  ;;  %v3252_v7 = vmul.f32 1.442695, %v3245_v51  ;;  %5925 = vmatprep.subr.bf16.mxu1 %v6215_v3 }
 0xc0d   :  { %v3239_v62 = vpop.xlane.xlu1 %3238  ;;  %5538 = vmatmul.mubr.msk.f32.gmra.mrb[108].mxu0 %vm619_vm5, %v7667_v13  ;;  %v2990_v1 = vsel %vm632_vm6, %v7667_v13, 0.0 }
 0xc0e   :  { %6096 = vpow2.f32 %v3252_v7  ;;  %v3246_v36 = vsub.f32 %v7568_v37, %v3239_v62  ;;  %5575 = vmatprep.mubr.msk.f32.mxu0 %vm6216_vm0, %v6217_v6 }
 0xc0f   :  { %5927 = vmatpush3.bf16.msra.mxu1 %v5926_v26 }
 0xc10   :  { %v6093_v33 = vpop.eup %6092  ;;  %v3254_v55 = vmul.f32 1.442695, %v3246_v36  ;;  %5934 = vmatprep.subr.bf16.mxu1 %v6215_v3 }
 0xc11   :  { %v3242_v4 = vpop.xlane.xlu0 %3241  ;;  %5576 = vmatmul.mubr.msk.f32.vlgmr.msra.gmra.mrb[110].mxu0 %vm619_vm5, %v6093_v33  ;;  %v3258_v57 = vsel %vm619_vm5, %v6093_v33, 0.0 }
 0xc12   :  { %6098 = vpow2.f32 %v3254_v55  ;;  %v3247_v38 = vsub.f32 %v7573_v43, %v3242_v4  ;;  %5918 = vmatpush3.bf16.msra.mxu0 %v7317_v42  ;;  %3259 = vadd.xlane.f32.xlu0 %v3258_v57 }
 0xc13   :  { %5578 = vmatprep.mubr.msk.f32.mxu0 %vm6216_vm0, %v6217_v6  ;;  %5919 = vmatprep.subr.bf16.mxu0 %v6215_v3 }
 0xc14   :  { %v6095_v37 = vpop.eup %6094  ;;  %v3256_v30 = vmul.f32 1.442695, %v3247_v38 }
 0xc15   :  { %v3510_v45 = vpop.xlane.xlu1 %3509  ;;  %5579 = vmatmul.mubr.msk.f32.gmra.mrb[112].mxu0 %vm619_vm5, %v6095_v37  ;;  %v3261_v34 = vsel %vm619_vm5, %v6095_v37, 0.0 }
 0xc16   :  { %6100 = vpow2.f32 %v3256_v30  ;;  %v3523_v40 = vsub.f32 %v7578_v27, %v3510_v45  ;;  %5921 = vmatpush3.bf16.msra.mxu0 %v7336_v8  ;;  %3262 = vadd.xlane.f32.xlu0 %v3261_v34 }
 0xc17   :  { %5581 = vmatprep.mubr.msk.f32.mxu0 %vm6216_vm0, %v6217_v6  ;;  %5623 = vmatprep.subr.mxu0 %v6217_v6 }
 0xc18   :  { %v6097_v42 = vpop.eup %6096  ;;  %v3528_v43 = vmul.f32 1.442695, %v3523_v40 }
 0xc19   :  { %v3513_v15 = vpop.xlane.xlu0 %3512  ;;  %5582 = vmatmul.mubr.msk.f32.gmra.mrb[114].mxu0 %vm619_vm5, %v6097_v42  ;;  %v3264_v35 = vsel %vm619_vm5, %v6097_v42, 0.0 }
 0xc1a   :  { %6102 = vpow2.f32 %v3528_v43  ;;  %v3524_v56 = vsub.f32 %v7583_v49, %v3513_v15  ;;  %5624 = vmatpush3.msk.msra.mxu0 %vm681_vm3, %v7343_v63  ;;  %3265 = vadd.xlane.f32.xlu0 %v3264_v35 }
 0xc1b   :  { %5584 = vmatprep.mubr.msk.f32.mxu0 %vm6216_vm0, %v6217_v6  ;;  %5928 = vmatprep.subr.bf16.mxu0 %v6215_v3 }
 0xc1c   :  { %v6099_v8 = vpop.eup %6098  ;;  %v3530_v27 = vmul.f32 1.442695, %v3524_v56 }
 0xc1d   :  { %v3516_v0 = vpop.xlane.xlu1 %3515  ;;  %5585 = vmatmul.mubr.msk.f32.gmra.mrb[116].mxu0 %vm619_vm5, %v6099_v8  ;;  %v3267_v5 = vsel %vm619_vm5, %v6099_v8, 0.0 }
 0xc1e   :  { %6104 = vpow2.f32 %v3530_v27  ;;  %v3525_v32 = vsub.f32 %v7588_v10, %v3516_v0  ;;  %3268 = vadd.xlane.f32.xlu0 %v3267_v5  ;;  %5587 = vmatprep.mubr.msk.f32.mxu0 %vm6216_vm0, %v6217_v6 }
 0xc20   :  { %v6101_v63 = vpop.eup %6100  ;;  %v3532_v49 = vmul.f32 1.442695, %v3525_v32 }
 0xc21   :  { %v3519_v28 = vpop.xlane.xlu0 %3518  ;;  %5588 = vmatmul.mubr.msk.f32.gmra.mrb[118].mxu0 %vm619_vm5, %v6101_v63  ;;  %v3270_v12 = vsel %vm632_vm6, %v6101_v63, 0.0 }
 0xc22   :  { %6106 = vpow2.f32 %v3532_v49  ;;  %v3526_v39 = vsub.f32 %v7593_v50, %v3519_v28  ;;  %2708 = vadd.xlane.f32.xlu0 %v2707_v58  ;;  %5625 = vmatprep.mubr.msk.f32.mxu0 %vm6216_vm0, %v6217_v6 }
 0xc24   :  { %v6103_v10 = vpop.eup %6102  ;;  %v3534_v31 = vmul.f32 1.442695, %v3526_v39 }
 0xc25   :  { %v3522_v22 = vpop.xlane.xlu1 %3521  ;;  %5626 = vmatmul.mubr.msk.f32.vlgmr.msra.gmra.mrb[120].mxu0 %vm619_vm5, %v6103_v10  ;;  %v3538_v23 = vsel %vm619_vm5, %v6103_v10, 0.0 }
 0xc26   :  { %6108 = vpow2.f32 %v3534_v31  ;;  %v3527_v59 = vsub.f32 %v7598_v44, %v3522_v22  ;;  %3271 = vadd.xlane.f32.xlu0 %v3270_v12  ;;  %3539 = vadd.xlane.f32.xlu1 %v3538_v23 }
 0xc27   :  { %5628 = vmatprep.mubr.msk.f32.mxu0 %vm6216_vm0, %v6217_v6 }
 0xc28   :  { %v6105_v50 = vpop.eup %6104  ;;  %v3536_v61 = vmul.f32 1.442695, %v3527_v59 }
 0xc29   :  { %5629 = vmatmul.mubr.msk.f32.gmra.mrb[122].mxu0 %vm619_vm5, %v6105_v50  ;;  %v3541_v54 = vsel %vm619_vm5, %v6105_v50, 0.0 }
 0xc2a   :  { %6110 = vpow2.f32 %v3536_v61  ;;  %3542 = vadd.xlane.f32.xlu1 %v3541_v54  ;;  %5631 = vmatprep.mubr.msk.f32.mxu0 %vm6216_vm0, %v6217_v6 }
 0xc2c   :  { %v6107_v52 = vpop.eup %6106 }
 0xc2d   :  { %5632 = vmatmul.mubr.msk.f32.gmra.mrb[124].mxu0 %vm619_vm5, %v6107_v52  ;;  %v3544_v44 = vsel %vm619_vm5, %v6107_v52, 0.0 }
 0xc2e   :  { %3545 = vadd.xlane.f32.xlu1 %v3544_v44  ;;  %5634 = vmatprep.mubr.msk.f32.mxu0 %vm6216_vm0, %v6217_v6 }
 0xc30   :  { %v6109_v24 = vpop.eup %6108 }
 0xc31   :  { %5635 = vmatmul.mubr.msk.f32.gmra.mrb[126].mxu0 %vm619_vm5, %v6109_v24  ;;  %v3547_v14 = vsel %vm619_vm5, %v6109_v24, 0.0 }
 0xc32   :  { %3548 = vadd.xlane.f32.xlu1 %v3547_v14  ;;  %5637 = vmatprep.mubr.msk.f32.mxu0 %vm6216_vm0, %v6217_v6 }
 0xc34   :  { %v6111_v25 = vpop.eup %6110 }
 0xc35   :  { %5638 = vmatmul.mubr.msk.f32.gmra.mrb[128].mxu0 %vm619_vm5, %v6111_v25  ;;  %v3550_v20 = vsel %vm632_vm6, %v6111_v25, 0.0 }
 0xc36   :  { %2991 = vadd.xlane.f32.xlu1 %v2990_v1  ;;  %5671 = vmatprep.mubr.msk.f32.mxu0 %vm6216_vm0, %v6217_v6 }
 0xc3a   :  { %3551 = vadd.xlane.f32.xlu1 %v3550_v20 }
 0xc77   :  { %v2697_v60 = vpop.xlane.xlu0 %2696 }
 0xc78   :  { %6112 = vrcp.f32 %v2697_v60 }
 0xc7b   :  { %v2700_v51 = vpop.xlane.xlu1 %2699 }
 0xc7f   :  { %v2703_v7 = vpop.xlane.xlu1 %2702 }
 0xc82   :  { %v6113_v28 = vpop.eup %6112 }
 0xc83   :  { %v2706_v36 = vpop.xlane.xlu1 %2705 }
 0xc8b   :  { %v2980_v55 = vpop.xlane.xlu1 %2979 }
 0xc8c   :  { %6114 = vrcp.f32 %v2980_v55 }
 0xc8d   :  { %6116 = vrcp.f32 %v2700_v51 }
 0xc8f   :  { %v2983_v13 = vpop.xlane.xlu0 %2982 }
 0xc90   :  { %6118 = vrcp.f32 %v2983_v13 }
 0xc91   :  { %6120 = vrcp.f32 %v2703_v7 }
 0xc93   :  { %v2986_v62 = vpop.xlane.xlu0 %2985 }
 0xc94   :  { %6122 = vrcp.f32 %v2986_v62 }
 0xc95   :  { %6124 = vrcp.f32 %v2706_v36 }
 0xc96   :  { %v6115_v10 = vpop.eup %6114 }
 0xc97   :  { %v2989_v33 = vpop.xlane.xlu0 %2988  ;;  %v6117_v50 = vpop.eup %6116 }
 0xc98   :  { %6126 = vrcp.f32 %v2989_v33 }
 0xc9a   :  { %v6119_v24 = vpop.eup %6118 }
 0xc9b   :  { %v6121_v41 = vpop.eup %6120 }
 0xc9e   :  { %v6123_v21 = vpop.eup %6122 }
 0xc9f   :  { %v3260_v4 = vpop.xlane.xlu0 %3259  ;;  %v6125_v7 = vpop.eup %6124 }
 0xca2   :  { %v6127_v55 = vpop.eup %6126 }
 0xca3   :  { %v3263_v34 = vpop.xlane.xlu0 %3262 }
 0xca7   :  { %v7749_v15 = vpop.xlane.xlu0 %3265 }
 0xcab   :  { %v7753_v5 = vpop.xlane.xlu0 %3268 }
 0xcaf   :  { %v2709_v23 = vpop.xlane.xlu0 %2708 }
 0xcb0   :  { %6128 = vrcp.f32 %v2709_v23 }
 0xcb3   :  { %v7745_v38 = vpop.xlane.xlu1 %3539 }
 0xcb7   :  { %v7747_v40 = vpop.xlane.xlu1 %3542 }
 0xcbb   :  { %v7751_v56 = vpop.xlane.xlu1 %3545 }
 0xcbc   :  { %v2794_v57 = vpop.f32.mrb[90].mxu0 }
 0xcbd   :  { %v5477_v37 = vpop.f32.mrb[91].mxu0  ;;  %v2818_v32 = vmul.f32 %v7313_v2, %v2794_v57 }
 0xcbf   :  { %v7756_v63 = vpop.xlane.xlu1 %3548  ;;  %v2828_v31 = vmul.f32 %v6113_v28, %v2818_v32 }
 0xcc0   :  { %v2799_v30 = vpop.f32.mrb[92].mxu0 }
 0xcc1   :  { %v5480_v45 = vpop.f32.mrb[93].mxu0  ;;  %v2819_v22 = vmul.f32 %v7313_v2, %v2799_v30 }
 0xcc3   :  { %v2992_v61 = vpop.xlane.xlu1 %2991  ;;  %v2829_v14 = vmul.f32 %v6117_v50, %v2819_v22 }
 0xcc4   :  { %v2804_v42 = vpop.f32.mrb[94].mxu0  ;;  %6130 = vrcp.f32 %v2992_v61 }
 0xcc5   :  { %v5483_v43 = vpop.f32.mrb[95].mxu0  ;;  %v2820_v25 = vmul.f32 %v7313_v2, %v2804_v42  ;;  %6132 = vrcp.f32 %v3260_v4  ;;  %v6129_v42 = vpop.eup %6128 }
 0xcc6   :  { %6134 = vrcp.f32 %v3263_v34 }
 0xcc7   :  { %v2830_v26 = vmul.f32 %v6121_v41, %v2820_v25  ;;  %6136 = vrcp.f32 %v7749_v15 }
 0xcc8   :  { %v2809_v35 = vpop.f32.mrb[96].mxu0  ;;  %6138 = vrcp.f32 %v7753_v5 }
 0xcc9   :  { %v5486_v8 = vpop.f32.mrb[97].mxu0  ;;  %v2821_v60 = vmul.f32 %v7313_v2, %v2809_v35 }
 0xccb   :  { %v2831_v57 = vmul.f32 %v6125_v7, %v2821_v60 }
 0xccc   :  { %v2814_v27 = vpop.f32.mrb[98].mxu0 }
 0xccd   :  { %v5489_v0 = vpop.f32.mrb[99].mxu0  ;;  %v2822_v37 = vmul.f32 %v7313_v2, %v2814_v27  ;;  %v3272_v27 = vpop.xlane.xlu0 %3271 }
 0xcce   :  { %v6131_v0 = vpop.eup %6130  ;;  %6140 = vrcp.f32 %v3272_v27 }
 0xccf   :  { %v2832_v4 = vmul.f32 %v6129_v42, %v2822_v37  ;;  %6142 = vrcp.f32 %v7745_v38 }
 0xcd0   :  { %v3074_v49 = vpop.f32.mrb[100].mxu0  ;;  %6144 = vrcp.f32 %v7747_v40  ;;  %v3552_v40 = vpop.xlane.xlu1 %3551 }
 0xcd1   :  { %v3098_v58 = vmul.f32 %v7367_v47, %v3074_v49  ;;  %v5527_v39 = vpop.f32.mrb[101].mxu0  ;;  %6146 = vrcp.f32 %v7751_v56 }
 0xcd2   :  { %6148 = vrcp.f32 %v7756_v63 }
 0xcd3   :  { %v3108_v12 = vmul.f32 %v6115_v10, %v3098_v58  ;;  %v6133_v10 = vpop.eup %6132  ;;  %6150 = vrcp.f32 %v3552_v40 }
 0xcd4   :  { %v3079_v59 = vpop.f32.mrb[102].mxu0 }
 0xcd5   :  { %v3113_v54 = vadd.f32 %v3108_v12, %v2828_v31  ;;  %v3099_v52 = vmul.f32 %v7367_v47, %v3079_v59  ;;  %v5530_v44 = vpop.f32.mrb[103].mxu0  ;;  %v6135_v12 = vpop.eup %6134 }
 0xcd7   :  { %v3109_v1 = vmul.f32 %v6119_v24, %v3099_v52  ;;  %v6137_v52 = vpop.eup %6136 }
 0xcd8   :  { %v3084_v20 = vpop.f32.mrb[104].mxu0  ;;  %v6139_v25 = vpop.eup %6138 }
 0xcd9   :  { %v3114_v11 = vadd.f32 %v3109_v1, %v2829_v14  ;;  %v3100_v9 = vmul.f32 %v7367_v47, %v3084_v20  ;;  %v5533_v18 = vpop.f32.mrb[105].mxu0 }
 0xcda   :  { %v6141_v18 = vpop.eup %6140 }
 0xcdb   :  { %v3110_v51 = vmul.f32 %v6123_v21, %v3100_v9 }
 0xcdc   :  { %v3089_v13 = vpop.f32.mrb[106].mxu0 }
 0xcdd   :  { %v3115_v62 = vadd.f32 %v3110_v51, %v2830_v26  ;;  %v3101_v36 = vmul.f32 %v7367_v47, %v3089_v13  ;;  %v5536_v33 = vpop.f32.mrb[107].mxu0  ;;  %v6143_v13 = vpop.eup %6142 }
 0xcdf   :  { %v3111_v30 = vmul.f32 %v6127_v55, %v3101_v36  ;;  %v6145_v55 = vpop.eup %6144 }
 0xce0   :  { %v3094_v45 = vpop.f32.mrb[108].mxu0  ;;  %v6147_v63 = vpop.eup %6146 }
 0xce1   :  { %v3116_v43 = vadd.f32 %v3111_v30, %v2831_v57  ;;  %v3102_v8 = vmul.f32 %v7367_v47, %v3094_v45  ;;  %v5539_v35 = vpop.f32.mrb[109].mxu0 }
 0xce3   :  { %v3112_v32 = vmul.f32 %v6131_v0, %v3102_v8 }
 0xce4   :  { %v3354_v49 = vpop.f32.mrb[110].mxu0 }
 0xce5   :  { %v3117_v28 = vadd.f32 %v3112_v32, %v2832_v4  ;;  %v3378_v58 = vmul.f32 %v7408_v53, %v3354_v49  ;;  %v5577_v39 = vpop.f32.mrb[111].mxu0  ;;  %v6149_v4 = vpop.eup %6148 }
 0xce7   :  { %v3388_v2 = vmul.f32 %v6133_v10, %v3378_v58  ;;  %v6151_v10 = vpop.eup %6150 }
 0xce8   :  { %v3359_v34 = vpop.f32.mrb[112].mxu0 }
 0xce9   :  { %v3393_v31 = vadd.f32 %v3388_v2, %v3113_v54  ;;  %v3379_v47 = vmul.f32 %v7408_v53, %v3359_v34  ;;  %v5580_v22 = vpop.f32.mrb[113].mxu0 }
 0xceb   :  { %v3389_v23 = vmul.f32 %v6135_v12, %v3379_v47 }
 0xcec   :  { %v3364_v59 = vpop.f32.mrb[114].mxu0 }
 0xced   :  { %v3394_v15 = vadd.f32 %v3389_v23, %v3114_v11  ;;  %v3380_v50 = vmul.f32 %v7408_v53, %v3364_v59  ;;  %v5583_v61 = vpop.f32.mrb[115].mxu0 }
 0xcef   :  { %v3390_v44 = vmul.f32 %v6137_v52, %v3380_v50 }
 0xcf0   :  { %v3369_v24 = vpop.f32.mrb[116].mxu0 }
 0xcf1   :  { %v3395_v5 = vadd.f32 %v3390_v44, %v3115_v62  ;;  %v3381_v14 = vmul.f32 %v7408_v53, %v3369_v24  ;;  %v5586_v54 = vpop.f32.mrb[117].mxu0 }
 0xcf3   :  { %v3391_v1 = vmul.f32 %v6139_v25, %v3381_v14 }
 0xcf4   :  { %v3374_v20 = vpop.f32.mrb[118].mxu0 }
 0xcf5   :  { %v3396_v41 = vadd.f32 %v3391_v1, %v3116_v43  ;;  %v3382_v11 = vmul.f32 %v7408_v53, %v3374_v20  ;;  %v5589_v9 = vpop.f32.mrb[119].mxu0 }
 0xcf7   :  { %v3392_v21 = vmul.f32 %v6141_v18, %v3382_v11 }
 0xcf8   :  { %v3634_v26 = vpop.f32.mrb[120].mxu0 }
 0xcf9   :  { %v3397_v38 = vadd.f32 %v3392_v21, %v3117_v28  ;;  %v3658_v60 = vmul.f32 %v7449_v17, %v3634_v26  ;;  %v5627_v51 = vpop.f32.mrb[121].mxu0 }
 0xcfb   :  { %v3668_v7 = vmul.f32 %v6143_v13, %v3658_v60 }
 0xcfc   :  { %v3639_v62 = vpop.f32.mrb[122].mxu0 }
 0xcfd   :  { %v3673_v36 = vadd.f32 %v3668_v7, %v3393_v31  ;;  %v3659_v33 = vmul.f32 %v7449_v17, %v3639_v62  ;;  %v5630_v53 = vpop.f32.mrb[123].mxu0 }
 0xcff   :  { %v3669_v57 = vmul.f32 %v6145_v55, %v3659_v33  ;;  %5649 = vmatmul.mubr.msk.f32.vlgmr.msra.gmra.mrb[130].mxu1 %vm191_vm2, %v3673_v36 }
 0xd00   :  { %v3644_v56 = vpop.f32.mrb[124].mxu0  ;;  %5651 = vmatprep.mubr.msk.f32.mxu1 %vm6216_vm0, %v6217_v6 }
 0xd01   :  { %v3674_v37 = vadd.f32 %v3669_v57, %v3394_v15  ;;  %v3660_v30 = vmul.f32 %v7449_v17, %v3644_v56  ;;  %v5633_v45 = vpop.f32.mrb[125].mxu0 }
 0xd02   :  { %v4667_v45 = vld [vmem:[%s7978_s9 + $0x28] sm:$0xff] }
 0xd03   :  { %v3670_v42 = vmul.f32 %v6147_v63, %v3660_v30  ;;  %5652 = vmatmul.mubr.msk.f32.gmra.mrb[132].mxu1 %vm191_vm2, %v3674_v37  ;;  %v4666_v30 = vld [vmem:[%s7978_s9 + $0x20] sm:$0xff] }
 0xd04   :  { %v3649_v43 = vpop.f32.mrb[126].mxu0  ;;  %5654 = vmatprep.mubr.msk.f32.mxu1 %vm6216_vm0, %v6217_v6  ;;  %v5929_v63 = vpack.c.bf16 %v4667_v45, %v4666_v30 }
 0xd05   :  { %v3675_v8 = vadd.f32 %v3670_v42, %v3395_v5  ;;  %v3661_v35 = vmul.f32 %v7449_v17, %v3649_v43  ;;  %v5636_v0 = vpop.f32.mrb[127].mxu0  ;;  %v4668_v42 = vld [vmem:[%s7978_s9 + $0x30] sm:$0xff]  ;;  %v4669_v43 = vld [vmem:[%s7978_s9 + $0x38] sm:$0xff] }
 0xd06   :  { %5930 = vmatpush3.bf16.msra.mxu0 %v5929_v63 }
 0xd07   :  { %v3671_v32 = vmul.f32 %v6149_v4, %v3661_v35  ;;  %5655 = vmatmul.mubr.msk.f32.gmra.mrb[134].mxu1 %vm191_vm2, %v3675_v8  ;;  %5931 = vmatprep.subr.bf16.mxu0 %v6215_v3  ;;  %v5932_v8 = vpack.c.bf16 %v4669_v43, %v4668_v42 }
 0xd08   :  { %v3654_v49 = vpop.f32.mrb[128].mxu0  ;;  %5657 = vmatprep.mubr.msk.f32.mxu1 %vm6216_vm0, %v6217_v6 }
 0xd09   :  { %v3676_v28 = vadd.f32 %v3671_v32, %v3396_v41  ;;  %v3662_v58 = vmul.f32 %v7449_v17, %v3654_v49  ;;  %v5639_v39 = vpop.f32.mrb[129].mxu0 }
 0xd0a   :  { %5933 = vmatpush3.bf16.msra.mxu0 %v5932_v8 }
 0xd0b   :  { %v3672_v2 = vmul.f32 %v6151_v10, %v3662_v58  ;;  %5658 = vmatmul.mubr.msk.f32.gmra.mrb[136].mxu1 %vm191_vm2, %v3676_v28  ;;  %5946 = vmatprep.subr.bf16.mxu0 %v6215_v3 }
 0xd0c   :  { %5660 = vmatprep.mubr.msk.f32.mxu1 %vm6216_vm0, %v6217_v6 }
 0xd0d   :  { %v3677_v34 = vadd.f32 %v3672_v2, %v3397_v38 }
 0xd0f   :  { %5661 = vmatmul.mubr.msk.f32.gmra.mrb[138].mxu1 %vm191_vm2, %v3677_v34 }
 0xd10   :  { %5702 = vmatprep.mubr.msk.f32.mxu1 %vm6216_vm0, %v6217_v6 }
 0xdd2   :  { %v3764_v27 = vpop.f32.mrb[130].mxu1 }
 0xdd3   :  { %v3788_v31 = vadd.f32 %v3764_v27, %v7202_v29  ;;  %v5650_v47 = vpop.f32.mrb[131].mxu1 }
 0xdd5   :  { %v3797_v17 = vsel %vm191_vm2, %v3788_v31, 0.0 }
 0xdd6   :  { %3798 = vadd.xlane.f32.xlu0 %v3797_v17  ;;  %v3769_v22 = vpop.f32.mrb[132].mxu1 }
 0xdd7   :  { %v3789_v12 = vadd.f32 %v3769_v22, %v7219_v46  ;;  %v5653_v23 = vpop.f32.mrb[133].mxu1 }
 0xdd9   :  { %v3800_v59 = vsel %vm191_vm2, %v3789_v12, 0.0 }
 0xdda   :  { %3801 = vadd.xlane.f32.xlu1 %v3800_v59  ;;  %v3774_v15 = vpop.f32.mrb[134].mxu1 }
 0xddb   :  { %v3790_v50 = vadd.f32 %v3774_v15, %v7231_v16  ;;  %v5656_v61 = vpop.f32.mrb[135].mxu1 }
 0xddd   :  { %v3803_v52 = vsel %vm191_vm2, %v3790_v50, 0.0 }
 0xdde   :  { %3804 = vadd.xlane.f32.xlu0 %v3803_v52  ;;  %v3779_v44 = vpop.f32.mrb[136].mxu1 }
 0xddf   :  { %v3791_v29 = vadd.f32 %v3779_v44, %v7243_v19  ;;  %v5659_v24 = vpop.f32.mrb[137].mxu1 }
 0xde1   :  { %v3806_v5 = vsel %vm191_vm2, %v3791_v29, 0.0 }
 0xde2   :  { %3807 = vadd.xlane.f32.xlu1 %v3806_v5  ;;  %v3784_v14 = vpop.f32.mrb[138].mxu1 }
 0xde3   :  { %v3792_v46 = vadd.f32 %v3784_v14, %v7254_v48  ;;  %v5662_v54 = vpop.f32.mrb[139].mxu1 }
 0xde5   :  { %v3809_v25 = vsel %vm1787_vm7, %v3792_v46, 0.0 }
 0xde6   :  { %3810 = vadd.xlane.f32.xlu0 %v3809_v25 }
 0xe63   :  { %v3799_v1 = vpop.xlane.xlu0 %3798 }
 0xe64   :  { %v3812_v16 = vmul.f32 0.03125, %v3799_v1 }
 0xe66   :  { %v3817_v20 = vsub.f32 %v3788_v31, %v3812_v16  ;;  %v4664_v31 = vld [vmem:[%s7976_s7 + $0x1] ss:$0 sm:$0xff] }
 0xe67   :  { %v3802_v41 = vpop.xlane.xlu1 %3801 }
 0xe68   :  { %v3813_v11 = vmul.f32 0.03125, %v3802_v41  ;;  %v3822_v9 = vmul.f32 %v3817_v20, %v3817_v20 }
 0xe6a   :  { %v3818_v18 = vsub.f32 %v3789_v12, %v3813_v11  ;;  %v3827_v19 = vsel %vm191_vm2, %v3822_v9, 0.0  ;;  %v4665_v12 = vld [vmem:[%s7977_s8 + $0x1] ss:$0 sm:$0xff] }
 0xe6b   :  { %v3805_v21 = vpop.xlane.xlu0 %3804  ;;  %3828 = vadd.xlane.f32.xlu1 %v3827_v19  ;;  %v4678_v19 = vld [vmem:[%s7980_s11 + $0x48] sm:$0xff] }
 0xe6c   :  { %v3814_v26 = vmul.f32 0.03125, %v3805_v21  ;;  %v3823_v38 = vmul.f32 %v3818_v18, %v3818_v18 }
 0xe6e   :  { %v3819_v60 = vsub.f32 %v3790_v50, %v3814_v26  ;;  %v3830_v48 = vsel %vm191_vm2, %v3823_v38, 0.0  ;;  %v4679_v26 = vld [vmem:[%s7980_s11 + $0x50] sm:$0xff]  ;;  %v4680_v38 = vld [vmem:[%s7980_s11 + $0x58] sm:$0xff] }
 0xe6f   :  { %v3808_v51 = vpop.xlane.xlu1 %3807  ;;  %3831 = vadd.xlane.f32.xlu0 %v3830_v48  ;;  %v4681_v48 = vld [vmem:[%s7980_s11 + $0x60] sm:$0xff] }
 0xe70   :  { %v3815_v13 = vmul.f32 0.03125, %v3808_v51  ;;  %v3824_v7 = vmul.f32 %v3819_v60, %v3819_v60  ;;  %v4682_v51 = vld [vmem:[%s7980_s11 + $0x68] sm:$0xff] }
 0xe72   :  { %v3820_v62 = vsub.f32 %v3791_v29, %v3815_v13  ;;  %v3833_v40 = vsel %vm191_vm2, %v3824_v7, 0.0  ;;  %v5941_v13 = vpack.c.bf16 %v4682_v51, %v4681_v48  ;;  %v4683_v7 = vld [vmem:[%s7980_s11 + $0x70] sm:$0xff] }
 0xe73   :  { %3834 = vadd.xlane.f32.xlu1 %v3833_v40  ;;  %v3811_v36 = vpop.xlane.xlu0 %3810 }
 0xe74   :  { %v3816_v33 = vmul.f32 0.03125, %v3811_v36  ;;  %v3825_v53 = vmul.f32 %v3820_v62, %v3820_v62  ;;  %v4671_v36 = vld [vmem:[%s7979_s10 + $0x1] ss:$0 sm:$0xff] }
 0xe76   :  { %v3821_v55 = vsub.f32 %v3792_v46, %v3816_v33  ;;  %v3836_v57 = vsel %vm191_vm2, %v3825_v53, 0.0 }
 0xe77   :  { %3837 = vadd.xlane.f32.xlu0 %v3836_v57 }
 0xe78   :  { %v3826_v56 = vmul.f32 %v3821_v55, %v3821_v55 }
 0xe7a   :  { %v3839_v37 = vsel %vm1787_vm7, %v3826_v56, 0.0 }
 0xe7b   :  { %3840 = vadd.xlane.f32.xlu1 %v3839_v37 }
 0xef8   :  { %v3829_v35 = vpop.xlane.xlu1 %3828 }
 0xef9   :  { %v3842_v0 = vmul.f32 0.03125, %v3829_v35 }
 0xefb   :  { %v3847_v4 = vadd.f32 1e-05, %v3842_v0 }
 0xefc   :  { %v3832_v32 = vpop.xlane.xlu0 %3831 }
 0xefd   :  { %6152 = vrsqrt.f32 %v3847_v4  ;;  %v3843_v49 = vmul.f32 0.03125, %v3832_v32 }
 0xeff   :  { %v3848_v28 = vadd.f32 1e-05, %v3843_v49 }
 0xf00   :  { %v3835_v58 = vpop.xlane.xlu1 %3834 }
 0xf01   :  { %6154 = vrsqrt.f32 %v3848_v28  ;;  %v3844_v39 = vmul.f32 0.03125, %v3835_v58 }
 0xf03   :  { %v3849_v10 = vadd.f32 1e-05, %v3844_v39 }
 0xf04   :  { %v3838_v2 = vpop.xlane.xlu0 %3837 }
 0xf05   :  { %6156 = vrsqrt.f32 %v3849_v10  ;;  %v3845_v34 = vmul.f32 0.03125, %v3838_v2 }
 0xf07   :  { %v6153_v27 = vpop.eup %6152  ;;  %v3850_v47 = vadd.f32 1e-05, %v3845_v34 }
 0xf08   :  { %v3857_v17 = vmul.f32 %v6153_v27, %v3817_v20  ;;  %v3841_v22 = vpop.xlane.xlu1 %3840 }
 0xf09   :  { %6158 = vrsqrt.f32 %v3850_v47  ;;  %v3846_v23 = vmul.f32 0.03125, %v3841_v22 }
 0xf0a   :  { %v3868_v59 = vmul.f32 %v4664_v31, %v3857_v17 }
 0xf0b   :  { %v6155_v15 = vpop.eup %6154  ;;  %v3851_v50 = vadd.f32 1e-05, %v3846_v23 }
 0xf0c   :  { %v7833_v61 = vadd.f32 %v4665_v12, %v3868_v59  ;;  %v3858_v52 = vmul.f32 %v6155_v15, %v3818_v18  ;;  %v4677_v18 = vld [vmem:[%s7980_s11 + $0x40] sm:$0xff] }
 0xf0d   :  { %6160 = vrsqrt.f32 %v3851_v50  ;;  %v5935_v21 = vpack.c.bf16 %v4678_v19, %v4677_v18 }
 0xf0e   :  { %5672 = vmatmul.mubr.msk.f32.vlgmr.msra.gmra.mrb[130].mxu0 %vm191_vm2, %v7833_v61  ;;  %v3869_v44 = vmul.f32 %v4664_v31, %v3858_v52 }
 0xf0f   :  { %v6157_v29 = vpop.eup %6156  ;;  %5674 = vmatprep.mubr.msk.f32.mxu0 %vm6216_vm0, %v6217_v6  ;;  %5936 = vmatpush3.bf16.msra.mxu1 %v5935_v21 }
 0xf10   :  { %v7839_v24 = vadd.f32 %v4665_v12, %v3869_v44  ;;  %v3859_v5 = vmul.f32 %v6157_v29, %v3819_v60  ;;  %5937 = vmatprep.subr.bf16.mxu1 %v6215_v3  ;;  %v5938_v60 = vpack.c.bf16 %v4680_v38, %v4679_v26 }
 0xf12   :  { %5675 = vmatmul.mubr.msk.f32.gmra.mrb[132].mxu0 %vm191_vm2, %v7839_v24  ;;  %v3870_v14 = vmul.f32 %v4664_v31, %v3859_v5 }
 0xf13   :  { %v6159_v46 = vpop.eup %6158  ;;  %5677 = vmatprep.mubr.msk.f32.mxu0 %vm6216_vm0, %v6217_v6  ;;  %5939 = vmatpush3.bf16.msra.mxu1 %v5938_v60 }
 0xf14   :  { %v7845_v54 = vadd.f32 %v4665_v12, %v3870_v14  ;;  %v3860_v25 = vmul.f32 %v6159_v46, %v3820_v62  ;;  %5940 = vmatprep.subr.bf16.mxu1 %v6215_v3  ;;  %v4684_v62 = vld [vmem:[%s7980_s11 + $0x78] sm:$0xff] }
 0xf15   :  { %v5944_v40 = vpack.c.bf16 %v4684_v62, %v4683_v7 }
 0xf16   :  { %5678 = vmatmul.mubr.msk.f32.gmra.mrb[134].mxu0 %vm191_vm2, %v7845_v54  ;;  %v3871_v1 = vmul.f32 %v4664_v31, %v3860_v25 }
 0xf17   :  { %v6161_v16 = vpop.eup %6160  ;;  %5680 = vmatprep.mubr.msk.f32.mxu0 %vm6216_vm0, %v6217_v6  ;;  %5942 = vmatpush3.bf16.msra.mxu1 %v5941_v13 }
 0xf18   :  { %v7851_v20 = vadd.f32 %v4665_v12, %v3871_v1  ;;  %v3861_v41 = vmul.f32 %v6161_v16, %v3821_v55  ;;  %5943 = vmatprep.subr.bf16.mxu1 %v6215_v3 }
 0xf1a   :  { %5681 = vmatmul.mubr.msk.f32.gmra.mrb[136].mxu0 %vm191_vm2, %v7851_v20  ;;  %v3872_v11 = vmul.f32 %v4664_v31, %v3861_v41 }
 0xf1b   :  { %5683 = vmatprep.mubr.msk.f32.mxu0 %vm6216_vm0, %v6217_v6  ;;  %5945 = vmatpush3.bf16.msra.mxu1 %v5944_v40 }
 0xf1c   :  { %v7857_v9 = vadd.f32 %v4665_v12, %v3872_v11 }
 0xf1e   :  { %5684 = vmatmul.mubr.msk.f32.gmra.mrb[138].mxu0 %vm191_vm2, %v7857_v9 }
 0xf1f   :  { %5727 = vmatprep.mubr.msk.f32.mxu0 %vm6216_vm0, %v6217_v6 }
 0xfe1   :  { %v3978_v33 = vpop.f32.mrb[130].mxu0 }
 0xfe2   :  { %v3979_v53 = vadd.f32 %v4671_v36, %v3978_v33  ;;  %v5673_v55 = vpop.f32.mrb[131].mxu0 }
 0xfe4   :  { %v4007_v57 = vmul.f32 %v3979_v53, %v3979_v53  ;;  %v4002_v25 = vmul.f32 0.5, %v3979_v53 }
 0xfe5   :  { %v3983_v56 = vpop.f32.mrb[132].mxu0 }
 0xfe6   :  { %v4012_v37 = vmul.f32 %v4007_v57, %v3979_v53  ;;  %v3984_v30 = vadd.f32 %v4671_v36, %v3983_v56  ;;  %v5676_v45 = vpop.f32.mrb[133].mxu0  ;;  %v4686_v57 = vld [vmem:[%s7981_s12 + $0x1] ss:$0 sm:$0xff] }
 0xfe8   :  { %v4017_v63 = vmul.f32 0.044715, %v4012_v37  ;;  %v4008_v42 = vmul.f32 %v3984_v30, %v3984_v30  ;;  %v4003_v19 = vmul.f32 0.5, %v3984_v30 }
 0xfe9   :  { %v3988_v43 = vpop.f32.mrb[134].mxu0 }
 0xfea   :  { %v4022_v8 = vadd.f32 %v4017_v63, %v3979_v53  ;;  %v4013_v35 = vmul.f32 %v4008_v42, %v3984_v30  ;;  %v3989_v0 = vadd.f32 %v4671_v36, %v3988_v43  ;;  %v5679_v4 = vpop.f32.mrb[135].mxu0 }
 0xfec   :  { %v4027_v32 = vmul.f32 0.7978846, %v4022_v8  ;;  %v4018_v49 = vmul.f32 0.044715, %v4013_v35  ;;  %v4009_v28 = vmul.f32 %v3989_v0, %v3989_v0  ;;  %v4004_v60 = vmul.f32 0.5, %v3989_v0 }
 0xfed   :  { %v3993_v58 = vpop.f32.mrb[136].mxu0 }
 0xfee   :  { %6162 = vtanh.f32 %v4027_v32  ;;  %v4023_v39 = vadd.f32 %v4018_v49, %v3984_v30  ;;  %v4014_v10 = vmul.f32 %v4009_v28, %v3989_v0  ;;  %v3994_v2 = vadd.f32 %v4671_v36, %v3993_v58  ;;  %v5682_v34 = vpop.f32.mrb[137].mxu0 }
 0xff0   :  { %v4028_v27 = vmul.f32 0.7978846, %v4023_v39  ;;  %v4019_v31 = vmul.f32 0.044715, %v4014_v10  ;;  %v4010_v47 = vmul.f32 %v3994_v2, %v3994_v2  ;;  %v4005_v7 = vmul.f32 0.5, %v3994_v2 }
 0xff1   :  { %v3998_v17 = vpop.f32.mrb[138].mxu0 }
 0xff2   :  { %6164 = vtanh.f32 %v4028_v27  ;;  %v4024_v22 = vadd.f32 %v4019_v31, %v3989_v0  ;;  %v4015_v12 = vmul.f32 %v4010_v47, %v3994_v2  ;;  %v3999_v23 = vadd.f32 %v4671_v36, %v3998_v17  ;;  %v5685_v59 = vpop.f32.mrb[139].mxu0 }
 0xff4   :  { %v4029_v15 = vmul.f32 0.7978846, %v4024_v22  ;;  %v4020_v50 = vmul.f32 0.044715, %v4015_v12  ;;  %v4011_v52 = vmul.f32 %v3999_v23, %v3999_v23  ;;  %v4006_v33 = vmul.f32 0.5, %v3999_v23 }
 0xff6   :  { %6166 = vtanh.f32 %v4029_v15  ;;  %v4025_v44 = vadd.f32 %v4020_v50, %v3994_v2  ;;  %v4016_v29 = vmul.f32 %v4011_v52, %v3999_v23 }
 0xff8   :  { %v6163_v5 = vpop.eup %6162  ;;  %v4030_v14 = vmul.f32 0.7978846, %v4025_v44  ;;  %v4021_v46 = vmul.f32 0.044715, %v4016_v29 }
 0xff9   :  { %v4037_v1 = vadd.f32 1.0, %v6163_v5 }
 0xffa   :  { %6168 = vtanh.f32 %v4030_v14  ;;  %v4026_v16 = vadd.f32 %v4021_v46, %v3999_v23 }
 0xffb   :  { %v4042_v41 = vmul.f32 %v4037_v1, %v4002_v25 }
 0xffc   :  { %v6165_v11 = vpop.eup %6164  ;;  %v4031_v18 = vmul.f32 0.7978846, %v4026_v16 }
 0xffd   :  { %5703 = vmatmul.mubr.msk.f32.vlgmr.msra.gmra.mrb[140].mxu1 %vm2040_vm8, %v4042_v41  ;;  %v4038_v21 = vadd.f32 1.0, %v6165_v11 }
 0xffe   :  { %6170 = vtanh.f32 %v4031_v18  ;;  %5705 = vmatprep.mubr.msk.f32.mxu1 %vm6216_vm0, %v6217_v6 }
 0xfff   :  { %v4043_v26 = vmul.f32 %v4038_v21, %v4003_v19 }
0x1000   :  { %v6167_v38 = vpop.eup %6166 }
0x1001   :  { %5706 = vmatmul.mubr.msk.f32.gmra.mrb[142].mxu1 %vm2040_vm8, %v4043_v26  ;;  %v4039_v48 = vadd.f32 1.0, %v6167_v38 }
0x1002   :  { %5708 = vmatprep.mubr.msk.f32.mxu1 %vm6216_vm0, %v6217_v6 }
0x1003   :  { %v4044_v51 = vmul.f32 %v4039_v48, %v4004_v60 }
0x1004   :  { %v6169_v13 = vpop.eup %6168 }
0x1005   :  { %5709 = vmatmul.mubr.msk.f32.gmra.mrb[144].mxu1 %vm2040_vm8, %v4044_v51  ;;  %v4040_v62 = vadd.f32 1.0, %v6169_v13 }
0x1006   :  { %5711 = vmatprep.mubr.msk.f32.mxu1 %vm6216_vm0, %v6217_v6 }
0x1007   :  { %v4045_v40 = vmul.f32 %v4040_v62, %v4005_v7 }
0x1008   :  { %v6171_v36 = vpop.eup %6170 }
0x1009   :  { %5712 = vmatmul.mubr.msk.f32.gmra.mrb[146].mxu1 %vm2040_vm8, %v4045_v40  ;;  %v4041_v53 = vadd.f32 1.0, %v6171_v36 }
0x100a   :  { %5714 = vmatprep.mubr.msk.f32.mxu1 %vm6216_vm0, %v6217_v6 }
0x100b   :  { %v4046_v55 = vmul.f32 %v4041_v53, %v4006_v33 }
0x100d   :  { %5715 = vmatmul.mubr.msk.f32.gmra.mrb[148].mxu1 %vm2040_vm8, %v4046_v55 }
0x10d0   :  { %v4145_v56 = vpop.f32.mrb[140].mxu1 }
0x10d1   :  { %v4146_v37 = vadd.f32 %v4686_v57, %v4145_v56  ;;  %v5704_v30 = vpop.f32.mrb[141].mxu1 }
0x10d3   :  { %v4169_v45 = vadd.f32 %v4146_v37, %v7833_v61 }
0x10d4   :  { %v4150_v63 = vpop.f32.mrb[142].mxu1 }
0x10d5   :  { %v4151_v42 = vadd.f32 %v4686_v57, %v4150_v63  ;;  %v5707_v43 = vpop.f32.mrb[143].mxu1  ;;  %v4178_v8 = vsel %vm191_vm2, %v4169_v45, 0.0 }
0x10d6   :  { %4179 = vadd.xlane.f32.xlu0 %v4178_v8 }
0x10d7   :  { %v4170_v35 = vadd.f32 %v4151_v42, %v7839_v24 }
0x10d8   :  { %v4155_v0 = vpop.f32.mrb[144].mxu1 }
0x10d9   :  { %v4156_v4 = vadd.f32 %v4686_v57, %v4155_v0  ;;  %v5710_v32 = vpop.f32.mrb[145].mxu1  ;;  %v4181_v49 = vsel %vm191_vm2, %v4170_v35, 0.0  ;;  %v4695_v0 = vld [vmem:[%s7983_s14 + $0x1] ss:$0 sm:$0xff] }
0x10da   :  { %4182 = vadd.xlane.f32.xlu1 %v4181_v49 }
0x10db   :  { %v4171_v28 = vadd.f32 %v4156_v4, %v7845_v54 }
0x10dc   :  { %v4160_v58 = vpop.f32.mrb[146].mxu1 }
0x10dd   :  { %v4161_v39 = vadd.f32 %v4686_v57, %v4160_v58  ;;  %v5713_v10 = vpop.f32.mrb[147].mxu1  ;;  %v4184_v61 = vsel %vm191_vm2, %v4171_v28, 0.0 }
0x10de   :  { %4185 = vadd.xlane.f32.xlu0 %v4184_v61 }
0x10df   :  { %v4172_v2 = vadd.f32 %v4161_v39, %v7851_v20 }
0x10e0   :  { %v4165_v34 = vpop.f32.mrb[148].mxu1 }
0x10e1   :  { %v4166_v27 = vadd.f32 %v4686_v57, %v4165_v34  ;;  %v5716_v31 = vpop.f32.mrb[149].mxu1  ;;  %v4187_v24 = vsel %vm191_vm2, %v4172_v2, 0.0 }
0x10e2   :  { %4188 = vadd.xlane.f32.xlu1 %v4187_v24 }
0x10e3   :  { %v4173_v47 = vadd.f32 %v4166_v27, %v7857_v9 }
0x10e5   :  { %v4190_v17 = vsel %vm1787_vm7, %v4173_v47, 0.0 }
0x10e6   :  { %4191 = vadd.xlane.f32.xlu0 %v4190_v17 }
0x1163   :  { %v4180_v54 = vpop.xlane.xlu0 %4179 }
0x1164   :  { %v4193_v22 = vmul.f32 0.03125, %v4180_v54 }
0x1166   :  { %v4198_v12 = vsub.f32 %v4169_v45, %v4193_v22  ;;  %v4694_v45 = vld [vmem:[%s7982_s13 + $0x1] ss:$0 sm:$0xff] }
0x1167   :  { %v4183_v23 = vpop.xlane.xlu1 %4182  ;;  %v4342_v22 = vld [vmem:[%s7985_s16] sm:$0xff] }
0x1168   :  { %v4194_v59 = vmul.f32 0.03125, %v4183_v23  ;;  %v4203_v15 = vmul.f32 %v4198_v12, %v4198_v12 }
0x116a   :  { %v4199_v50 = vsub.f32 %v4170_v35, %v4194_v59  ;;  %v4208_v20 = vsel %vm191_vm2, %v4203_v15, 0.0  ;;  %v4265_v59 = vld [vmem:[%s7984_s15] sm:$0x3] }
0x116b   :  { %v4186_v52 = vpop.xlane.xlu0 %4185  ;;  %4209 = vadd.xlane.f32.xlu1 %v4208_v20  ;;  %v4345_v20 = vld [vmem:[%s7985_s16 + $0x18] sm:$0xff] }
0x116c   :  { %v4195_v44 = vmul.f32 0.03125, %v4186_v52  ;;  %v4204_v29 = vmul.f32 %v4199_v50, %v4199_v50 }
0x116e   :  { %v4200_v5 = vsub.f32 %v4171_v28, %v4195_v44  ;;  %v4211_v14 = vsel %vm191_vm2, %v4204_v29, 0.0 }
0x116f   :  { %v4189_v9 = vpop.xlane.xlu1 %4188  ;;  %4212 = vadd.xlane.f32.xlu0 %v4211_v14 }
0x1170   :  { %v4196_v46 = vmul.f32 0.03125, %v4189_v9  ;;  %v4205_v25 = vmul.f32 %v4200_v5, %v4200_v5 }
0x1172   :  { %v4201_v1 = vsub.f32 %v4172_v2, %v4196_v46  ;;  %v4214_v16 = vsel %vm191_vm2, %v4205_v25, 0.0 }
0x1173   :  { %4215 = vadd.xlane.f32.xlu1 %v4214_v16  ;;  %v4192_v41 = vpop.xlane.xlu0 %4191 }
0x1174   :  { %v4197_v11 = vmul.f32 0.03125, %v4192_v41  ;;  %v4206_v18 = vmul.f32 %v4201_v1, %v4201_v1 }
0x1176   :  { %v4202_v19 = vsub.f32 %v4173_v47, %v4197_v11  ;;  %v4217_v21 = vsel %vm191_vm2, %v4206_v18, 0.0 }
0x1177   :  { %4218 = vadd.xlane.f32.xlu0 %v4217_v21 }
0x1178   :  { %v4207_v26 = vmul.f32 %v4202_v19, %v4202_v19 }
0x117a   :  { %v4220_v38 = vsel %vm1787_vm7, %v4207_v26, 0.0 }
0x117b   :  { %4221 = vadd.xlane.f32.xlu1 %v4220_v38 }
0x11f8   :  { %v4210_v60 = vpop.xlane.xlu1 %4209 }
0x11f9   :  { %v4223_v48 = vmul.f32 0.03125, %v4210_v60 }
0x11fb   :  { %v4228_v51 = vadd.f32 1e-05, %v4223_v48 }
0x11fc   :  { %v4213_v13 = vpop.xlane.xlu0 %4212 }
0x11fd   :  { %6172 = vrsqrt.f32 %v4228_v51  ;;  %v4224_v7 = vmul.f32 0.03125, %v4213_v13 }
0x11ff   :  { %v4229_v62 = vadd.f32 1e-05, %v4224_v7 }
0x1200   :  { %v4216_v40 = vpop.xlane.xlu1 %4215 }
0x1201   :  { %6174 = vrsqrt.f32 %v4229_v62  ;;  %v4225_v36 = vmul.f32 0.03125, %v4216_v40 }
0x1203   :  { %v4230_v33 = vadd.f32 1e-05, %v4225_v36 }
0x1204   :  { %v4219_v53 = vpop.xlane.xlu0 %4218 }
0x1205   :  { %6176 = vrsqrt.f32 %v4230_v33  ;;  %v4226_v55 = vmul.f32 0.03125, %v4219_v53 }
0x1207   :  { %v6173_v57 = vpop.eup %6172  ;;  %v4231_v56 = vadd.f32 1e-05, %v4226_v55 }
0x1208   :  { %v4238_v37 = vmul.f32 %v6173_v57, %v4198_v12  ;;  %v4222_v30 = vpop.xlane.xlu1 %4221  ;;  %v4343_v12 = vld [vmem:[%s7985_s16 + $0x8] sm:$0xff] }
0x1209   :  { %6178 = vrsqrt.f32 %v4231_v56  ;;  %v4227_v63 = vmul.f32 0.03125, %v4222_v30  ;;  %v5953_v15 = vpack.c.bf16 %v4343_v12, %v4342_v22 }
0x120a   :  { %v4249_v35 = vmul.f32 %v4694_v45, %v4238_v37 }
0x120b   :  { %v6175_v42 = vpop.eup %6174  ;;  %v4232_v43 = vadd.f32 1e-05, %v4227_v63 }
0x120c   :  { %v4239_v8 = vmul.f32 %v6175_v42, %v4199_v50  ;;  %v4260_v28 = vadd.f32 %v4695_v0, %v4249_v35  ;;  %v4344_v50 = vld [vmem:[%s7985_s16 + $0x10] sm:$0xff] }
0x120d   :  { %6180 = vrsqrt.f32 %v4232_v43  ;;  %v5956_v52 = vpack.c.bf16 %v4345_v20, %v4344_v50 }
0x120e   :  { %v4250_v4 = vmul.f32 %v4694_v45, %v4239_v8 }
0x120f   :  { %v6177_v32 = vpop.eup %6176 }
0x1210   :  { %v4240_v49 = vmul.f32 %v6177_v32, %v4200_v5  ;;  %v4261_v58 = vadd.f32 %v4695_v0, %v4250_v4  ;;  %v4698_v5 = vld [vmem:[%s7986_s17] ss:$0 sm:$0xff] }
0x1212   :  { %v5947_v39 = vpack.c.bf16 %v4261_v58, %v4260_v28  ;;  %v4251_v2 = vmul.f32 %v4694_v45, %v4240_v49 }
0x1213   :  { %v6179_v10 = vpop.eup %6178 }
0x1214   :  { %v4241_v61 = vmul.f32 %v6179_v10, %v4201_v1  ;;  %5948 = vmatpush3.bf16.msra.mxu0 %v5947_v39  ;;  %v4262_v24 = vadd.f32 %v4695_v0, %v4251_v2 }
0x1215   :  { %5949 = vmatprep.subr.bf16.mxu0 %v6215_v3 }
0x1216   :  { %v4252_v34 = vmul.f32 %v4694_v45, %v4241_v61 }
0x1217   :  { %v6181_v27 = vpop.eup %6180 }
0x1218   :  { %v4242_v31 = vmul.f32 %v6181_v27, %v4202_v19  ;;  %v4263_v47 = vadd.f32 %v4695_v0, %v4252_v34 }
0x121a   :  { %v4253_v17 = vmul.f32 %v4694_v45, %v4242_v31  ;;  %v5950_v54 = vpack.c.bf16 %v4263_v47, %v4262_v24 }
0x121c   :  { %5951 = vmatpush3.bf16.msra.mxu0 %v5950_v54  ;;  %v4264_v23 = vadd.f32 %v4695_v0, %v4253_v17 }
0x121d   :  { %5725 = vmatprep.subr.mxu0 %v6217_v6 }
0x1220   :  { %5726 = vmatpush3.msk.msra.mxu0 %vm681_vm3, %v4264_v23 }
0x1221   :  { %5728 = vmatmul.mubr.msk.f32.vlgmr.msra.gmra.mrb[140].mxu0 %vm619_vm5, %v4265_v59  ;;  %5952 = vmatprep.subr.bf16.mxu0 %v6215_v3 }
0x1222   :  { %5954 = vmatpush3.bf16.msra.mxu0 %v5953_v15  ;;  %5738 = vmatprep.mubr.msk.f32.mxu0 %vm6216_vm0, %v6217_v6 }
0x1223   :  { %5955 = vmatprep.subr.bf16.mxu0 %v6215_v3 }
0x1226   :  { %5957 = vmatpush3.bf16.msra.mxu0 %v5956_v52 }
0x12f4   :  { %v4338_v44 = vpop.f32.mrb[140].mxu0 }
0x12f5   :  { %v5729_v29 = vpop.f32.mrb[141].mxu0  ;;  %5739 = vmatmul.mubr.msk.f32.vlgmr.msra.gmra.mrb[142].mxu0 %vm191_vm2, %v4338_v44 }
0x13c8   :  { %v4422_v14 = vpop.f32.mrb[142].mxu0 }
0x13c9   :  { %v4423_v9 = vadd.f32 %v4698_v5, %v4422_v14  ;;  %v5740_v46 = vpop.f32.mrb[143].mxu0 }
0x13cb   :  { %4427 = vst.msk [vmem:[#allocation2] sm:$0x3] %vm4426_vm9, %v4423_v9 }
0x13cc   :  { %6202 = shalt.err (!%p6199_p4)
}
0x13cd   :  { %s6203_s30 = scalar_lea.hbm %s7987_s18, 32 }
0x13ce   :  { %p6204_p5 = scmp.ne.s32.totalorder %s7987_s18, %s6203_s30  ;;  %p6207_p6 = scmp.lt.u32.totalorder %s6203_s30, %s7987_s18 }
0x13d0   :  { %p6209_p7 = pnand %p6207_p6, %p6204_p5 }
0x13d2   :  { %6212 = shalt.err (!%p6209_p7)
}
0x13d3   :  { %4437 = dma.vmem_to_hbm [thread:$0]  %s4435_s27, 32, %s7987_s18, [#allocation3]  }
0x13d4   :  { %6213 = dma.done.wait [#allocation3], 32  }
0x13d5   :  { %6214 = vsyncadd [#allocation3], 4294967264 }
0x13d6   :  { %4441 = vsyncpa [#allocation3], 1 }

</bundles_post_ra>
